<compile_context>
chip_gen: v7x
topology: tpu7x:2x2x1
jax: 0.10.0
libtpu: 0.0.40
codegen_flags: <defaults>
</compile_context>

<pallas_src>
import functools

import jax
import jax.numpy as jnp
import numpy as np
from jax.experimental import pallas as pl
from jax.experimental.pallas import tpu as pltpu

EPS = 1e-5
NEG_SLOPE = 0.01
MATMUL_DTYPE = jnp.bfloat16   # MXU-native on v5e/v6e/v7x; accumulation stays f32
ACT_DTYPE = jnp.bfloat16      # inter-pass activation storage (halves HBM traffic)


def _leaky(v):
    return jnp.where(v > 0, v, NEG_SLOPE * v)


def _vmem_limit_bytes():
    """Generation-aware VMEM budget: ~96 MiB on v5e/v6e (128 MiB phys),
    ~48 MiB on v7x (64 MiB phys)."""
    try:
        cap = int(pltpu.get_tpu_info().vmem_capacity_bytes)
    except Exception:
        cap = 64 * 1024 * 1024
    return min(max(cap * 3 // 4, 32 * 1024 * 1024), 112 * 1024 * 1024)


def _tile_bytes(th, W, C):
    img = 2 * (th + 2) * W * C * 4          # double-buffered input slab + halo (f32)
    col = 2 * th * W * 3 * C * 4            # ~2 live kx im2col slabs
    out = 3 * th * W * C * 4                # double-buffered y block + accumulator
    return img + col + out


def _pick_tile_h(H, W, C, budget_bytes):
    for d in range(H, 0, -1):
        if H % d == 0 and _tile_bytes(d, W, C) <= budget_bytes:
            return d
    return 1


def _conv_kernel(*refs, apply_affine_act):
    """3x3 SAME conv on one (TILE_H, W, C) row slab of one image.

    kx-grouped im2col: ky shifts are cheap leading-dim offsets, kx shifts are
    XLU rolls + one-column mask; three K=3C bf16 matmuls accumulate into an
    f32 accumulator.  Optionally applies the previous layer's folded BN affine
    + leaky_relu to the input first.  Emits per-tile (mean, centered M2) BN
    statistics in f32 (computed before the bf16 activation store).
    """
    if apply_affine_act:
        (x_ref, halo_ref, scale_ref, shift_ref, w_ref, b_ref,
         y_ref, stats_ref) = refs
    else:
        x_ref, halo_ref, w_ref, b_ref, y_ref, stats_ref = refs
        scale_ref = shift_ref = None

    _, TH, W, C = x_ref.shape
    a = x_ref[0].astype(jnp.float32)            # (TH, W, C)
    halo = halo_ref[0, 0].astype(jnp.float32)   # (2, W, C): rows above / below

    if apply_affine_act:   # folded BN1 affine + leaky_relu (elementwise, f32)
        s, t = scale_ref[...], shift_ref[...]
        a = _leaky(a * s + t)
        halo = _leaky(halo * s + t)

    # At the image top/bottom the halo rows are the conv's zero padding in the
    # *post*-affine domain, so zero them after the transform.
    r, nr = pl.program_id(1), pl.num_programs(1)
    top = jnp.where(r == 0, jnp.zeros_like(halo[0:1]), halo[0:1])
    bot = jnp.where(r == nr - 1, jnp.zeros_like(halo[1:2]), halo[1:2])
    ap = jnp.concatenate([top, a, bot], axis=0)          # (TH+2, W, C)

    wcol = jax.lax.broadcasted_iota(jnp.int32, ap.shape, 1)
    acc = jnp.zeros((TH * W, C), jnp.float32)
    for kx in range(3):
        if kx == 1:
            sh = ap
        else:
            # W shift on the XLU (no sublane-axis concat); zero the wrapped
            # column = SAME zero padding along W.
            sh = pltpu.roll(ap, shift=1 if kx == 0 else W - 1, axis=1)
            edge = 0 if kx == 0 else W - 1
            sh = jnp.where(wcol == edge, 0.0, sh)
        col = jnp.concatenate([sh[ky:ky + TH] for ky in range(3)],
                              axis=-1).reshape(TH * W, 3 * C)
        acc = acc + jnp.dot(col.astype(MATMUL_DTYPE), w_ref[kx],
                            preferred_element_type=jnp.float32)
    y = acc + b_ref[...]                                  # (TH*W, C) f32

    # Per-tile BN stats: mean + centered sum of squares (stable Chan combine
    # happens in the wrapper).
    mean = jnp.sum(y, axis=0, keepdims=True) * (1.0 / (TH * W))
    m2 = jnp.sum((y - mean) * (y - mean), axis=0, keepdims=True)
    stats_ref[0, 0] = jnp.concatenate([mean, m2], axis=0)   # (2, C)

    y_ref[0] = y.reshape(TH, W, C).astype(y_ref.dtype)


def _finalize_kernel(y2_ref, x_ref, scale_ref, shift_ref, out_ref):
    """out = leaky_relu( BN2(y2) + residual ), BN2 folded to scale/shift."""
    z = y2_ref[0].astype(jnp.float32) * scale_ref[...] + shift_ref[...] + x_ref[0]
    out_ref[0] = _leaky(z)


def _conv_call(N, H, W, C, th, *, apply_affine_act, vmem):
    R = H // th
    img_in = pl.BlockSpec((1, th, W, C), lambda n, r: (n, r, 0, 0))
    halo_in = pl.BlockSpec((1, 1, 2, W, C), lambda n, r: (n, r, 0, 0, 0))
    w_spec = pl.BlockSpec((3, 3 * C, C), lambda n, r: (0, 0, 0))
    vec = lambda: pl.BlockSpec((1, C), lambda n, r: (0, 0))
    y_out = pl.BlockSpec((1, th, W, C), lambda n, r: (n, r, 0, 0))
    st_out = pl.BlockSpec((1, 1, 2, C), lambda n, r: (n, r, 0, 0))

    in_specs = [img_in, halo_in]
    if apply_affine_act:
        in_specs += [vec(), vec()]
    in_specs += [w_spec, vec()]

    return pl.pallas_call(
        functools.partial(_conv_kernel, apply_affine_act=apply_affine_act),
        out_shape=(jax.ShapeDtypeStruct((N, H, W, C), ACT_DTYPE),
                   jax.ShapeDtypeStruct((N, R, 2, C), jnp.float32)),
        grid=(N, R),
        in_specs=in_specs,
        out_specs=(y_out, st_out),
        compiler_params=pltpu.CompilerParams(
            dimension_semantics=("parallel", "parallel"),
            vmem_limit_bytes=vmem),
    )


def _finalize_call(N, H, W, C, th, vmem):
    img = lambda: pl.BlockSpec((1, th, W, C), lambda n, r: (n, r, 0, 0))
    vec = lambda: pl.BlockSpec((1, C), lambda n, r: (0, 0))
    return pl.pallas_call(
        _finalize_kernel,
        out_shape=jax.ShapeDtypeStruct((N, H, W, C), jnp.float32),
        grid=(N, H // th),
        in_specs=[img(), img(), vec(), vec()],
        out_specs=img(),
        input_output_aliases={1: 0},          # out reuses the residual's buffer
        compiler_params=pltpu.CompilerParams(
            dimension_semantics=("parallel", "parallel"),
            vmem_limit_bytes=vmem),
    )


def _bn_fold(stats, gamma, beta, tile_count, total_count):
    """Global training-mode BN from per-tile (mean, M2) via Chan combine."""
    means = stats[:, :, 0, :]                             # (N, R, C)
    m2s = stats[:, :, 1, :]
    grand = jnp.mean(means, axis=(0, 1))                  # equal-count tiles
    m2 = jnp.sum(m2s, axis=(0, 1)) \
        + tile_count * jnp.sum((means - grand) ** 2, axis=(0, 1))
    var = m2 / total_count                                # biased (PyTorch BN)
    scale = gamma * jax.lax.rsqrt(var + EPS)
    shift = beta - grand * scale
    return scale.reshape(1, -1), shift.reshape(1, -1)


def residual_block_pallas_nhwc(x, params, tile_h=None):
    """x: (N, H, W, C) float32 -> (N, H, W, C) float32."""
    N, H, W, C = x.shape
    w1, b1, g1, bt1, w2, b2, g2, bt2 = params
    vmem = _vmem_limit_bytes()
    th = tile_h if tile_h is not None else _pick_tile_h(H, W, C, vmem // 3)
    assert H % th == 0, "tile_h must divide H"
    count = N * H * W

    def pack_w(w):   # (O, I, ky, kx) -> (kx, ky*C_in + i, O), bf16 for the MXU
        return jnp.transpose(w, (3, 2, 1, 0)).reshape(3, 3 * C, C) \
            .astype(MATMUL_DTYPE)

    def make_halo(a):   # rows just above/below each row tile (zeros at borders)
        zrow = jnp.zeros((N, 1, W, C), a.dtype)
        top = jnp.concatenate([zrow, a[:, th - 1:H - 1:th]], axis=1)  # (N,R,W,C)
        bot = jnp.concatenate([a[:, th::th], zrow], axis=1)           # (N,R,W,C)
        return jnp.stack([top, bot], axis=2)                          # (N,R,2,W,C)

    # pass 1: conv1 + bias, fused per-tile BN1 stats (single pass over y1)
    y1, st1 = _conv_call(N, H, W, C, th, apply_affine_act=False, vmem=vmem)(
        x, make_halo(x), pack_w(w1), b1.reshape(1, C))
    scale1, shift1 = _bn_fold(st1, g1, bt1, th * W, count)

    # pass 2: (BN1 + leaky folded into input transform) conv2 + bias, BN2 stats
    y2, st2 = _conv_call(N, H, W, C, th, apply_affine_act=True, vmem=vmem)(
        y1, make_halo(y1), scale1, shift1, pack_w(w2), b2.reshape(1, C))
    scale2, shift2 = _bn_fold(st2, g2, bt2, th * W, count)

    # pass 3: BN2 + residual add + leaky (output aliases the residual buffer)
    return _finalize_call(N, H, W, C, th, vmem)(y2, x, scale2, shift2)


@functools.partial(jax.jit, static_argnames=("tile_h",))
def residual_block_pallas(x_nchw, params, tile_h=None):
    """x_nchw: (N, C, H, W) float32 -> (N, C, H, W) float32 (PyTorch layout)."""
    x = jnp.transpose(x_nchw, (0, 2, 3, 1)).astype(jnp.float32)      # NHWC
    out = residual_block_pallas_nhwc(x, params, tile_h)
    return jnp.transpose(out, (0, 3, 1, 2))


def residual_block_ref(x, params):
    """Pure-JAX reference (NCHW), mirrors the PyTorch forward."""
    w1, b1, g1, bt1, w2, b2, g2, bt2 = params

    def conv(x, w, b):
        y = jax.lax.conv_general_dilated(
            x, w, window_strides=(1, 1), padding="SAME",
            dimension_numbers=("NCHW", "OIHW", "NCHW"))
        return y + b[None, :, None, None]

    def bn(y, g, bt):
        mean = jnp.mean(y, axis=(0, 2, 3), keepdims=True)
        var = jnp.mean((y - mean) ** 2, axis=(0, 2, 3), keepdims=True)
        return (y - mean) * jax.lax.rsqrt(var + EPS) \
            * g[None, :, None, None] + bt[None, :, None, None]

    h = _leaky(bn(conv(x, w1, b1), g1, bt1))
    h = bn(conv(h, w2, b2), g2, bt2)
    return _leaky(h + x)


def init_params(key, C):
    k1, k2, k3, k4 = jax.random.split(key, 4)
    fan_in = C * 3 * 3
    bound = 1.0 / np.sqrt(fan_in)
    w1 = jax.random.uniform(k1, (C, C, 3, 3), jnp.float32, -bound, bound)
    b1 = jax.random.uniform(k2, (C,), jnp.float32, -bound, bound)
    w2 = jax.random.uniform(k3, (C, C, 3, 3), jnp.float32, -bound, bound)
    b2 = jax.random.uniform(k4, (C,), jnp.float32, -bound, bound)
    g1 = jnp.ones((C,), jnp.float32)      # BN weight init (PyTorch: ones)
    bt1 = jnp.zeros((C,), jnp.float32)    # BN bias init (PyTorch: zeros)
    g2 = jnp.ones((C,), jnp.float32)
    bt2 = jnp.zeros((C,), jnp.float32)
    return (w1, b1, g1, bt1, w2, b2, g2, bt2)


if __name__ == "__main__":
    key = jax.random.PRNGKey(0)
    kx_, kp = jax.random.split(key)

    N, C, H, W = 2, 4, 16, 16
    x = jax.random.normal(kx_, (N, C, H, W), jnp.float32)
    params = init_params(kp, C)

    # tile_h=8 exercises the row-tiled (R=2) halo path at toy size.
    out = jax.block_until_ready(residual_block_pallas(x, params, tile_h=8))
    ref = jax.block_until_ready(residual_block_ref(x, params))

    # bf16 MXU operands + bf16 inter-pass activations -> ~1e-2 error band vs
    # the f32 reference (a real tap/mask bug would be O(1)).
    np.testing.assert_allclose(np.asarray(out), np.asarray(ref),
                               rtol=5e-2, atol=5e-2)

    print("KERNEL_OK")
</pallas_src>

<mosaic_0001>
module attributes {stable_mosaic.version = 11 : i64} {
  func.func @_conv_kernel(%arg0: i32, %arg1: i32, %arg2: memref<1x8x16x4xf32, #tpu.memory_space<vmem>>, %arg3: memref<1x1x2x16x4xf32, #tpu.memory_space<vmem>>, %arg4: memref<3x12x4xbf16, #tpu.memory_space<vmem>>, %arg5: memref<1x4xf32, #tpu.memory_space<vmem>>, %arg6: memref<1x8x16x4xbf16, #tpu.memory_space<vmem>>, %arg7: memref<1x1x2x4xf32, #tpu.memory_space<vmem>>) attributes {dimension_semantics = [#tpu.dimension_semantics<parallel>, #tpu.dimension_semantics<parallel>], iteration_bounds = array<i64: 2, 2>, scalar_prefetch = 0 : i64, scratch_operands = 0 : i64, tpu.core_type = #tpu.core_type<tc>, window_params = [{transform_indices = @transform_0, window_bounds = array<i64: 1, 8, 16, 4>}, {transform_indices = @transform_1, window_bounds = array<i64: 1, 1, 2, 16, 4>}, {pipeline_mode = #tpu.pipeline_mode<synchronous>, transform_indices = @transform_2, window_bounds = array<i64: 3, 12, 4>}, {pipeline_mode = #tpu.pipeline_mode<synchronous>, transform_indices = @transform_3, window_bounds = array<i64: 1, 4>}, {transform_indices = @transform_4, window_bounds = array<i64: 1, 8, 16, 4>}, {transform_indices = @transform_5, window_bounds = array<i64: 1, 1, 2, 4>}]} {
    %c0 = arith.constant 0 : index
    %c0_0 = arith.constant 0 : index
    %c0_1 = arith.constant 0 : index
    %c0_2 = arith.constant 0 : index
    %0 = vector.load %arg2[%c0, %c0_0, %c0_1, %c0_2] : memref<1x8x16x4xf32, #tpu.memory_space<vmem>>, vector<1x8x16x4xf32>
    %1 = vector.shape_cast %0 : vector<1x8x16x4xf32> to vector<8x16x4xf32>
    %c0_3 = arith.constant 0 : index
    %c0_4 = arith.constant 0 : index
    %c0_5 = arith.constant 0 : index
    %c0_6 = arith.constant 0 : index
    %c0_7 = arith.constant 0 : index
    %2 = vector.load %arg3[%c0_3, %c0_4, %c0_5, %c0_6, %c0_7] : memref<1x1x2x16x4xf32, #tpu.memory_space<vmem>>, vector<1x1x2x16x4xf32>
    %3 = vector.shape_cast %2 : vector<1x1x2x16x4xf32> to vector<2x16x4xf32>
    %c0_i32 = arith.constant 0 : i32
    %4 = arith.cmpi eq, %arg1, %c0_i32 : i32
    %cst = arith.constant 0.000000e+00 : f32
    %5 = vector.broadcast %cst : f32 to vector<1x16x4xf32>
    %6 = vector.extract_strided_slice %3 {offsets = [0, 0, 0], sizes = [1, 16, 4], strides = [1, 1, 1]} : vector<2x16x4xf32> to vector<1x16x4xf32>
    %7 = arith.select %4, %5, %6 : vector<1x16x4xf32>
    %c1_i32 = arith.constant 1 : i32
    %8 = arith.cmpi eq, %arg1, %c1_i32 : i32
    %cst_8 = arith.constant 0.000000e+00 : f32
    %9 = vector.broadcast %cst_8 : f32 to vector<1x16x4xf32>
    %10 = vector.extract_strided_slice %3 {offsets = [1, 0, 0], sizes = [1, 16, 4], strides = [1, 1, 1]} : vector<2x16x4xf32> to vector<1x16x4xf32>
    %11 = arith.select %8, %9, %10 : vector<1x16x4xf32>
    %12 = tpu.concatenate %7, %1, %11 in 0 : vector<1x16x4xf32>, vector<8x16x4xf32>, vector<1x16x4xf32> -> vector<10x16x4xf32>
    %13 = tpu.iota {dimensions = array<i32: 1>} : vector<10x16x4xi32>
    %cst_9 = arith.constant 0.000000e+00 : f32
    %14 = vector.broadcast %cst_9 : f32 to vector<128x4xf32>
    %c1_i32_10 = arith.constant 1 : i32
    %15 = tpu.dynamic_rotate %12 by %c1_i32_10 dim 1 : vector<10x16x4xf32>, i32 -> vector<10x16x4xf32>
    %c0_i32_11 = arith.constant 0 : i32
    %16 = vector.broadcast %c0_i32_11 : i32 to vector<10x16x4xi32>
    %17 = arith.cmpi eq, %13, %16 : vector<10x16x4xi32>
    %cst_12 = arith.constant 0.000000e+00 : f32
    %18 = vector.broadcast %cst_12 : f32 to vector<10x16x4xf32>
    %19 = arith.select %17, %18, %15 : vector<10x16x4xi1>, vector<10x16x4xf32>
    %20 = vector.extract_strided_slice %19 {offsets = [0, 0, 0], sizes = [8, 16, 4], strides = [1, 1, 1]} : vector<10x16x4xf32> to vector<8x16x4xf32>
    %21 = vector.extract_strided_slice %19 {offsets = [1, 0, 0], sizes = [8, 16, 4], strides = [1, 1, 1]} : vector<10x16x4xf32> to vector<8x16x4xf32>
    %22 = vector.extract_strided_slice %19 {offsets = [2, 0, 0], sizes = [8, 16, 4], strides = [1, 1, 1]} : vector<10x16x4xf32> to vector<8x16x4xf32>
    %23 = tpu.concatenate %20, %21, %22 in 2 : vector<8x16x4xf32>, vector<8x16x4xf32>, vector<8x16x4xf32> -> vector<8x16x12xf32>
    %24 = vector.shape_cast %23 : vector<8x16x12xf32> to vector<128x12xf32>
    %25 = arith.truncf %24 : vector<128x12xf32> to vector<128x12xbf16>
    %c0_13 = arith.constant 0 : index
    %c0_14 = arith.constant 0 : index
    %c0_15 = arith.constant 0 : index
    %26 = vector.load %arg4[%c0_13, %c0_14, %c0_15] : memref<3x12x4xbf16, #tpu.memory_space<vmem>>, vector<1x12x4xbf16>
    %27 = vector.shape_cast %26 : vector<1x12x4xbf16> to vector<12x4xbf16>
    %cst_16 = arith.constant dense<0.000000e+00> : vector<128x4xf32>
    %28 = tpu.matmul %25, %27, %cst_16 {dimension_numbers = #tpu.dot_dimension_numbers<[1], [0], [0], [1], [0, 0, 1, 1], [], []>} : vector<128x12xbf16>, vector<12x4xbf16>, vector<128x4xf32> -> vector<128x4xf32>
    %29 = arith.addf %14, %28 : vector<128x4xf32>
    %30 = vector.extract_strided_slice %12 {offsets = [0, 0, 0], sizes = [8, 16, 4], strides = [1, 1, 1]} : vector<10x16x4xf32> to vector<8x16x4xf32>
    %31 = vector.extract_strided_slice %12 {offsets = [1, 0, 0], sizes = [8, 16, 4], strides = [1, 1, 1]} : vector<10x16x4xf32> to vector<8x16x4xf32>
    %32 = vector.extract_strided_slice %12 {offsets = [2, 0, 0], sizes = [8, 16, 4], strides = [1, 1, 1]} : vector<10x16x4xf32> to vector<8x16x4xf32>
    %33 = tpu.concatenate %30, %31, %32 in 2 : vector<8x16x4xf32>, vector<8x16x4xf32>, vector<8x16x4xf32> -> vector<8x16x12xf32>
    %34 = vector.shape_cast %33 : vector<8x16x12xf32> to vector<128x12xf32>
    %35 = arith.truncf %34 : vector<128x12xf32> to vector<128x12xbf16>
    %c1 = arith.constant 1 : index
    %c0_17 = arith.constant 0 : index
    %c0_18 = arith.constant 0 : index
    %36 = vector.load %arg4[%c1, %c0_17, %c0_18] : memref<3x12x4xbf16, #tpu.memory_space<vmem>>, vector<1x12x4xbf16>
    %37 = vector.shape_cast %36 : vector<1x12x4xbf16> to vector<12x4xbf16>
    %cst_19 = arith.constant dense<0.000000e+00> : vector<128x4xf32>
    %38 = tpu.matmul %35, %37, %cst_19 {dimension_numbers = #tpu.dot_dimension_numbers<[1], [0], [0], [1], [0, 0, 1, 1], [], []>} : vector<128x12xbf16>, vector<12x4xbf16>, vector<128x4xf32> -> vector<128x4xf32>
    %39 = arith.addf %29, %38 : vector<128x4xf32>
    %c15_i32 = arith.constant 15 : i32
    %40 = tpu.dynamic_rotate %12 by %c15_i32 dim 1 : vector<10x16x4xf32>, i32 -> vector<10x16x4xf32>
    %c15_i32_20 = arith.constant 15 : i32
    %41 = vector.broadcast %c15_i32_20 : i32 to vector<10x16x4xi32>
    %42 = arith.cmpi eq, %13, %41 : vector<10x16x4xi32>
    %cst_21 = arith.constant 0.000000e+00 : f32
    %43 = vector.broadcast %cst_21 : f32 to vector<10x16x4xf32>
    %44 = arith.select %42, %43, %40 : vector<10x16x4xi1>, vector<10x16x4xf32>
    %45 = vector.extract_strided_slice %44 {offsets = [0, 0, 0], sizes = [8, 16, 4], strides = [1, 1, 1]} : vector<10x16x4xf32> to vector<8x16x4xf32>
    %46 = vector.extract_strided_slice %44 {offsets = [1, 0, 0], sizes = [8, 16, 4], strides = [1, 1, 1]} : vector<10x16x4xf32> to vector<8x16x4xf32>
    %47 = vector.extract_strided_slice %44 {offsets = [2, 0, 0], sizes = [8, 16, 4], strides = [1, 1, 1]} : vector<10x16x4xf32> to vector<8x16x4xf32>
    %48 = tpu.concatenate %45, %46, %47 in 2 : vector<8x16x4xf32>, vector<8x16x4xf32>, vector<8x16x4xf32> -> vector<8x16x12xf32>
    %49 = vector.shape_cast %48 : vector<8x16x12xf32> to vector<128x12xf32>
    %50 = arith.truncf %49 : vector<128x12xf32> to vector<128x12xbf16>
    %c2 = arith.constant 2 : index
    %c0_22 = arith.constant 0 : index
    %c0_23 = arith.constant 0 : index
    %51 = vector.load %arg4[%c2, %c0_22, %c0_23] : memref<3x12x4xbf16, #tpu.memory_space<vmem>>, vector<1x12x4xbf16>
    %52 = vector.shape_cast %51 : vector<1x12x4xbf16> to vector<12x4xbf16>
    %cst_24 = arith.constant dense<0.000000e+00> : vector<128x4xf32>
    %53 = tpu.matmul %50, %52, %cst_24 {dimension_numbers = #tpu.dot_dimension_numbers<[1], [0], [0], [1], [0, 0, 1, 1], [], []>} : vector<128x12xbf16>, vector<12x4xbf16>, vector<128x4xf32> -> vector<128x4xf32>
    %54 = arith.addf %39, %53 : vector<128x4xf32>
    %c0_25 = arith.constant 0 : index
    %c0_26 = arith.constant 0 : index
    %55 = vector.load %arg5[%c0_25, %c0_26] : memref<1x4xf32, #tpu.memory_space<vmem>>, vector<1x4xf32>
    %56 = vector.broadcast %55 : vector<1x4xf32> to vector<128x4xf32>
    %57 = arith.addf %54, %56 : vector<128x4xf32>
    %cst_27 = arith.constant dense<0.000000e+00> : vector<4xf32>
    %58 = vector.multi_reduction <add>, %57, %cst_27 [0] : vector<128x4xf32> to vector<4xf32>
    %59 = vector.shape_cast %58 : vector<4xf32> to vector<1x4xf32>
    %cst_28 = arith.constant 7.812500e-03 : f32
    %60 = vector.broadcast %cst_28 : f32 to vector<1x4xf32>
    %61 = arith.mulf %59, %60 : vector<1x4xf32>
    %62 = vector.broadcast %61 : vector<1x4xf32> to vector<128x4xf32>
    %63 = arith.subf %57, %62 : vector<128x4xf32>
    %64 = vector.broadcast %61 : vector<1x4xf32> to vector<128x4xf32>
    %65 = arith.subf %57, %64 : vector<128x4xf32>
    %66 = arith.mulf %63, %65 : vector<128x4xf32>
    %cst_29 = arith.constant dense<0.000000e+00> : vector<4xf32>
    %67 = vector.multi_reduction <add>, %66, %cst_29 [0] : vector<128x4xf32> to vector<4xf32>
    %68 = vector.shape_cast %67 : vector<4xf32> to vector<1x4xf32>
    %69 = tpu.concatenate %61, %68 in 0 : vector<1x4xf32>, vector<1x4xf32> -> vector<2x4xf32>
    %c0_30 = arith.constant 0 : index
    %c0_31 = arith.constant 0 : index
    %c0_32 = arith.constant 0 : index
    %c0_33 = arith.constant 0 : index
    %70 = vector.load %arg7[%c0_30, %c0_31, %c0_32, %c0_33] : memref<1x1x2x4xf32, #tpu.memory_space<vmem>>, vector<1x1x2x4xf32>
    %71 = vector.shape_cast %70 : vector<1x1x2x4xf32> to vector<2x4xf32>
    %72 = vector.shape_cast %69 : vector<2x4xf32> to vector<1x1x2x4xf32>
    tpu.vector_store %arg7[%c0_30, %c0_31, %c0_32, %c0_33], %72 {strides = array<i32>} : memref<1x1x2x4xf32, #tpu.memory_space<vmem>>, vector<1x1x2x4xf32>,
    %73 = vector.shape_cast %57 : vector<128x4xf32> to vector<8x16x4xf32>
    %74 = arith.truncf %73 : vector<8x16x4xf32> to vector<8x16x4xbf16>
    %c0_34 = arith.constant 0 : index
    %c0_35 = arith.constant 0 : index
    %c0_36 = arith.constant 0 : index
    %c0_37 = arith.constant 0 : index
    %75 = vector.load %arg6[%c0_34, %c0_35, %c0_36, %c0_37] : memref<1x8x16x4xbf16, #tpu.memory_space<vmem>>, vector<1x8x16x4xbf16>
    %76 = vector.shape_cast %75 : vector<1x8x16x4xbf16> to vector<8x16x4xbf16>
    %77 = vector.shape_cast %74 : vector<8x16x4xbf16> to vector<1x8x16x4xbf16>
    tpu.vector_store %arg6[%c0_34, %c0_35, %c0_36, %c0_37], %77 {strides = array<i32>} : memref<1x8x16x4xbf16, #tpu.memory_space<vmem>>, vector<1x8x16x4xbf16>,
    return
  }
  func.func @transform_0(%arg0: i32, %arg1: i32) -> (i32, i32, i32, i32) {
    %c0_i32 = arith.constant 0 : i32
    %c0_i32_0 = arith.constant 0 : i32
    %c0_i32_1 = arith.constant 0 : i32
    return %arg0, %arg1, %c0_i32, %c0_i32_0 : i32, i32, i32, i32
  }
  func.func @transform_1(%arg0: i32, %arg1: i32) -> (i32, i32, i32, i32, i32) {
    %c0_i32 = arith.constant 0 : i32
    %c0_i32_0 = arith.constant 0 : i32
    %c0_i32_1 = arith.constant 0 : i32
    %c0_i32_2 = arith.constant 0 : i32
    return %arg0, %arg1, %c0_i32, %c0_i32_0, %c0_i32_1 : i32, i32, i32, i32, i32
  }
  func.func @transform_2(%arg0: i32, %arg1: i32) -> (i32, i32, i32) {
    %c0_i32 = arith.constant 0 : i32
    %c0_i32_0 = arith.constant 0 : i32
    %c0_i32_1 = arith.constant 0 : i32
    %c0_i32_2 = arith.constant 0 : i32
    return %c0_i32, %c0_i32_0, %c0_i32_1 : i32, i32, i32
  }
  func.func @transform_3(%arg0: i32, %arg1: i32) -> (i32, i32) {
    %c0_i32 = arith.constant 0 : i32
    %c0_i32_0 = arith.constant 0 : i32
    %c0_i32_1 = arith.constant 0 : i32
    return %c0_i32, %c0_i32_0 : i32, i32
  }
  func.func @transform_4(%arg0: i32, %arg1: i32) -> (i32, i32, i32, i32) {
    %c0_i32 = arith.constant 0 : i32
    %c0_i32_0 = arith.constant 0 : i32
    %c0_i32_1 = arith.constant 0 : i32
    return %arg0, %arg1, %c0_i32, %c0_i32_0 : i32, i32, i32, i32
  }
  func.func @transform_5(%arg0: i32, %arg1: i32) -> (i32, i32, i32, i32) {
    %c0_i32 = arith.constant 0 : i32
    %c0_i32_0 = arith.constant 0 : i32
    %c0_i32_1 = arith.constant 0 : i32
    return %arg0, %arg1, %c0_i32, %c0_i32_0 : i32, i32, i32, i32
  }
}

module attributes {stable_mosaic.version = 11 : i64} {
  func.func @_finalize_kernel(%arg0: i32, %arg1: i32, %arg2: memref<1x8x16x4xbf16, #tpu.memory_space<vmem>>, %arg3: memref<1x8x16x4xf32, #tpu.memory_space<vmem>>, %arg4: memref<1x4xf32, #tpu.memory_space<vmem>>, %arg5: memref<1x4xf32, #tpu.memory_space<vmem>>, %arg6: memref<1x8x16x4xf32, #tpu.memory_space<vmem>>) attributes {dimension_semantics = [#tpu.dimension_semantics<parallel>, #tpu.dimension_semantics<parallel>], iteration_bounds = array<i64: 2, 2>, scalar_prefetch = 0 : i64, scratch_operands = 0 : i64, tpu.core_type = #tpu.core_type<tc>, window_params = [{transform_indices = @transform_0, window_bounds = array<i64: 1, 8, 16, 4>}, {transform_indices = @transform_1, window_bounds = array<i64: 1, 8, 16, 4>}, {pipeline_mode = #tpu.pipeline_mode<synchronous>, transform_indices = @transform_2, window_bounds = array<i64: 1, 4>}, {pipeline_mode = #tpu.pipeline_mode<synchronous>, transform_indices = @transform_3, window_bounds = array<i64: 1, 4>}, {transform_indices = @transform_4, window_bounds = array<i64: 1, 8, 16, 4>}]} {
    %c0 = arith.constant 0 : index
    %c0_0 = arith.constant 0 : index
    %c0_1 = arith.constant 0 : index
    %c0_2 = arith.constant 0 : index
    %0 = vector.load %arg2[%c0, %c0_0, %c0_1, %c0_2] : memref<1x8x16x4xbf16, #tpu.memory_space<vmem>>, vector<1x8x16x4xbf16>
    %1 = vector.shape_cast %0 : vector<1x8x16x4xbf16> to vector<8x16x4xbf16>
    %2 = arith.extf %1 : vector<8x16x4xbf16> to vector<8x16x4xf32>
    %c0_3 = arith.constant 0 : index
    %c0_4 = arith.constant 0 : index
    %3 = vector.load %arg4[%c0_3, %c0_4] : memref<1x4xf32, #tpu.memory_space<vmem>>, vector<1x4xf32>
    %4 = vector.shape_cast %3 : vector<1x4xf32> to vector<1x1x4xf32>
    %5 = vector.broadcast %4 : vector<1x1x4xf32> to vector<8x16x4xf32>
    %6 = arith.mulf %2, %5 : vector<8x16x4xf32>
    %c0_5 = arith.constant 0 : index
    %c0_6 = arith.constant 0 : index
    %7 = vector.load %arg5[%c0_5, %c0_6] : memref<1x4xf32, #tpu.memory_space<vmem>>, vector<1x4xf32>
    %8 = vector.shape_cast %7 : vector<1x4xf32> to vector<1x1x4xf32>
    %9 = vector.broadcast %8 : vector<1x1x4xf32> to vector<8x16x4xf32>
    %10 = arith.addf %6, %9 : vector<8x16x4xf32>
    %c0_7 = arith.constant 0 : index
    %c0_8 = arith.constant 0 : index
    %c0_9 = arith.constant 0 : index
    %c0_10 = arith.constant 0 : index
    %11 = vector.load %arg3[%c0_7, %c0_8, %c0_9, %c0_10] : memref<1x8x16x4xf32, #tpu.memory_space<vmem>>, vector<1x8x16x4xf32>
    %12 = vector.shape_cast %11 : vector<1x8x16x4xf32> to vector<8x16x4xf32>
    %13 = arith.addf %10, %12 : vector<8x16x4xf32>
    %cst = arith.constant 0.000000e+00 : f32
    %14 = vector.broadcast %cst : f32 to vector<8x16x4xf32>
    %15 = arith.cmpf ogt, %13, %14 : vector<8x16x4xf32>
    %cst_11 = arith.constant 0.00999999977 : f32
    %16 = vector.broadcast %cst_11 : f32 to vector<8x16x4xf32>
    %17 = arith.mulf %16, %13 : vector<8x16x4xf32>
    %18 = arith.select %15, %13, %17 : vector<8x16x4xi1>, vector<8x16x4xf32>
    %c0_12 = arith.constant 0 : index
    %c0_13 = arith.constant 0 : index
    %c0_14 = arith.constant 0 : index
    %c0_15 = arith.constant 0 : index
    %19 = vector.load %arg6[%c0_12, %c0_13, %c0_14, %c0_15] : memref<1x8x16x4xf32, #tpu.memory_space<vmem>>, vector<1x8x16x4xf32>
    %20 = vector.shape_cast %19 : vector<1x8x16x4xf32> to vector<8x16x4xf32>
    %21 = vector.shape_cast %18 : vector<8x16x4xf32> to vector<1x8x16x4xf32>
    tpu.vector_store %arg6[%c0_12, %c0_13, %c0_14, %c0_15], %21 {strides = array<i32>} : memref<1x8x16x4xf32, #tpu.memory_space<vmem>>, vector<1x8x16x4xf32>,
    return
  }
  func.func @transform_0(%arg0: i32, %arg1: i32) -> (i32, i32, i32, i32) {
    %c0_i32 = arith.constant 0 : i32
    %c0_i32_0 = arith.constant 0 : i32
    %c0_i32_1 = arith.constant 0 : i32
    return %arg0, %arg1, %c0_i32, %c0_i32_0 : i32, i32, i32, i32
  }
  func.func @transform_1(%arg0: i32, %arg1: i32) -> (i32, i32, i32, i32) {
    %c0_i32 = arith.constant 0 : i32
    %c0_i32_0 = arith.constant 0 : i32
    %c0_i32_1 = arith.constant 0 : i32
    return %arg0, %arg1, %c0_i32, %c0_i32_0 : i32, i32, i32, i32
  }
  func.func @transform_2(%arg0: i32, %arg1: i32) -> (i32, i32) {
    %c0_i32 = arith.constant 0 : i32
    %c0_i32_0 = arith.constant 0 : i32
    %c0_i32_1 = arith.constant 0 : i32
    return %c0_i32, %c0_i32_0 : i32, i32
  }
  func.func @transform_3(%arg0: i32, %arg1: i32) -> (i32, i32) {
    %c0_i32 = arith.constant 0 : i32
    %c0_i32_0 = arith.constant 0 : i32
    %c0_i32_1 = arith.constant 0 : i32
    return %c0_i32, %c0_i32_0 : i32, i32
  }
  func.func @transform_4(%arg0: i32, %arg1: i32) -> (i32, i32, i32, i32) {
    %c0_i32 = arith.constant 0 : i32
    %c0_i32_0 = arith.constant 0 : i32
    %c0_i32_1 = arith.constant 0 : i32
    return %arg0, %arg1, %c0_i32, %c0_i32_0 : i32, i32, i32, i32
  }
}

module attributes {stable_mosaic.version = 11 : i64} {
  func.func @_conv_kernel(%arg0: i32, %arg1: i32, %arg2: memref<1x8x16x4xbf16, #tpu.memory_space<vmem>>, %arg3: memref<1x1x2x16x4xbf16, #tpu.memory_space<vmem>>, %arg4: memref<1x4xf32, #tpu.memory_space<vmem>>, %arg5: memref<1x4xf32, #tpu.memory_space<vmem>>, %arg6: memref<3x12x4xbf16, #tpu.memory_space<vmem>>, %arg7: memref<1x4xf32, #tpu.memory_space<vmem>>, %arg8: memref<1x8x16x4xbf16, #tpu.memory_space<vmem>>, %arg9: memref<1x1x2x4xf32, #tpu.memory_space<vmem>>) attributes {dimension_semantics = [#tpu.dimension_semantics<parallel>, #tpu.dimension_semantics<parallel>], iteration_bounds = array<i64: 2, 2>, scalar_prefetch = 0 : i64, scratch_operands = 0 : i64, tpu.core_type = #tpu.core_type<tc>, window_params = [{transform_indices = @transform_0, window_bounds = array<i64: 1, 8, 16, 4>}, {transform_indices = @transform_1, window_bounds = array<i64: 1, 1, 2, 16, 4>}, {pipeline_mode = #tpu.pipeline_mode<synchronous>, transform_indices = @transform_2, window_bounds = array<i64: 1, 4>}, {pipeline_mode = #tpu.pipeline_mode<synchronous>, transform_indices = @transform_3, window_bounds = array<i64: 1, 4>}, {pipeline_mode = #tpu.pipeline_mode<synchronous>, transform_indices = @transform_4, window_bounds = array<i64: 3, 12, 4>}, {pipeline_mode = #tpu.pipeline_mode<synchronous>, transform_indices = @transform_5, window_bounds = array<i64: 1, 4>}, {transform_indices = @transform_6, window_bounds = array<i64: 1, 8, 16, 4>}, {transform_indices = @transform_7, window_bounds = array<i64: 1, 1, 2, 4>}]} {
    %c0 = arith.constant 0 : index
    %c0_0 = arith.constant 0 : index
    %c0_1 = arith.constant 0 : index
    %c0_2 = arith.constant 0 : index
    %0 = vector.load %arg2[%c0, %c0_0, %c0_1, %c0_2] : memref<1x8x16x4xbf16, #tpu.memory_space<vmem>>, vector<1x8x16x4xbf16>
    %1 = vector.shape_cast %0 : vector<1x8x16x4xbf16> to vector<8x16x4xbf16>
    %2 = arith.extf %1 : vector<8x16x4xbf16> to vector<8x16x4xf32>
    %c0_3 = arith.constant 0 : index
    %c0_4 = arith.constant 0 : index
    %c0_5 = arith.constant 0 : index
    %c0_6 = arith.constant 0 : index
    %c0_7 = arith.constant 0 : index
    %3 = vector.load %arg3[%c0_3, %c0_4, %c0_5, %c0_6, %c0_7] : memref<1x1x2x16x4xbf16, #tpu.memory_space<vmem>>, vector<1x1x2x16x4xbf16>
    %4 = vector.shape_cast %3 : vector<1x1x2x16x4xbf16> to vector<2x16x4xbf16>
    %5 = arith.extf %4 : vector<2x16x4xbf16> to vector<2x16x4xf32>
    %c0_8 = arith.constant 0 : index
    %c0_9 = arith.constant 0 : index
    %6 = vector.load %arg4[%c0_8, %c0_9] : memref<1x4xf32, #tpu.memory_space<vmem>>, vector<1x4xf32>
    %c0_10 = arith.constant 0 : index
    %c0_11 = arith.constant 0 : index
    %7 = vector.load %arg5[%c0_10, %c0_11] : memref<1x4xf32, #tpu.memory_space<vmem>>, vector<1x4xf32>
    %8 = vector.shape_cast %6 : vector<1x4xf32> to vector<1x1x4xf32>
    %9 = vector.broadcast %8 : vector<1x1x4xf32> to vector<8x16x4xf32>
    %10 = arith.mulf %2, %9 : vector<8x16x4xf32>
    %11 = vector.shape_cast %7 : vector<1x4xf32> to vector<1x1x4xf32>
    %12 = vector.broadcast %11 : vector<1x1x4xf32> to vector<8x16x4xf32>
    %13 = arith.addf %10, %12 : vector<8x16x4xf32>
    %cst = arith.constant 0.000000e+00 : f32
    %14 = vector.broadcast %cst : f32 to vector<8x16x4xf32>
    %15 = arith.cmpf ogt, %13, %14 : vector<8x16x4xf32>
    %cst_12 = arith.constant 0.00999999977 : f32
    %16 = vector.broadcast %cst_12 : f32 to vector<8x16x4xf32>
    %17 = arith.mulf %16, %13 : vector<8x16x4xf32>
    %18 = arith.select %15, %13, %17 : vector<8x16x4xi1>, vector<8x16x4xf32>
    %19 = vector.shape_cast %6 : vector<1x4xf32> to vector<1x1x4xf32>
    %20 = vector.broadcast %19 : vector<1x1x4xf32> to vector<2x16x4xf32>
    %21 = arith.mulf %5, %20 : vector<2x16x4xf32>
    %22 = vector.shape_cast %7 : vector<1x4xf32> to vector<1x1x4xf32>
    %23 = vector.broadcast %22 : vector<1x1x4xf32> to vector<2x16x4xf32>
    %24 = arith.addf %21, %23 : vector<2x16x4xf32>
    %cst_13 = arith.constant 0.000000e+00 : f32
    %25 = vector.broadcast %cst_13 : f32 to vector<2x16x4xf32>
    %26 = arith.cmpf ogt, %24, %25 : vector<2x16x4xf32>
    %cst_14 = arith.constant 0.00999999977 : f32
    %27 = vector.broadcast %cst_14 : f32 to vector<2x16x4xf32>
    %28 = arith.mulf %27, %24 : vector<2x16x4xf32>
    %29 = arith.select %26, %24, %28 : vector<2x16x4xi1>, vector<2x16x4xf32>
    %c0_i32 = arith.constant 0 : i32
    %30 = arith.cmpi eq, %arg1, %c0_i32 : i32
    %cst_15 = arith.constant 0.000000e+00 : f32
    %31 = vector.broadcast %cst_15 : f32 to vector<1x16x4xf32>
    %32 = vector.extract_strided_slice %29 {offsets = [0, 0, 0], sizes = [1, 16, 4], strides = [1, 1, 1]} : vector<2x16x4xf32> to vector<1x16x4xf32>
    %33 = arith.select %30, %31, %32 : vector<1x16x4xf32>
    %c1_i32 = arith.constant 1 : i32
    %34 = arith.cmpi eq, %arg1, %c1_i32 : i32
    %cst_16 = arith.constant 0.000000e+00 : f32
    %35 = vector.broadcast %cst_16 : f32 to vector<1x16x4xf32>
    %36 = vector.extract_strided_slice %29 {offsets = [1, 0, 0], sizes = [1, 16, 4], strides = [1, 1, 1]} : vector<2x16x4xf32> to vector<1x16x4xf32>
    %37 = arith.select %34, %35, %36 : vector<1x16x4xf32>
    %38 = tpu.concatenate %33, %18, %37 in 0 : vector<1x16x4xf32>, vector<8x16x4xf32>, vector<1x16x4xf32> -> vector<10x16x4xf32>
    %39 = tpu.iota {dimensions = array<i32: 1>} : vector<10x16x4xi32>
    %cst_17 = arith.constant 0.000000e+00 : f32
    %40 = vector.broadcast %cst_17 : f32 to vector<128x4xf32>
    %c1_i32_18 = arith.constant 1 : i32
    %41 = tpu.dynamic_rotate %38 by %c1_i32_18 dim 1 : vector<10x16x4xf32>, i32 -> vector<10x16x4xf32>
    %c0_i32_19 = arith.constant 0 : i32
    %42 = vector.broadcast %c0_i32_19 : i32 to vector<10x16x4xi32>
    %43 = arith.cmpi eq, %39, %42 : vector<10x16x4xi32>
    %cst_20 = arith.constant 0.000000e+00 : f32
    %44 = vector.broadcast %cst_20 : f32 to vector<10x16x4xf32>
    %45 = arith.select %43, %44, %41 : vector<10x16x4xi1>, vector<10x16x4xf32>
    %46 = vector.extract_strided_slice %45 {offsets = [0, 0, 0], sizes = [8, 16, 4], strides = [1, 1, 1]} : vector<10x16x4xf32> to vector<8x16x4xf32>
    %47 = vector.extract_strided_slice %45 {offsets = [1, 0, 0], sizes = [8, 16, 4], strides = [1, 1, 1]} : vector<10x16x4xf32> to vector<8x16x4xf32>
    %48 = vector.extract_strided_slice %45 {offsets = [2, 0, 0], sizes = [8, 16, 4], strides = [1, 1, 1]} : vector<10x16x4xf32> to vector<8x16x4xf32>
    %49 = tpu.concatenate %46, %47, %48 in 2 : vector<8x16x4xf32>, vector<8x16x4xf32>, vector<8x16x4xf32> -> vector<8x16x12xf32>
    %50 = vector.shape_cast %49 : vector<8x16x12xf32> to vector<128x12xf32>
    %51 = arith.truncf %50 : vector<128x12xf32> to vector<128x12xbf16>
    %c0_21 = arith.constant 0 : index
    %c0_22 = arith.constant 0 : index
    %c0_23 = arith.constant 0 : index
    %52 = vector.load %arg6[%c0_21, %c0_22, %c0_23] : memref<3x12x4xbf16, #tpu.memory_space<vmem>>, vector<1x12x4xbf16>
    %53 = vector.shape_cast %52 : vector<1x12x4xbf16> to vector<12x4xbf16>
    %cst_24 = arith.constant dense<0.000000e+00> : vector<128x4xf32>
    %54 = tpu.matmul %51, %53, %cst_24 {dimension_numbers = #tpu.dot_dimension_numbers<[1], [0], [0], [1], [0, 0, 1, 1], [], []>} : vector<128x12xbf16>, vector<12x4xbf16>, vector<128x4xf32> -> vector<128x4xf32>
    %55 = arith.addf %40, %54 : vector<128x4xf32>
    %56 = vector.extract_strided_slice %38 {offsets = [0, 0, 0], sizes = [8, 16, 4], strides = [1, 1, 1]} : vector<10x16x4xf32> to vector<8x16x4xf32>
    %57 = vector.extract_strided_slice %38 {offsets = [1, 0, 0], sizes = [8, 16, 4], strides = [1, 1, 1]} : vector<10x16x4xf32> to vector<8x16x4xf32>
    %58 = vector.extract_strided_slice %38 {offsets = [2, 0, 0], sizes = [8, 16, 4], strides = [1, 1, 1]} : vector<10x16x4xf32> to vector<8x16x4xf32>
    %59 = tpu.concatenate %56, %57, %58 in 2 : vector<8x16x4xf32>, vector<8x16x4xf32>, vector<8x16x4xf32> -> vector<8x16x12xf32>
    %60 = vector.shape_cast %59 : vector<8x16x12xf32> to vector<128x12xf32>
    %61 = arith.truncf %60 : vector<128x12xf32> to vector<128x12xbf16>
    %c1 = arith.constant 1 : index
    %c0_25 = arith.constant 0 : index
    %c0_26 = arith.constant 0 : index
    %62 = vector.load %arg6[%c1, %c0_25, %c0_26] : memref<3x12x4xbf16, #tpu.memory_space<vmem>>, vector<1x12x4xbf16>
    %63 = vector.shape_cast %62 : vector<1x12x4xbf16> to vector<12x4xbf16>
    %cst_27 = arith.constant dense<0.000000e+00> : vector<128x4xf32>
    %64 = tpu.matmul %61, %63, %cst_27 {dimension_numbers = #tpu.dot_dimension_numbers<[1], [0], [0], [1], [0, 0, 1, 1], [], []>} : vector<128x12xbf16>, vector<12x4xbf16>, vector<128x4xf32> -> vector<128x4xf32>
    %65 = arith.addf %55, %64 : vector<128x4xf32>
    %c15_i32 = arith.constant 15 : i32
    %66 = tpu.dynamic_rotate %38 by %c15_i32 dim 1 : vector<10x16x4xf32>, i32 -> vector<10x16x4xf32>
    %c15_i32_28 = arith.constant 15 : i32
    %67 = vector.broadcast %c15_i32_28 : i32 to vector<10x16x4xi32>
    %68 = arith.cmpi eq, %39, %67 : vector<10x16x4xi32>
    %cst_29 = arith.constant 0.000000e+00 : f32
    %69 = vector.broadcast %cst_29 : f32 to vector<10x16x4xf32>
    %70 = arith.select %68, %69, %66 : vector<10x16x4xi1>, vector<10x16x4xf32>
    %71 = vector.extract_strided_slice %70 {offsets = [0, 0, 0], sizes = [8, 16, 4], strides = [1, 1, 1]} : vector<10x16x4xf32> to vector<8x16x4xf32>
    %72 = vector.extract_strided_slice %70 {offsets = [1, 0, 0], sizes = [8, 16, 4], strides = [1, 1, 1]} : vector<10x16x4xf32> to vector<8x16x4xf32>
    %73 = vector.extract_strided_slice %70 {offsets = [2, 0, 0], sizes = [8, 16, 4], strides = [1, 1, 1]} : vector<10x16x4xf32> to vector<8x16x4xf32>
    %74 = tpu.concatenate %71, %72, %73 in 2 : vector<8x16x4xf32>, vector<8x16x4xf32>, vector<8x16x4xf32> -> vector<8x16x12xf32>
    %75 = vector.shape_cast %74 : vector<8x16x12xf32> to vector<128x12xf32>
    %76 = arith.truncf %75 : vector<128x12xf32> to vector<128x12xbf16>
    %c2 = arith.constant 2 : index
    %c0_30 = arith.constant 0 : index
    %c0_31 = arith.constant 0 : index
    %77 = vector.load %arg6[%c2, %c0_30, %c0_31] : memref<3x12x4xbf16, #tpu.memory_space<vmem>>, vector<1x12x4xbf16>
    %78 = vector.shape_cast %77 : vector<1x12x4xbf16> to vector<12x4xbf16>
    %cst_32 = arith.constant dense<0.000000e+00> : vector<128x4xf32>
    %79 = tpu.matmul %76, %78, %cst_32 {dimension_numbers = #tpu.dot_dimension_numbers<[1], [0], [0], [1], [0, 0, 1, 1], [], []>} : vector<128x12xbf16>, vector<12x4xbf16>, vector<128x4xf32> -> vector<128x4xf32>
    %80 = arith.addf %65, %79 : vector<128x4xf32>
    %c0_33 = arith.constant 0 : index
    %c0_34 = arith.constant 0 : index
    %81 = vector.load %arg7[%c0_33, %c0_34] : memref<1x4xf32, #tpu.memory_space<vmem>>, vector<1x4xf32>
    %82 = vector.broadcast %81 : vector<1x4xf32> to vector<128x4xf32>
    %83 = arith.addf %80, %82 : vector<128x4xf32>
    %cst_35 = arith.constant dense<0.000000e+00> : vector<4xf32>
    %84 = vector.multi_reduction <add>, %83, %cst_35 [0] : vector<128x4xf32> to vector<4xf32>
    %85 = vector.shape_cast %84 : vector<4xf32> to vector<1x4xf32>
    %cst_36 = arith.constant 7.812500e-03 : f32
    %86 = vector.broadcast %cst_36 : f32 to vector<1x4xf32>
    %87 = arith.mulf %85, %86 : vector<1x4xf32>
    %88 = vector.broadcast %87 : vector<1x4xf32> to vector<128x4xf32>
    %89 = arith.subf %83, %88 : vector<128x4xf32>
    %90 = vector.broadcast %87 : vector<1x4xf32> to vector<128x4xf32>
    %91 = arith.subf %83, %90 : vector<128x4xf32>
    %92 = arith.mulf %89, %91 : vector<128x4xf32>
    %cst_37 = arith.constant dense<0.000000e+00> : vector<4xf32>
    %93 = vector.multi_reduction <add>, %92, %cst_37 [0] : vector<128x4xf32> to vector<4xf32>
    %94 = vector.shape_cast %93 : vector<4xf32> to vector<1x4xf32>
    %95 = tpu.concatenate %87, %94 in 0 : vector<1x4xf32>, vector<1x4xf32> -> vector<2x4xf32>
    %c0_38 = arith.constant 0 : index
    %c0_39 = arith.constant 0 : index
    %c0_40 = arith.constant 0 : index
    %c0_41 = arith.constant 0 : index
    %96 = vector.load %arg9[%c0_38, %c0_39, %c0_40, %c0_41] : memref<1x1x2x4xf32, #tpu.memory_space<vmem>>, vector<1x1x2x4xf32>
    %97 = vector.shape_cast %96 : vector<1x1x2x4xf32> to vector<2x4xf32>
    %98 = vector.shape_cast %95 : vector<2x4xf32> to vector<1x1x2x4xf32>
    tpu.vector_store %arg9[%c0_38, %c0_39, %c0_40, %c0_41], %98 {strides = array<i32>} : memref<1x1x2x4xf32, #tpu.memory_space<vmem>>, vector<1x1x2x4xf32>,
    %99 = vector.shape_cast %83 : vector<128x4xf32> to vector<8x16x4xf32>
    %100 = arith.truncf %99 : vector<8x16x4xf32> to vector<8x16x4xbf16>
    %c0_42 = arith.constant 0 : index
    %c0_43 = arith.constant 0 : index
    %c0_44 = arith.constant 0 : index
    %c0_45 = arith.constant 0 : index
    %101 = vector.load %arg8[%c0_42, %c0_43, %c0_44, %c0_45] : memref<1x8x16x4xbf16, #tpu.memory_space<vmem>>, vector<1x8x16x4xbf16>
    %102 = vector.shape_cast %101 : vector<1x8x16x4xbf16> to vector<8x16x4xbf16>
    %103 = vector.shape_cast %100 : vector<8x16x4xbf16> to vector<1x8x16x4xbf16>
    tpu.vector_store %arg8[%c0_42, %c0_43, %c0_44, %c0_45], %103 {strides = array<i32>} : memref<1x8x16x4xbf16, #tpu.memory_space<vmem>>, vector<1x8x16x4xbf16>,
    return
  }
  func.func @transform_0(%arg0: i32, %arg1: i32) -> (i32, i32, i32, i32) {
    %c0_i32 = arith.constant 0 : i32
    %c0_i32_0 = arith.constant 0 : i32
    %c0_i32_1 = arith.constant 0 : i32
    return %arg0, %arg1, %c0_i32, %c0_i32_0 : i32, i32, i32, i32
  }
  func.func @transform_1(%arg0: i32, %arg1: i32) -> (i32, i32, i32, i32, i32) {
    %c0_i32 = arith.constant 0 : i32
    %c0_i32_0 = arith.constant 0 : i32
    %c0_i32_1 = arith.constant 0 : i32
    %c0_i32_2 = arith.constant 0 : i32
    return %arg0, %arg1, %c0_i32, %c0_i32_0, %c0_i32_1 : i32, i32, i32, i32, i32
  }
  func.func @transform_2(%arg0: i32, %arg1: i32) -> (i32, i32) {
    %c0_i32 = arith.constant 0 : i32
    %c0_i32_0 = arith.constant 0 : i32
    %c0_i32_1 = arith.constant 0 : i32
    return %c0_i32, %c0_i32_0 : i32, i32
  }
  func.func @transform_3(%arg0: i32, %arg1: i32) -> (i32, i32) {
    %c0_i32 = arith.constant 0 : i32
    %c0_i32_0 = arith.constant 0 : i32
    %c0_i32_1 = arith.constant 0 : i32
    return %c0_i32, %c0_i32_0 : i32, i32
  }
  func.func @transform_4(%arg0: i32, %arg1: i32) -> (i32, i32, i32) {
    %c0_i32 = arith.constant 0 : i32
    %c0_i32_0 = arith.constant 0 : i32
    %c0_i32_1 = arith.constant 0 : i32
    %c0_i32_2 = arith.constant 0 : i32
    return %c0_i32, %c0_i32_0, %c0_i32_1 : i32, i32, i32
  }
  func.func @transform_5(%arg0: i32, %arg1: i32) -> (i32, i32) {
    %c0_i32 = arith.constant 0 : i32
    %c0_i32_0 = arith.constant 0 : i32
    %c0_i32_1 = arith.constant 0 : i32
    return %c0_i32, %c0_i32_0 : i32, i32
  }
  func.func @transform_6(%arg0: i32, %arg1: i32) -> (i32, i32, i32, i32) {
    %c0_i32 = arith.constant 0 : i32
    %c0_i32_0 = arith.constant 0 : i32
    %c0_i32_1 = arith.constant 0 : i32
    return %arg0, %arg1, %c0_i32, %c0_i32_0 : i32, i32, i32, i32
  }
  func.func @transform_7(%arg0: i32, %arg1: i32) -> (i32, i32, i32, i32) {
    %c0_i32 = arith.constant 0 : i32
    %c0_i32_0 = arith.constant 0 : i32
    %c0_i32_1 = arith.constant 0 : i32
    return %arg0, %arg1, %c0_i32, %c0_i32_0 : i32, i32, i32, i32
  }
}

</mosaic_0001>

<bundles_post_ra>
// kernel: residual_block_pallas.5
= control target key start
LH: loop header
LB: loop body
LE: loop exit
PB: predicated region body
PF: predicated region fallthrough
CT: control target
= control target key end

     0   :  { %s741_s15 = smov 0   ;;  %s743_s16 = smov 0   ;;  %s931_s0 = inlined_call_operand.vmem [shape: bf16[2,16,16,4], index: 0, kind: input, shape index: {}]   ;;  %s932_s1 = inlined_call_operand.vmem [shape: f32[2,16,16,4], index: 1, kind: input, shape index: {}, may-alias: {1,4}]   ;;  %s933_s2 = inlined_call_operand.vmem [shape: f32[1,4], index: 2, kind: input, shape index: {}]   ;;  %s934_s3 = inlined_call_operand.vmem [shape: f32[1,4], index: 3, kind: input, shape index: {}]   ;;  %s935_s4 = inlined_call_operand.vmem [shape: f32[2,16,16,4], index: 4, kind: output, shape index: {}, may-alias: {1,4}]  }
   0x1   :  { %s745_s17 = smov 0   ;;  %s747_s18 = smov 0  }
   0x2   :  { %s749_s19 = smov 0  }
   0x3 LB: > { %s23_s20 = sadd.s32 1, %s706_s17  ;;  %s26_s21 = sadd.s32 1, %s710_s18  ;;  %s714_s19 = sphi %s749_s19, %s14_s19   ;;  %s710_s18 = sphi %s747_s18, %s939_s18   ;;  %s706_s17 = sphi %s745_s17, %s938_s17   ;;  %s702_s16 = sphi %s743_s16, %s937_s16   ;;  %s698_s15 = sphi %s741_s15, %s936_s15  }
   0x4   : > { %p24_p0 = scmp.ge.s32.totalorder %s23_s20, 2  ;;  %p580_p1 = scmp.ge.s32.totalorder %s714_s19, 1 }
   0x5   : > { %p202_p2 = scmp.lt.s32.totalorder %s714_s19, 5 }
   0x6   : > { %s941_s20 = smov (%p24_p0, %s23_s20), 0  ;;  %s943_s21 = smov (!%p24_p0, %s26_s21), %s710_s18 }
   0x7   : > { %p203_p3 = pnand %p580_p1, %p202_p2  ;;  %p28_p4 = scmp.ge.s32.totalorder %s943_s21, 2 }
   0x8   : > { %s581_s22 = sshll.u32 (!%p203_p3), %s698_s15, 3  ;;  %p249_p5 = scmp.lt.s32.totalorder (!%p203_p3), %s702_s16, 1  ;;  %v784_v1 = vld [vmem:[%s933_s2] ss:$0 sm:$0xff] (!%p203_p3)  ;;  %vm439_vm0 = vcmask (!%p203_p3), 31744  }
   0x9   : > { %s945_s21 = smov (%p28_p4, %s943_s21), 0  ;;  %206 = sbr.rel (%p203_p3) target bundleno = 54 (0x36), region = 36 }
   0xa   : > { %p251_p6 = scmp.lt.s32.totalorder (!%p203_p3), %s581_s22, 15  ;;  %v796_v4 = vld [vmem:[%s934_s3] ss:$0 sm:$0xff] (!%p203_p3) }
  0x10   : > { %s947_s16 = smov (!%p249_p5, %s702_s16), 1  ;;  %s949_s22 = smov (!%p251_p6, %s581_s22), 15 }
  0x11   : > { %s583_s23 = sshll.u32 %s947_s16, 5  ;;  %s582_s24 = sshll.u32 %s949_s22, 1 }
  0x12   : > { %s771_s25 = sadd.s32 %s583_s23, %s582_s24 }
  0x13   : > { %s584_s26 = sshll.u32 %s771_s25, 2  ;;  %s588_s27 = sshll.u32 %s771_s25, 3 }
  0x14   : > { %s778_s30 = scalar_lea.vmem %s931_s0, %s584_s26  ;;  %s791_s9 = scalar_lea.vmem %s932_s1, %s588_s27 }
  0x15   : > { %v598_v0 = vld [vmem:[%s778_s30] sm:$0xff]   ;;  %v360_v8 = vld [vmem:[%s791_s9 + $0x8] sm:$0xff]  ;;  %v630_v14 = vld [vmem:[%s778_s30 + $0x10] sm:$0xff]   ;;  %s816_s14 = scalar_lea.vmem %s935_s4, %s588_s27 }
  0x16   : > { %v599_v2 = vunpack.c.l.bf16 %v598_v0  ;;  %v600_v3 = vunpack.c.h.bf16 %v598_v0  ;;  %v359_v7 = vld [vmem:[%s791_s9] sm:$0xff]  ;;  %v629_v11 = vld [vmem:[%s778_s30 + $0x8] sm:$0xff]   ;;  %v631_v15 = vld [vmem:[%s778_s30 + $0x18] sm:$0xff]   ;;  %v607_v18 = vunpack.c.l.bf16 %v630_v14  ;;  %v608_v19 = vunpack.c.h.bf16 %v630_v14 }
  0x17   : > { %v603_v12 = vunpack.c.l.bf16 %v629_v11  ;;  %v604_v13 = vunpack.c.h.bf16 %v629_v11  ;;  %v361_v20 = vld [vmem:[%s791_s9 + $0x10] sm:$0xff]  ;;  %v362_v21 = vld [vmem:[%s791_s9 + $0x18] sm:$0xff]  ;;  %v611_v24 = vunpack.c.l.bf16 %v631_v15  ;;  %v612_v25 = vunpack.c.h.bf16 %v631_v15  ;;  %v363_v26 = vld [vmem:[%s791_s9 + $0x20] sm:$0xff] }
  0x18   : > { %v320_v5 = vmul.f32 %v599_v2, %v784_v1  ;;  %v321_v6 = vmul.f32 %v600_v3, %v784_v1  ;;  %v364_v27 = vld [vmem:[%s791_s9 + $0x28] sm:$0xff]  ;;  %v365_v28 = vld [vmem:[%s791_s9 + $0x30] sm:$0xff]  ;;  %v366_v29 = vld [vmem:[%s791_s9 + $0x38] sm:$0xff]  ;;  %v324_v39 = vmul.f32 %v607_v18, %v784_v1  ;;  %v325_v40 = vmul.f32 %v608_v19, %v784_v1 }
  0x19   : > { %v322_v22 = vmul.f32 %v603_v12, %v784_v1  ;;  %v323_v23 = vmul.f32 %v604_v13, %v784_v1  ;;  %v823_v30 = vld [vmem:[%s791_s9 + $0x40] sm:$0xff]  ;;  %v826_v31 = vld [vmem:[%s791_s9 + $0x48] sm:$0xff]  ;;  %v829_v32 = vld [vmem:[%s791_s9 + $0x50] sm:$0xff]  ;;  %v326_v47 = vmul.f32 %v611_v24, %v784_v1  ;;  %v327_v48 = vmul.f32 %v612_v25, %v784_v1 }
  0x1a   : > { %v343_v9 = vadd.f32 %v796_v4, %v320_v5  ;;  %v344_v10 = vadd.f32 %v796_v4, %v321_v6  ;;  %v832_v35 = vld [vmem:[%s791_s9 + $0x58] sm:$0xff]  ;;  %v835_v36 = vld [vmem:[%s791_s9 + $0x60] sm:$0xff]  ;;  %v843_v42 = vld [vmem:[%s791_s9 + $0x68] sm:$0xff]  ;;  %v347_v51 = vadd.f32 %v796_v4, %v324_v39  ;;  %v348_v52 = vadd.f32 %v796_v4, %v325_v40 }
  0x1b   : > { %v345_v37 = vadd.f32 %v796_v4, %v322_v22  ;;  %v346_v38 = vadd.f32 %v796_v4, %v323_v23  ;;  %v632_v41 = vld [vmem:[%s778_s30 + $0x20] sm:$0xff]   ;;  %v846_v43 = vld [vmem:[%s791_s9 + $0x70] sm:$0xff]  ;;  %v849_v44 = vld [vmem:[%s791_s9 + $0x78] sm:$0xff]  ;;  %v349_v53 = vadd.f32 %v796_v4, %v326_v47  ;;  %v350_v54 = vadd.f32 %v796_v4, %v327_v48 }
  0x1c   : > { %v375_v16 = vadd.f32 %v359_v7, %v343_v9  ;;  %v376_v17 = vadd.f32 %v360_v8, %v344_v10  ;;  %v615_v55 = vunpack.c.l.bf16 %v632_v41  ;;  %v616_v56 = vunpack.c.h.bf16 %v632_v41  ;;  %v633_v5 = vld [vmem:[%s778_s30 + $0x28] sm:$0xff]   ;;  %v634_v6 = vld [vmem:[%s778_s30 + $0x30] sm:$0xff]   ;;  %v635_v15 = vld [vmem:[%s778_s30 + $0x38] sm:$0xff]  }
  0x1d   : > { %v377_v49 = vadd.f32 %v361_v20, %v345_v37  ;;  %v378_v50 = vadd.f32 %v362_v21, %v346_v38  ;;  %v379_v59 = vadd.f32 %v363_v26, %v347_v51  ;;  %v380_v60 = vadd.f32 %v364_v27, %v348_v52 }
  0x1e   : > { %vm391_vm1 = vcmp.gt.f32.partialorder %v375_v16, 0.0  ;;  %v407_v33 = vmul.f32 0.01, %v375_v16  ;;  %vm392_vm2 = vcmp.gt.f32.partialorder %v376_v17, 0.0  ;;  %v408_v34 = vmul.f32 0.01, %v376_v17 }
  0x1f   : > { %vm393_vm3 = vcmp.gt.f32.partialorder %v377_v49, 0.0  ;;  %v409_v57 = vmul.f32 0.01, %v377_v49  ;;  %vm394_vm4 = vcmp.gt.f32.partialorder %v378_v50, 0.0  ;;  %v410_v58 = vmul.f32 0.01, %v378_v50 }
  0x20   : > { %v423_v45 = vsel %vm391_vm1, %v375_v16, %v407_v33  ;;  %v424_v46 = vsel %vm392_vm2, %v376_v17, %v408_v34  ;;  %v381_v61 = vadd.f32 %v365_v28, %v349_v53  ;;  %v382_v62 = vadd.f32 %v366_v29, %v350_v54 }
  0x21   : > { %440 = vst.msk [vmem:[%s816_s14] sm:$0xff] %vm439_vm0, %v423_v45  ;;  %441 = vst.msk [vmem:[%s816_s14 + $0x8] sm:$0xff] %vm439_vm0, %v424_v46  ;;  %v425_v63 = vsel %vm393_vm3, %v377_v49, %v409_v57  ;;  %v426_v0 = vsel %vm394_vm4, %v378_v50, %v410_v58  ;;  %v328_v2 = vmul.f32 %v615_v55, %v784_v1  ;;  %vm395_vm5 = vcmp.gt.f32.partialorder %v379_v59, 0.0 }
  0x22   : > { %v329_v3 = vmul.f32 %v616_v56, %v784_v1  ;;  %442 = vst.msk [vmem:[%s816_s14 + $0x10] sm:$0xff] %vm439_vm0, %v425_v63  ;;  %443 = vst.msk [vmem:[%s816_s14 + $0x18] sm:$0xff] %vm439_vm0, %v426_v0  ;;  %v411_v7 = vmul.f32 0.01, %v379_v59  ;;  %vm396_vm6 = vcmp.gt.f32.partialorder %v380_v60, 0.0  ;;  %vm397_vm7 = vcmp.gt.f32.partialorder %v381_v61, 0.0 }
  0x23   : > { %v412_v8 = vmul.f32 0.01, %v380_v60  ;;  %v413_v9 = vmul.f32 0.01, %v381_v61  ;;  %vm398_vm8 = vcmp.gt.f32.partialorder %v382_v62, 0.0  ;;  %v351_v13 = vadd.f32 %v796_v4, %v328_v2 }
  0x24   : > { %v414_v10 = vmul.f32 0.01, %v382_v62  ;;  %v427_v11 = vsel %vm395_vm5, %v379_v59, %v411_v7  ;;  %v352_v14 = vadd.f32 %v796_v4, %v329_v3  ;;  %v619_v18 = vunpack.c.l.bf16 %v633_v5 }
  0x25   : > { %v428_v12 = vsel %vm396_vm6, %v380_v60, %v412_v8  ;;  %444 = vst.msk [vmem:[%s816_s14 + $0x20] sm:$0xff] %vm439_vm0, %v427_v11  ;;  %v429_v16 = vsel %vm397_vm7, %v381_v61, %v413_v9  ;;  %v620_v19 = vunpack.c.h.bf16 %v633_v5  ;;  %v383_v20 = vadd.f32 %v823_v30, %v351_v13 }
  0x26   : > { %445 = vst.msk [vmem:[%s816_s14 + $0x28] sm:$0xff] %vm439_vm0, %v428_v12  ;;  %v430_v17 = vsel %vm398_vm8, %v382_v62, %v414_v10  ;;  %446 = vst.msk [vmem:[%s816_s14 + $0x30] sm:$0xff] %vm439_vm0, %v429_v16  ;;  %v384_v21 = vadd.f32 %v826_v31, %v352_v14  ;;  %v623_v22 = vunpack.c.l.bf16 %v634_v6  ;;  %v624_v23 = vunpack.c.h.bf16 %v634_v6 }
  0x27   : > { %447 = vst.msk [vmem:[%s816_s14 + $0x38] sm:$0xff] %vm439_vm0, %v430_v17  ;;  %v330_v24 = vmul.f32 %v619_v18, %v784_v1  ;;  %v331_v25 = vmul.f32 %v620_v19, %v784_v1  ;;  %v627_v26 = vunpack.c.l.bf16 %v635_v15  ;;  %v628_v27 = vunpack.c.h.bf16 %v635_v15 }
  0x28   : > { %vm399_vm9 = vcmp.gt.f32.partialorder %v383_v20, 0.0  ;;  %v415_v28 = vmul.f32 0.01, %v383_v20  ;;  %vm400_vm10 = vcmp.gt.f32.partialorder %v384_v21, 0.0  ;;  %v416_v29 = vmul.f32 0.01, %v384_v21 }
  0x29   : > { %v353_v33 = vadd.f32 %v796_v4, %v330_v24  ;;  %v354_v30 = vadd.f32 %v796_v4, %v331_v25  ;;  %v332_v31 = vmul.f32 %v623_v22, %v784_v1  ;;  %v333_v34 = vmul.f32 %v624_v23, %v784_v1 }
  0x2a   : > { %v431_v37 = vsel %vm399_vm9, %v383_v20, %v415_v28  ;;  %v432_v38 = vsel %vm400_vm10, %v384_v21, %v416_v29  ;;  %v334_v39 = vmul.f32 %v627_v26, %v784_v1  ;;  %v335_v40 = vmul.f32 %v628_v27, %v784_v1 }
  0x2b   : > { %448 = vst.msk [vmem:[%s816_s14 + $0x40] sm:$0xff] %vm439_vm0, %v431_v37  ;;  %449 = vst.msk [vmem:[%s816_s14 + $0x48] sm:$0xff] %vm439_vm0, %v432_v38  ;;  %v385_v41 = vadd.f32 %v829_v32, %v353_v33  ;;  %v386_v45 = vadd.f32 %v832_v35, %v354_v30  ;;  %v355_v46 = vadd.f32 %v796_v4, %v332_v31 }
  0x2c   : > { %v356_v47 = vadd.f32 %v796_v4, %v333_v34  ;;  %v357_v48 = vadd.f32 %v796_v4, %v334_v39  ;;  %v358_v49 = vadd.f32 %v796_v4, %v335_v40 }
  0x2d   : > { %vm401_vm11 = vcmp.gt.f32.partialorder %v385_v41, 0.0  ;;  %v417_v1 = vmul.f32 0.01, %v385_v41  ;;  %vm402_vm12 = vcmp.gt.f32.partialorder %v386_v45, 0.0  ;;  %v418_v50 = vmul.f32 0.01, %v386_v45 }
  0x2e   : > { %v387_v51 = vadd.f32 %v835_v36, %v355_v46  ;;  %v388_v32 = vadd.f32 %v843_v42, %v356_v47  ;;  %v389_v52 = vadd.f32 %v846_v43, %v357_v48  ;;  %v390_v35 = vadd.f32 %v849_v44, %v358_v49 }
  0x2f   : > { %v433_v53 = vsel %vm401_vm11, %v385_v41, %v417_v1  ;;  %v434_v54 = vsel %vm402_vm12, %v386_v45, %v418_v50 }
  0x30   : > { %450 = vst.msk [vmem:[%s816_s14 + $0x50] sm:$0xff] %vm439_vm0, %v433_v53  ;;  %451 = vst.msk [vmem:[%s816_s14 + $0x58] sm:$0xff] %vm439_vm0, %v434_v54  ;;  %vm403_vm13 = vcmp.gt.f32.partialorder %v387_v51, 0.0  ;;  %v419_v4 = vmul.f32 0.01, %v387_v51  ;;  %vm404_vm14 = vcmp.gt.f32.partialorder %v388_v32, 0.0 }
  0x31   : > { %v420_v36 = vmul.f32 0.01, %v388_v32  ;;  %vm405_vm15 = vcmp.gt.f32.partialorder %v389_v52, 0.0  ;;  %v421_v42 = vmul.f32 0.01, %v389_v52  ;;  %vm406_vm1 = vcmp.gt.f32.partialorder %v390_v35, 0.0 }
  0x32   : > { %v422_v43 = vmul.f32 0.01, %v390_v35  ;;  %v435_v55 = vsel %vm403_vm13, %v387_v51, %v419_v4 }
  0x33   : > { %v436_v56 = vsel %vm404_vm14, %v388_v32, %v420_v36  ;;  %452 = vst.msk [vmem:[%s816_s14 + $0x60] sm:$0xff] %vm439_vm0, %v435_v55  ;;  %v437_v44 = vsel %vm405_vm15, %v389_v52, %v421_v42 }
  0x34   : > { %453 = vst.msk [vmem:[%s816_s14 + $0x68] sm:$0xff] %vm439_vm0, %v436_v56  ;;  %v438_v57 = vsel %vm406_vm1, %v390_v35, %v422_v43  ;;  %454 = vst.msk [vmem:[%s816_s14 + $0x70] sm:$0xff] %vm439_vm0, %v437_v44 }
  0x35   : > { %455 = vst.msk [vmem:[%s816_s14 + $0x78] sm:$0xff] %vm439_vm0, %v438_v57 }
  0x36 PF: > { %s14_s19 = sadd.s32 1, %s714_s19   ;;  %s936_s15 = smov %s706_s17 }
  0x37   : > { %p11_p7 = scmp.ge.s32.totalorder %s14_s19, 6   ;;  %s937_s16 = smov %s710_s18 }
  0x38   : > { %s938_s17 = smov %s941_s20  ;;  %s939_s18 = smov %s945_s21 }
  0x39   :  { %13 = sbr.rel (!%p11_p7) target bundleno = 3 (0x3), region = 69 }

// kernel: residual_block_pallas.3
= control target key start
LH: loop header
LB: loop body
LE: loop exit
PB: predicated region body
PF: predicated region fallthrough
CT: control target
= control target key end

     0   :  { %s2317_s18 = smov 0   ;;  %s2319_s19 = smov 0   ;;  %s3187_s0 = inlined_call_operand.vmem [shape: f32[2,16,16,4], index: 0, kind: input, shape index: {}]   ;;  %s3188_s1 = inlined_call_operand.vmem [shape: f32[2,2,2,16,4], index: 1, kind: input, shape index: {}]   ;;  %s3189_s2 = inlined_call_operand.vmem [shape: bf16[3,12,4], index: 2, kind: input, shape index: {}]   ;;  %s3190_s3 = inlined_call_operand.vmem [shape: f32[1,4], index: 3, kind: input, shape index: {}]   ;;  %s3191_s4 = inlined_call_operand.vmem [shape: bf16[2,16,16,4], index: 4, kind: output, shape index: {0}]   ;;  %s3192_s5 = inlined_call_operand.vmem [shape: f32[2,2,2,4], index: 5, kind: output, shape index: {1}]  }
   0x1   :  { %s2321_s20 = smov 0   ;;  %s2323_s21 = smov 0  }
   0x2   :  { %s2325_s22 = smov 0  }
   0x3 LB: > { %s25_s23 = sadd.s32 1, %s2275_s20  ;;  %s28_s24 = sadd.s32 1, %s2279_s21  ;;  %s2283_s22 = sphi %s2325_s22, %s16_s22   ;;  %s2279_s21 = sphi %s2323_s21, %s3210_s21   ;;  %s2275_s20 = sphi %s2321_s20, %s3209_s20   ;;  %s2271_s19 = sphi %s2319_s19, %s3208_s19   ;;  %s2267_s18 = sphi %s2317_s18, %s3207_s18  }
   0x4   : > { %p26_p0 = scmp.ge.s32.totalorder %s25_s23, 2  ;;  %p1749_p1 = scmp.ge.s32.totalorder %s2283_s22, 1 }
   0x5   : > { %p230_p2 = scmp.lt.s32.totalorder %s2283_s22, 5 }
   0x6   : > { %s3212_s23 = smov (%p26_p0, %s25_s23), 0  ;;  %s3214_s24 = smov (!%p26_p0, %s28_s24), %s2279_s21 }
   0x7   : > { %p231_p3 = pnand %p1749_p1, %p230_p2  ;;  %p30_p4 = scmp.ge.s32.totalorder %s3214_s24, 2 }
   0x9   : > { %s3216_s24 = smov (%p30_p4, %s3214_s24), 0  ;;  %234 = sbr.rel (%p231_p3) target bundleno = 531 (0x213), region = 36 }
  0x10   : > { %s1750_s25 = sshll.u32 %s2267_s18, 3  ;;  %p286_p5 = scmp.lt.s32.totalorder %s2271_s19, 1  ;;  %v357_v0 = vlaneseq  ;;  %v2236_v2 = vld [vmem:[%s3189_s2 + $0x8] sm:$0x3f]   ;;  %vm768_vm0 = vcmask 1045504   ;;  %vm537_vm5 = vcmask 31744  }
  0x11   : > { %p288_p6 = scmp.lt.s32.totalorder %s1750_s25, 15  ;;  %p298_p7 = scmp.lt.s32.totalorder %s2267_s18, 1  ;;  %1944 = vmatprep.subr.msk.bf16.mxu1 %vm768_vm0, %v2236_v2  ;;  %v770_v3 = vsel %vm768_vm0, %v2236_v2, 0  ;;  %v2435_v25 = vld [vmem:[%s3189_s2] sm:$0x3f]   ;;  %vm554_vm6 = vcmask 64512  }
  0x12   : > { %s3218_s19 = smov (!%p286_p5, %s2271_s19), 1  ;;  %v2353_v1 = vshrl.u32 %v357_v0, 7  ;;  %1857 = vmatpush3.bf16.msra.mxu1 %v770_v3  ;;  %s2285_s13 = smov 8   ;;  %1945 = vmatprep.subr.msk.bf16.mxu0 %vm768_vm0, %v2435_v25  ;;  %vm743_vm7 = vcmask 97280   ;;  %vm1561_vm8 = vcmask 27648   ;;  %vm1493_vm9 = vcmask 1040384  }
  0x13   : > { %s3220_s25 = smov (!%p288_p6, %s1750_s25), 15  ;;  %s1752_s26 = sshll.u32 %s3218_s19, 5  ;;  %1946 = vmatprep.subr.msk.bf16.mxu1 %vm768_vm0, %v2435_v25  ;;  %vm1495_vm10 = vcmask 25600  }
  0x14   : > { %s1751_s27 = sshll.u32 %s3220_s25, 1  ;;  %vm380_vm1 = vcmp.lt.s32.totalorder %v2353_v1, 1  ;;  %vm401_vm2 = vcmp.eq.s32.totalorder %v2353_v1, 0  ;;  %s1761_s11 = sshll.u32 %s3218_s19, 1  ;;  %v2498_v44 = vadd.s32 8, %v2353_v1  ;;  %vm1018_vm3 = vcmp.lt.s32.totalorder %v2353_v1, 7 }
  0x15   : > { %s2359_s30 = sadd.s32 %s1752_s26, %s1751_s27  ;;  %s2286_s14 = smov 4  }
  0x16   : > { %s1753_s6 = sshll.u32 %s2359_s30, 3  ;;  %p351_p8 = scmp.eq.s32.totalorder %s2267_s18, 1  ;;  %vm1040_vm4 = vcmp.eq.s32.totalorder %v2498_v44, 15 }
  0x17   : > { %s2367_s9 = scalar_lea.vmem %s3187_s0, %s1753_s6  ;;  %s1755_s25 = sshll.u32 %s3218_s19, 3 }
  0x18   : > { %v2370_v4 = vld [vmem:[%s2367_s9 + $0x10] sm:$0xff]  ;;  %v2373_v5 = vld [vmem:[%s2367_s9 + $0x18] sm:$0xff]  ;;  %v2376_v6 = vld [vmem:[%s2367_s9] sm:$0xff]  ;;  %s2383_s10 = scalar_select %p298_p7, %s2267_s18, 1 }
  0x19   : > { %v2000_v7 = vpack.i.bf16 %v2373_v5, %v2370_v4  ;;  %v2388_v8 = vld [vmem:[%s2367_s9 + $0x8] sm:$0xff]  ;;  %v2391_v9 = vld [vmem:[%s2367_s9 + $0x20] sm:$0xff]  ;;  %v362_v11 = vrot.slane %v2370_v4, 7  ;;  %v372_v12 = vrot.slane %v2373_v5, 7  ;;  %v361_v14 = vrot.slane %v2376_v6, 7  ;;  %v2440_v27 = vld [vmem:[%s2367_s9 + $0x30] sm:$0xff] }
  0x1a   : > { %v2394_v10 = vld [vmem:[%s2367_s9 + $0x28] sm:$0xff]  ;;  %v1990_v13 = vpack.i.bf16 %v2388_v8, %v2376_v6  ;;  %v371_v15 = vrot.slane %v2388_v8, 7  ;;  %s2404_s12 = sadd.s32 %s1761_s11, %s2383_s10  ;;  %v363_v18 = vrot.slane %v2391_v9, 7  ;;  %v2443_v28 = vld [vmem:[%s2367_s9 + $0x38] sm:$0xff]  ;;  %v364_v33 = vrot.slane %v2440_v27, 7  ;;  %v2474_v37 = vld [vmem:[%s2367_s9 + $0x40] sm:$0xff] }
  0x1b   : > { %2001 = vrot.lane.b32.xlu1 %v2000_v7, %s2285_s13  ;;  %v2005_v16 = vpack.i.bf16 %v2394_v10, %v2391_v9  ;;  %v393_v17 = vsel %vm380_vm1, %v372_v12, %v362_v11  ;;  %v373_v19 = vrot.slane %v2394_v10, 7  ;;  %v2416_v20 = vsel %vm380_vm1, %v362_v11, %v372_v12  ;;  %v2477_v38 = vld [vmem:[%s2367_s9 + $0x48] sm:$0xff]  ;;  %s1754_s17 = sshll.u32 %s2383_s10, 2  ;;  %p345_p9 = scmp.eq.s32.totalorder %s2267_s18, 0  ;;  %v2515_v50 = vld [vmem:[%s2367_s9 + $0x60] sm:$0xff]  ;;  %v2554_v62 = vld [vmem:[%s2367_s9 + $0x50] sm:$0xff] }
  0x1c   : > { %1991 = vrot.lane.b32.xlu0 %v1990_v13, %s2286_s14  ;;  %v2420_v21 = vsel %vm401_vm2, 0.0, %v393_v17  ;;  %v392_v22 = vsel %vm380_vm1, %v371_v15, %v361_v14  ;;  %v2426_v23 = vsel %vm380_vm1, %v361_v14, %v371_v15  ;;  %v374_v34 = vrot.slane %v2443_v28, 7  ;;  %s302_s26 = sadd.s32 %s1755_s25, %s1754_s17  ;;  %v2518_v51 = vld [vmem:[%s2367_s9 + $0x68] sm:$0xff]  ;;  %v2557_v63 = vld [vmem:[%s2367_s9 + $0x58] sm:$0xff]  ;;  %v2560_v0 = vld [vmem:[%s2367_s9 + $0x70] sm:$0xff]  ;;  %s1760_s11 = sshll.u32 %s2359_s30, 2 }
  0x1d   : > { %v2430_v24 = vsel %vm401_vm2, 0.0, %v392_v22  ;;  %v394_v26 = vsel %vm380_vm1, %v373_v19, %v363_v18  ;;  %v2015_v29 = vpack.i.bf16 %v2416_v20, %v2420_v21  ;;  %v2455_v31 = vsel %vm380_vm1, %v363_v18, %v373_v19  ;;  %s1756_s19 = sshll.u32 %s302_s26, 3  ;;  %v2563_v2 = vld [vmem:[%s2367_s9 + $0x78] sm:$0xff]  ;;  %s3004_s15 = scalar_lea.vmem %s3191_s4, %s1760_s11 }
  0x1e   : > { %v2010_v30 = vpack.i.bf16 %v2426_v23, %v2430_v24  ;;  %v2459_v32 = vsel %vm401_vm2, 0.0, %v394_v26  ;;  %v395_v36 = vsel %vm380_vm1, %v374_v34, %v364_v33  ;;  %v2482_v39 = vsel %vm380_vm1, %v364_v33, %v374_v34  ;;  %s2231_s27 = scalar_select %p351_p8, 0, 255 }
  0x1f   : > { %2006 = vrot.lane.b32.xlu1 %v2005_v16, %s2285_s13  ;;  %v2025_v35 = vpack.i.bf16 %v2455_v31, %v2459_v32  ;;  %v2486_v40 = vsel %vm401_vm2, 0.0, %v395_v36  ;;  %v365_v41 = vrot.slane %v2474_v37, 7  ;;  %v375_v42 = vrot.slane %v2477_v38, 7  ;;  %s2533_s6 = scalar_lea.vmem %s3188_s1, %s1756_s19  ;;  %s1762_s30 = sshll.u32 %s2404_s12, 1 }
  0x20   : > { %1996 = vrot.lane.b32.xlu0 %v2000_v7, %s2286_s14  ;;  %v2045_v43 = vpack.i.bf16 %v2482_v39, %v2486_v40  ;;  %v999_v45 = vrot.slane %v2376_v6, 1  ;;  %v1009_v46 = vrot.slane %v2388_v8, 1  ;;  %v2055_v48 = vpack.i.bf16 %v2443_v28, %v2440_v27  ;;  %v2566_v3 = vld [vmem:[%s2533_s6 + $0x10] sm:%s2231_s27]  ;;  %s2238_s7 = scalar_select %p345_p9, 0, 255 }
  0x21   : > { %v396_v47 = vsel %vm380_vm1, %v375_v42, %v365_v41  ;;  %v2511_v49 = vsel %vm380_vm1, %v365_v41, %v375_v42  ;;  %v3193_v54 = vrot.slane %v2515_v50, 7  ;;  %v3194_v55 = vrot.slane %v2518_v51, 7  ;;  %v2569_v7 = vld [vmem:[%s2533_s6 + $0x18] sm:%s2231_s27]  ;;  %s323_s25 = scalar_lea.vmem %s3192_s5, %s1762_s30 }
  0x22   : > { %v2524_v52 = vsel %vm401_vm2, 0.0, %v396_v47  ;;  %v1030_v53 = vsel %vm1018_vm3, %v1009_v46, %v999_v45  ;;  %v2065_v56 = vpack.i.bf16 %v2477_v38, %v2474_v37  ;;  %v1000_v57 = vrot.slane %v2370_v4, 1  ;;  %v2619_v42 = vld [vmem:[%s2533_s6] sm:%s2238_s7]  ;;  %v2630_v47 = vld [vmem:[%s2533_s6 + $0x8] sm:%s2238_s7] }
  0x23   : > { %2016 = vrot.lane.b32.xlu1 %v2015_v29, %s2286_s14  ;;  %3198 = vst [vmem:[#allocation2_spill] sm:$0xff] %v2524_v52  ;;  %v1010_v58 = vrot.slane %v2373_v5, 1  ;;  %v2543_v59 = vpack.i.bf16 %v2511_v49, %v2524_v52  ;;  %v2547_v60 = vsel %vm1018_vm3, %v999_v45, %v1009_v46  ;;  %v2551_v61 = vsel %vm1040_vm4, 0.0, %v1030_v53 }
  0x24   : > { %2011 = vrot.lane.b32.xlu0 %v2010_v30, %s2286_s14  ;;  %v398_v11 = vsel %vm380_vm1, %v3194_v55, %v3193_v54  ;;  %v368_v12 = vrot.slane %v2560_v0, 7  ;;  %v379_v13 = vrot.slane %v2569_v7, 7  ;;  %v369_v14 = vrot.slane %v2566_v3, 7 }
  0x25   : > { %v2582_v15 = vsel %vm401_vm2, 0.0, %v398_v11  ;;  %v2075_v17 = vpack.i.bf16 %v2551_v61, %v2547_v60  ;;  %v1031_v18 = vsel %vm1018_vm3, %v1010_v58, %v1000_v57  ;;  %v1001_v19 = vrot.slane %v2391_v9, 1 }
  0x26   : > { %v1011_v22 = vrot.slane %v2394_v10, 1  ;;  %v2085_v30 = vpack.i.bf16 %v2557_v63, %v2554_v62  ;;  %v2604_v33 = vsel %vm1018_vm3, %v1000_v57, %v1010_v58  ;;  %v2616_v41 = vsel %vm380_vm1, %v369_v14, %v379_v13 }
  0x27   : > { %2021 = vrot.lane.b32.xlu1 %v2015_v29, %s2285_s13  ;;  %v400_v46 = vsel %vm380_vm1, %v379_v13, %v369_v14  ;;  %v370_v57 = vrot.slane %v2630_v47, 7  ;;  %v998_v58 = vrot.slane %v2619_v42, 1  ;;  %v2645_v13 = vsel %vm768_vm0, %v2435_v25, 0 }
  0x28   : > { %2026 = vrot.lane.b32.xlu0 %v2025_v35, %s2285_s13  ;;  %v1032_v45 = vsel %vm1018_vm3, %v1011_v22, %v1001_v19  ;;  %v2636_v53 = vsel %vm401_vm2, 0.0, %v400_v46  ;;  %1875 = vmatpush3.bf16.msra.mxu0 %v2645_v13  ;;  %v1005_v55 = vrot.slane %v2515_v50, 1  ;;  %v1015_v52 = vrot.slane %v2518_v51, 1 }
  0x2b   : > { %2036 = vrot.lane.b32.xlu1 %v2005_v16, %s2286_s14  ;;  %v378_v16 = vrot.slane %v2563_v2, 7 }
  0x2c   : > { %2031 = vrot.lane.b32.xlu0 %v2025_v35, %s2286_s14  ;;  %v2610_v35 = vsel %vm1040_vm4, 0.0, %v1031_v18 }
  0x2d   : > { %v389_v26 = vsel %vm380_vm1, %v368_v12, %v378_v16  ;;  %v399_v29 = vsel %vm380_vm1, %v378_v16, %v368_v12  ;;  %v1008_v12 = vrot.slane %v2630_v47, 1 }
  0x2e   : > { %v419_v34 = vsel %vm401_vm2, 0.0, %v399_v29  ;;  %v2674_v29 = vsel %vm1018_vm3, %v1001_v19, %v1011_v22  ;;  %v1002_v19 = vrot.slane %v2440_v27, 1  ;;  %v1012_v22 = vrot.slane %v2443_v28, 1 }
  0x2f   : > { %2046 = vrot.lane.b32.xlu1 %v2045_v43, %s2285_s13  ;;  %v2612_v36 = vpack.i.bf16 %v389_v26, %v419_v34  ;;  %v2666_v18 = vsel %vm1018_vm3, %v998_v58, %v1008_v12  ;;  %v1029_v26 = vsel %vm1018_vm3, %v1008_v12, %v998_v58  ;;  %v2678_v34 = vsel %vm1040_vm4, 0.0, %v1032_v45 }
  0x30   : > { %2041 = vrot.lane.b32.xlu0 %v2045_v43, %s2286_s14  ;;  %v2244_v43 = vld [vmem:[%s3189_s2 + $0x10] sm:$0x3f]   ;;  %v2682_v46 = vsel %vm1040_vm4, 0.0, %v1029_v26  ;;  %v1003_v45 = vrot.slane %v2474_v37, 1  ;;  %v2125_v58 = vpack.i.bf16 %v2563_v2, %v2560_v0  ;;  %v2704_v12 = vsel %vm1018_vm3, %v1002_v19, %v1012_v22 }
  0x31   : > { %v2648_v14 = vsel %vm768_vm0, %v2244_v43, 0  ;;  %1947 = vmatprep.subr.msk.bf16.mxu0 %vm768_vm0, %v2244_v43  ;;  %v1033_v43 = vsel %vm1018_vm3, %v1012_v22, %v1002_v19  ;;  %v366_v19 = vrot.slane %v2554_v62, 7  ;;  %v376_v22 = vrot.slane %v2557_v63, 7 }
  0x33   : > { %2056 = vrot.lane.b32.xlu1 %v2055_v48, %s2285_s13  ;;  %v2740_v11 = vsel %vm380_vm1, %v366_v19, %v376_v22 }
  0x34   : > { %2051 = vrot.lane.b32.xlu0 %v2055_v48, %s2286_s14  ;;  %v360_v48 = vrot.slane %v2619_v42, 7 }
  0x36   : > { %v391_v16 = vsel %vm380_vm1, %v370_v57, %v360_v48 }
  0x37   : > { %2066 = vrot.lane.b32.xlu1 %v2065_v56, %s2285_s13  ;;  %v2662_v25 = vsel %vm401_vm2, 0.0, %v391_v16  ;;  %v2708_v16 = vsel %vm1040_vm4, 0.0, %v1033_v43 }
  0x38   : > { %2061 = vrot.lane.b32.xlu0 %v2543_v59, %s2285_s13  ;;  %v2135_v26 = vpack.i.bf16 %v2708_v16, %v2704_v12 }
  0x3b   : > { %2076 = vrot.lane.b32.xlu1 %v2075_v17, %s2286_s14  ;;  %v2095_v17 = vpack.i.bf16 %v2610_v35, %v2604_v33 }
  0x3c   : > { %2071 = vrot.lane.b32.xlu0 %v2065_v56, %s2286_s14  ;;  %v2653_v56 = vsel %vm380_vm1, %v360_v48, %v370_v57  ;;  %v2105_v48 = vpack.i.bf16 %v2678_v34, %v2674_v29  ;;  %v1013_v57 = vrot.slane %v2477_v38, 1 }
  0x3f   : > { %2086 = vrot.lane.b32.xlu1 %v2085_v30, %s2285_s13 }
  0x40   : > { %2081 = vrot.lane.b32.xlu0 %v2085_v30, %s2286_s14  ;;  %v2100_v30 = vpack.i.bf16 %v2518_v51, %v2515_v50 }
  0x43   : > { %2096 = vrot.lane.b32.xlu1 %v2095_v17, %s2285_s13 }
  0x44   : > { %2091 = vrot.lane.b32.xlu0 %v2095_v17, %s2286_s14  ;;  %v1034_v17 = vsel %vm1018_vm3, %v1013_v57, %v1003_v45 }
  0x47   : > { %2106 = vrot.lane.b32.xlu1 %v2105_v48, %s2285_s13 }
  0x48   : > { %2101 = vrot.lane.b32.xlu0 %v2100_v30, %s2285_s13 }
  0x4b   : > { %2116 = vrot.lane.b32.xlu1 %v2105_v48, %s2286_s14  ;;  %v2718_v48 = vsel %vm1018_vm3, %v1003_v45, %v1013_v57  ;;  %v397_v45 = vsel %vm380_vm1, %v376_v22, %v366_v19  ;;  %v1004_v57 = vrot.slane %v2554_v62, 1 }
  0x4c   : > { %2111 = vrot.lane.b32.xlu0 %v2100_v30, %s2286_s14  ;;  %v2722_v30 = vsel %vm1040_vm4, 0.0, %v1034_v17  ;;  %v1014_v17 = vrot.slane %v2557_v63, 1 }
  0x4d   : > { %v2145_v43 = vpack.i.bf16 %v2722_v30, %v2718_v48 }
  0x4e   : > { %v1035_v54 = vsel %vm1018_vm3, %v1014_v17, %v1004_v57  ;;  %v2757_v19 = vsel %vm1018_vm3, %v1004_v57, %v1014_v17  ;;  %v3202_v17 = vrot.slane %v2515_v50, 7 }
  0x4f   : > { %2126 = vrot.lane.b32.xlu1 %v2125_v58, %s2285_s13  ;;  %v2761_v22 = vsel %vm1040_vm4, 0.0, %v1035_v54  ;;  %v3201_v54 = vrot.slane %v2518_v51, 7 }
  0x50   : > { %2121 = vrot.lane.b32.xlu0 %v2125_v58, %s2286_s14  ;;  %v2140_v58 = vpack.i.bf16 %v2569_v7, %v2566_v3 }
  0x53   : > { %2136 = vrot.lane.b32.xlu1 %v2135_v26, %s2285_s13 }
  0x54   : > { %2131 = vrot.lane.b32.xlu0 %v2135_v26, %s2286_s14  ;;  %v2744_v26 = vsel %vm401_vm2, 0.0, %v397_v45  ;;  %v1036_v45 = vsel %vm1018_vm3, %v1015_v52, %v1005_v55 }
  0x55   : > { %3199 = vst [vmem:[#allocation3_spill] sm:$0xff] %v2744_v26  ;;  %v2775_v57 = vsel %vm1040_vm4, 0.0, %v1036_v45  ;;  %v1016_v45 = vrot.slane %v2563_v2, 1 }
  0x57   : > { %2146 = vrot.lane.b32.xlu1 %v2145_v43, %s2285_s13 }
  0x58   : > { %2141 = vrot.lane.b32.xlu0 %v2140_v58, %s2285_s13  ;;  %v2165_v58 = vpack.i.bf16 %v2740_v11, %v2744_v26  ;;  %v2783_v26 = vsel %vm380_vm1, %v3202_v17, %v3201_v54  ;;  %v1017_v54 = vrot.slane %v2569_v7, 1  ;;  %v1007_v17 = vrot.slane %v2566_v3, 1 }
  0x5a   : > { %v1028_v7 = vsel %vm1018_vm3, %v1007_v17, %v1017_v54 }
  0x5b   : > { %2156 = vrot.lane.b32.xlu1 %v2145_v43, %s2286_s14  ;;  %v2175_v43 = vpack.i.bf16 %v2761_v22, %v2757_v19 }
  0x5c   : > { %2151 = vrot.lane.b32.xlu0 %v2543_v59, %s2286_s14  ;;  %v2771_v59 = vsel %vm1018_vm3, %v1005_v55, %v1015_v52  ;;  %v2180_v52 = vpack.i.bf16 %v2783_v26, %v2582_v15  ;;  %v1006_v55 = vrot.slane %v2560_v0, 1 }
  0x5d   : > { %3200 = vst [vmem:[#allocation4_spill] sm:$0xff] %v2771_v59 }
  0x5e   : > { %v1027_v0 = vsel %vm1018_vm3, %v1006_v55, %v1016_v45 }
  0x5f   : > { %2166 = vrot.lane.b32.xlu1 %v2165_v58, %s2285_s13 }
  0x60   : > { %2161 = vrot.lane.b32.xlu0 %v2165_v58, %s2286_s14  ;;  %v2185_v58 = vpack.i.bf16 %v2775_v57, %v2771_v59  ;;  %v1037_v59 = vsel %vm1018_vm3, %v1016_v45, %v1006_v55 }
  0x61   : > { %v1058_v2 = vsel %vm1040_vm4, 0.0, %v1037_v59  ;;  %v3203_v59 = vpack.i.bf16 %v2616_v41, %v2636_v53 }
  0x62   : > { %v2215_v3 = vpack.i.bf16 %v1058_v2, %v1027_v0 }
  0x63   : > { %2176 = vrot.lane.b32.xlu1 %v2175_v43, %s2285_s13 }
  0x64   : > { %2171 = vrot.lane.b32.xlu0 %v2175_v43, %s2286_s14  ;;  %v1038_v43 = vsel %vm1018_vm3, %v1017_v54, %v1007_v17 }
  0x67   : > { %2186 = vrot.lane.b32.xlu1 %v2185_v58, %s2285_s13 }
  0x68   : > { %2181 = vrot.lane.b32.xlu0 %v2180_v52, %s2285_s13 }
  0x6b   : > { %2196 = vrot.lane.b32.xlu1 %v2185_v58, %s2286_s14  ;;  %v1060_v58 = vsel %vm1040_vm4, 0.0, %v1038_v43 }
  0x6c   : > { %2191 = vrot.lane.b32.xlu0 %v2180_v52, %s2286_s14  ;;  %v2225_v52 = vpack.i.bf16 %v1060_v58, %v1028_v7 }
  0x6f   : > { %2206 = vrot.lane.b32.xlu1 %v2612_v36, %s2285_s13 }
  0x70   : > { %2201 = vrot.lane.b32.xlu0 %v2612_v36, %s2286_s14 }
  0x73   : > { %2216 = vrot.lane.b32.xlu1 %v2215_v3, %s2285_s13 }
  0x74   : > { %2211 = vrot.lane.b32.xlu0 %v2215_v3, %s2286_s14 }
  0x77   : > { %2226 = vrot.lane.b32.xlu1 %v2225_v52, %s2285_s13 }
  0x78   : > { %2221 = vrot.lane.b32.xlu0 %v3203_v59, %s2285_s13 }
  0x8d   : > { %v2002_v55 = vpop.permute.xlu1 %2001 }
  0x8e   : > { %v2004_v36 = vunpack.i.h.bf16 %v2002_v55  ;;  %v2003_v45 = vunpack.i.l.bf16 %v2002_v55  ;;  %v1992_v1 = vpop.permute.xlu0 %1991 }
  0x8f   : > { %v1994_v54 = vunpack.i.h.bf16 %v1992_v1  ;;  %v1993_v44 = vunpack.i.l.bf16 %v1992_v1 }
  0x91   : > { %v2007_v17 = vpop.permute.xlu1 %2006  ;;  %v695_v0 = vsel %vm537_vm5, %v2619_v42, %v1993_v44  ;;  %v696_v2 = vsel %vm537_vm5, %v2630_v47, %v1994_v54 }
  0x92   : > { %v2009_v43 = vunpack.i.h.bf16 %v2007_v17  ;;  %v2008_v3 = vunpack.i.l.bf16 %v2007_v17  ;;  %v1997_v41 = vpop.permute.xlu0 %1996  ;;  %v711_v53 = vsel %vm554_vm6, %v695_v0, %v2003_v45  ;;  %v712_v7 = vsel %vm554_vm6, %v696_v2, %v2004_v36 }
  0x93   : > { %v1999_v58 = vunpack.i.h.bf16 %v1997_v41  ;;  %v1998_v52 = vunpack.i.l.bf16 %v1997_v41  ;;  %v727_v59 = vpack.c.bf16 %v712_v7, %v711_v53 }
  0x95   : > { %v698_v55 = vsel %vm537_vm5, %v2388_v8, %v1999_v58  ;;  %v697_v42 = vsel %vm537_vm5, %v2376_v6, %v1998_v52  ;;  %1858 = vmatprep.mubr.msk.bf16.mxu1 %vm743_vm7, %v727_v59  ;;  %v2017_v47 = vpop.permute.xlu1 %2016 }
  0x96   : > { %v2012_v1 = vpop.permute.xlu0 %2011  ;;  %v713_v54 = vsel %vm554_vm6, %v697_v42, %v2008_v3  ;;  %v714_v44 = vsel %vm554_vm6, %v698_v55, %v2009_v43  ;;  %v2019_v0 = vunpack.i.h.bf16 %v2017_v47  ;;  %v2018_v2 = vunpack.i.l.bf16 %v2017_v47 }
  0x97   : > { %v2014_v45 = vunpack.i.h.bf16 %v2012_v1  ;;  %v2013_v17 = vunpack.i.l.bf16 %v2012_v1  ;;  %v728_v36 = vpack.c.bf16 %v714_v44, %v713_v54 }
  0x98   : > { %v540_v52 = vsel %vm537_vm5, %v2430_v24, %v2018_v2  ;;  %v541_v59 = vsel %vm537_vm5, %v2426_v23, %v2019_v0 }
  0x99   : > { %1859 = vmatmul.mubr.msk.bf16.vlgmr.msra.gmra.mrb[0].mxu1 %vm743_vm7, %v728_v36  ;;  %v2022_v41 = vpop.permute.xlu1 %2021  ;;  %v538_v3 = vsel %vm537_vm5, %v2662_v25, %v2013_v17  ;;  %v539_v43 = vsel %vm537_vm5, %v2653_v56, %v2014_v45 }
  0x9a   : > { %v2024_v8 = vunpack.i.h.bf16 %v2022_v41  ;;  %v2023_v53 = vunpack.i.l.bf16 %v2022_v41  ;;  %v2027_v7 = vpop.permute.xlu0 %2026  ;;  %1911 = vmatpush3.bf16.msra.mxu1 %v2645_v13 }
  0x9b   : > { %v2029_v6 = vunpack.i.h.bf16 %v2027_v7  ;;  %v2028_v58 = vunpack.i.l.bf16 %v2027_v7 }
  0x9c   : > { %v555_v55 = vsel %vm554_vm6, %v538_v3, %v2023_v53  ;;  %v556_v42 = vsel %vm554_vm6, %v539_v43, %v2024_v8 }
  0x9d   : > { %v557_v13 = vsel %vm554_vm6, %v540_v52, %v2028_v58  ;;  %v558_v47 = vsel %vm554_vm6, %v541_v59, %v2029_v6  ;;  %v2037_v1 = vpop.permute.xlu1 %2036  ;;  %v571_v54 = vpack.c.bf16 %v556_v42, %v555_v55 }
  0x9e   : > { %v572_v25 = vpack.c.bf16 %v558_v47, %v557_v13  ;;  %v2032_v44 = vpop.permute.xlu0 %2031  ;;  %v2039_v0 = vunpack.i.h.bf16 %v2037_v1  ;;  %v2038_v2 = vunpack.i.l.bf16 %v2037_v1 }
  0x9f   : > { %v2034_v17 = vunpack.i.h.bf16 %v2032_v44  ;;  %v2033_v56 = vunpack.i.l.bf16 %v2032_v44  ;;  %1876 = vmatprep.mubr.msk.bf16.mxu0 %vm743_vm7, %v571_v54 }
  0xa0   : > { %1877 = vmatmul.mubr.msk.bf16.vlgmr.msra.gmra.mrb[0].mxu0 %vm743_vm7, %v572_v25  ;;  %v700_v52 = vsel %vm537_vm5, %v2373_v5, %v2039_v0  ;;  %v699_v59 = vsel %vm537_vm5, %v2370_v4, %v2038_v2 }
  0xa1   : > { %v2047_v24 = vpop.permute.xlu1 %2046  ;;  %1893 = vmatpush3.bf16.msra.mxu0 %v2648_v14  ;;  %v543_v41 = vsel %vm537_vm5, %v2416_v20, %v2034_v17  ;;  %v542_v8 = vsel %vm537_vm5, %v2420_v21, %v2033_v56 }
  0xa2   : > { %v2049_v23 = vunpack.i.h.bf16 %v2047_v24  ;;  %v2048_v45 = vunpack.i.l.bf16 %v2047_v24  ;;  %v2042_v36 = vpop.permute.xlu0 %2041 }
  0xa3   : > { %v2044_v21 = vunpack.i.h.bf16 %v2042_v36  ;;  %v2043_v42 = vunpack.i.l.bf16 %v2042_v36 }
  0xa4   : > { %v559_v53 = vsel %vm554_vm6, %v542_v8, %v2048_v45  ;;  %v560_v7 = vsel %vm554_vm6, %v543_v41, %v2049_v23 }
  0xa5   : > { %v573_v6 = vpack.c.bf16 %v560_v7, %v559_v53  ;;  %v2057_v58 = vpop.permute.xlu1 %2056  ;;  %v545_v23 = vsel %vm537_vm5, %v2455_v31, %v2044_v21  ;;  %v544_v45 = vsel %vm537_vm5, %v2459_v32, %v2043_v42 }
  0xa6   : > { %v2059_v3 = vunpack.i.h.bf16 %v2057_v58  ;;  %v2058_v43 = vunpack.i.l.bf16 %v2057_v58  ;;  %v2052_v14 = vpop.permute.xlu0 %2051 }
  0xa7   : > { %v2054_v55 = vunpack.i.h.bf16 %v2052_v14  ;;  %v2053_v20 = vunpack.i.l.bf16 %v2052_v14  ;;  %1880 = vmatprep.mubr.msk.bf16.mxu0 %vm743_vm7, %v573_v6 }
  0xa8   : > { %v715_v13 = vsel %vm554_vm6, %v699_v59, %v2058_v43  ;;  %v716_v47 = vsel %vm554_vm6, %v700_v52, %v2059_v3 }
  0xa9   : > { %v729_v1 = vpack.c.bf16 %v716_v47, %v715_v13  ;;  %v2067_v54 = vpop.permute.xlu1 %2066  ;;  %v702_v5 = vsel %vm537_vm5, %v2394_v10, %v2054_v55  ;;  %v701_v4 = vsel %vm537_vm5, %v2391_v9, %v2053_v20 }
  0xaa   : > { %v2069_v25 = vunpack.i.h.bf16 %v2067_v54  ;;  %v2068_v44 = vunpack.i.l.bf16 %v2067_v54  ;;  %v2062_v17 = vpop.permute.xlu0 %2061 }
  0xab   : > { %v2064_v56 = vunpack.i.h.bf16 %v2062_v17  ;;  %v2063_v24 = vunpack.i.l.bf16 %v2062_v17  ;;  %1862 = vmatprep.mubr.msk.bf16.mxu1 %vm743_vm7, %v729_v1 }
  0xac   : > { %v717_v36 = vsel %vm554_vm6, %v701_v4, %v2068_v44  ;;  %v718_v0 = vsel %vm554_vm6, %v702_v5, %v2069_v25 }
  0xad   : > { %v730_v2 = vpack.c.bf16 %v718_v0, %v717_v36  ;;  %v561_v10 = vsel %vm554_vm6, %v544_v45, %v2063_v24  ;;  %v562_v41 = vsel %vm554_vm6, %v545_v23, %v2064_v56  ;;  %v2077_v9 = vpop.permute.xlu1 %2076 }
  0xae   : > { %v574_v8 = vpack.c.bf16 %v562_v41, %v561_v10  ;;  %v2072_v53 = vpop.permute.xlu0 %2071  ;;  %v2079_v43 = vunpack.i.h.bf16 %v2077_v9  ;;  %v2078_v14 = vunpack.i.l.bf16 %v2077_v9 }
  0xaf   : > { %v2074_v7 = vunpack.i.h.bf16 %v2072_v53  ;;  %v2073_v6 = vunpack.i.l.bf16 %v2072_v53  ;;  %1863 = vmatmul.mubr.msk.bf16.gmra.mrb[4].mxu1 %vm743_vm7, %v730_v2 }
  0xb0   : > { %1881 = vmatmul.mubr.msk.bf16.gmra.mrb[4].mxu0 %vm743_vm7, %v574_v8  ;;  %v1176_v54 = vsel %vm537_vm5, %v2682_v46, %v2079_v43  ;;  %v1175_v25 = vsel %vm537_vm5, %v2666_v18, %v2078_v14 }
  0xb1   : > { %v2087_v31 = vpop.permute.xlu1 %2086  ;;  %v704_v52 = vsel %vm537_vm5, %v2443_v28, %v2074_v7  ;;  %v703_v59 = vsel %vm537_vm5, %v2440_v27, %v2073_v6 }
  0xb2   : > { %v2089_v32 = vunpack.i.h.bf16 %v2087_v31  ;;  %v2088_v58 = vunpack.i.l.bf16 %v2087_v31  ;;  %v2082_v3 = vpop.permute.xlu0 %2081 }
  0xb3   : > { %v2084_v27 = vunpack.i.h.bf16 %v2082_v3  ;;  %v2083_v17 = vunpack.i.l.bf16 %v2082_v3 }
  0xb4   : > { %v719_v55 = vsel %vm554_vm6, %v703_v59, %v2088_v58  ;;  %v720_v20 = vsel %vm554_vm6, %v704_v52, %v2089_v32 }
  0xb5   : > { %v731_v21 = vpack.c.bf16 %v720_v20, %v719_v55  ;;  %v2097_v42 = vpop.permute.xlu1 %2096  ;;  %v706_v10 = vsel %vm537_vm5, %v2477_v38, %v2084_v27  ;;  %v705_v41 = vsel %vm537_vm5, %v2474_v37, %v2083_v17 }
  0xb6   : > { %v2099_v13 = vunpack.i.h.bf16 %v2097_v42  ;;  %v2098_v47 = vunpack.i.l.bf16 %v2097_v42  ;;  %v2092_v1 = vpop.permute.xlu0 %2091 }
  0xb7   : > { %v2094_v44 = vunpack.i.h.bf16 %v2092_v1  ;;  %v2093_v28 = vunpack.i.l.bf16 %v2092_v1  ;;  %1866 = vmatprep.mubr.msk.bf16.mxu1 %vm743_vm7, %v731_v21 }
  0xb8   : > { %v1191_v5 = vsel %vm554_vm6, %v1175_v25, %v2098_v47  ;;  %v1192_v4 = vsel %vm554_vm6, %v1176_v54, %v2099_v13 }
  0xb9   : > { %v1207_v56 = vpack.c.bf16 %v1192_v4, %v1191_v5  ;;  %v2107_v24 = vpop.permute.xlu1 %2106  ;;  %v1178_v46 = vsel %vm537_vm5, %v2551_v61, %v2094_v44  ;;  %v1177_v18 = vsel %vm537_vm5, %v2547_v60, %v2093_v28 }
  0xba   : > { %v2109_v23 = vunpack.i.h.bf16 %v2107_v24  ;;  %v2108_v45 = vunpack.i.l.bf16 %v2107_v24  ;;  %v2102_v36 = vpop.permute.xlu0 %2101 }
  0xbb   : > { %v2104_v0 = vunpack.i.h.bf16 %v2102_v36  ;;  %v2103_v2 = vunpack.i.l.bf16 %v2102_v36  ;;  %1894 = vmatprep.mubr.msk.bf16.mxu0 %vm743_vm7, %v1207_v56 }
  0xbc   : > { %v1193_v9 = vsel %vm554_vm6, %v1177_v18, %v2108_v45  ;;  %v1194_v8 = vsel %vm554_vm6, %v1178_v46, %v2109_v23 }
  0xbd   : > { %v1208_v53 = vpack.c.bf16 %v1194_v8, %v1193_v9  ;;  %v721_v61 = vsel %vm554_vm6, %v705_v41, %v2103_v2  ;;  %v722_v7 = vsel %vm554_vm6, %v706_v10, %v2104_v0  ;;  %v2117_v60 = vpop.permute.xlu1 %2116 }
  0xbe   : > { %v732_v6 = vpack.c.bf16 %v722_v7, %v721_v61  ;;  %v2112_v31 = vpop.permute.xlu0 %2111  ;;  %v2119_v14 = vunpack.i.h.bf16 %v2117_v60  ;;  %v2118_v52 = vunpack.i.l.bf16 %v2117_v60 }
  0xbf   : > { %v2114_v32 = vunpack.i.h.bf16 %v2112_v31  ;;  %v2113_v58 = vunpack.i.l.bf16 %v2112_v31  ;;  %1895 = vmatmul.mubr.msk.bf16.vlgmr.msra.gmra.mrb[0].mxu0 %vm743_vm7, %v1208_v53 }
  0xc0   : > { %1867 = vmatmul.mubr.msk.bf16.gmra.mrb[8].mxu1 %vm743_vm7, %v732_v6  ;;  %v1180_v25 = vsel %vm537_vm5, %v2610_v35, %v2119_v14  ;;  %v1179_v44 = vsel %vm537_vm5, %v2604_v33, %v2118_v52 }
  0xc1   : > { %v2127_v38 = vpop.permute.xlu1 %2126  ;;  %v708_v59 = vsel %vm537_vm5, %v2557_v63, %v2114_v32  ;;  %v707_v55 = vsel %vm537_vm5, %v2554_v62, %v2113_v58 }
  0xc2   : > { %v2129_v37 = vunpack.i.h.bf16 %v2127_v38  ;;  %v2128_v3 = vunpack.i.l.bf16 %v2127_v38  ;;  %v2122_v43 = vpop.permute.xlu0 %2121 }
  0xc3   : > { %v2124_v62 = vunpack.i.h.bf16 %v2122_v43  ;;  %v2123_v27 = vunpack.i.l.bf16 %v2122_v43 }
  0xc4   : > { %v723_v20 = vsel %vm554_vm6, %v707_v55, %v2128_v3  ;;  %v724_v21 = vsel %vm554_vm6, %v708_v59, %v2129_v37 }
  0xc5   : > { %v733_v42 = vpack.c.bf16 %v724_v21, %v723_v20  ;;  %v2137_v13 = vpop.permute.xlu1 %2136  ;;  %v710_v18 = vsel %vm537_vm5, %v2518_v51, %v2124_v62  ;;  %v709_v0 = vsel %vm537_vm5, %v2515_v50, %v2123_v27 }
  0xc6   : > { %v2139_v47 = vunpack.i.h.bf16 %v2137_v13  ;;  %v2138_v1 = vunpack.i.l.bf16 %v2137_v13  ;;  %v2132_v54 = vpop.permute.xlu0 %2131 }
  0xc7   : > { %v2134_v28 = vunpack.i.h.bf16 %v2132_v54  ;;  %v2133_v63 = vunpack.i.l.bf16 %v2132_v54  ;;  %1870 = vmatprep.mubr.msk.bf16.mxu1 %vm743_vm7, %v733_v42 }
  0xc8   : > { %v1195_v17 = vsel %vm554_vm6, %v1179_v44, %v2138_v1  ;;  %v1196_v5 = vsel %vm554_vm6, %v1180_v25, %v2139_v47 }
  0xc9   : > { %v1209_v4 = vpack.c.bf16 %v1196_v5, %v1195_v17  ;;  %v2147_v56 = vpop.permute.xlu1 %2146  ;;  %v1182_v35 = vsel %vm537_vm5, %v2678_v34, %v2134_v28  ;;  %v1181_v33 = vsel %vm537_vm5, %v2674_v29, %v2133_v63  ;;  %v3204_v5 = vld [vmem:[#allocation2_spill] sm:$0xff] }
  0xca   : > { %v2149_v24 = vunpack.i.h.bf16 %v2147_v56  ;;  %v2148_v23 = vunpack.i.l.bf16 %v2147_v56  ;;  %v2142_v45 = vpop.permute.xlu0 %2141 }
  0xcb   : > { %v2144_v36 = vunpack.i.h.bf16 %v2142_v45  ;;  %v2143_v46 = vunpack.i.l.bf16 %v2142_v45  ;;  %1898 = vmatprep.mubr.msk.bf16.mxu0 %vm743_vm7, %v1209_v4 }
  0xcc   : > { %v1197_v2 = vsel %vm554_vm6, %v1181_v33, %v2148_v23  ;;  %v1198_v10 = vsel %vm554_vm6, %v1182_v35, %v2149_v24 }
  0xcd   : > { %v1210_v41 = vpack.c.bf16 %v1198_v10, %v1197_v2  ;;  %v725_v34 = vsel %vm554_vm6, %v709_v0, %v2143_v46  ;;  %v726_v9 = vsel %vm554_vm6, %v710_v18, %v2144_v36  ;;  %v2157_v29 = vpop.permute.xlu1 %2156 }
  0xce   : > { %v734_v8 = vpack.c.bf16 %v726_v9, %v725_v34  ;;  %v2152_v53 = vpop.permute.xlu0 %2151  ;;  %v2159_v31 = vunpack.i.h.bf16 %v2157_v29  ;;  %v2158_v32 = vunpack.i.l.bf16 %v2157_v29  ;;  %v3205_v9 = vld [vmem:[#allocation3_spill] sm:$0xff] }
  0xcf   : > { %v2154_v61 = vunpack.i.h.bf16 %v2152_v53  ;;  %v2153_v7 = vunpack.i.l.bf16 %v2152_v53  ;;  %1899 = vmatmul.mubr.msk.bf16.gmra.mrb[4].mxu0 %vm743_vm7, %v1210_v41 }
  0xd0   : > { %1871 = vmatmul.mubr.msk.bf16.gmra.mrb[12].mxu1 %vm743_vm7, %v734_v8  ;;  %v1184_v20 = vsel %vm537_vm5, %v2708_v16, %v2159_v31  ;;  %v1183_v21 = vsel %vm537_vm5, %v2704_v12, %v2158_v32 }
  0xd1   : > { %v2167_v51 = vpop.permute.xlu1 %2166  ;;  %v547_v58 = vsel %vm537_vm5, %v2482_v39, %v2154_v61  ;;  %v546_v38 = vsel %vm537_vm5, %v2486_v40, %v2153_v7 }
  0xd2   : > { %v2169_v50 = vunpack.i.h.bf16 %v2167_v51  ;;  %v2168_v60 = vunpack.i.l.bf16 %v2167_v51  ;;  %v2162_v6 = vpop.permute.xlu0 %2161 }
  0xd3   : > { %v2164_v40 = vunpack.i.h.bf16 %v2162_v6  ;;  %v2163_v13 = vunpack.i.l.bf16 %v2162_v6 }
  0xd4   : > { %v563_v37 = vsel %vm554_vm6, %v546_v38, %v2168_v60  ;;  %v564_v3 = vsel %vm554_vm6, %v547_v58, %v2169_v50 }
  0xd5   : > { %v575_v43 = vpack.c.bf16 %v564_v3, %v563_v37  ;;  %v2177_v14 = vpop.permute.xlu1 %2176  ;;  %v549_v17 = vsel %vm537_vm5, %v2511_v49, %v2164_v40  ;;  %v548_v4 = vsel %vm537_vm5, %v3204_v5, %v2163_v13 }
  0xd6   : > { %v2179_v52 = vunpack.i.h.bf16 %v2177_v14  ;;  %v2178_v59 = vunpack.i.l.bf16 %v2177_v14  ;;  %v2172_v55 = vpop.permute.xlu0 %2171 }
  0xd7   : > { %v2174_v42 = vunpack.i.h.bf16 %v2172_v55  ;;  %v2173_v39 = vunpack.i.l.bf16 %v2172_v55  ;;  %1884 = vmatprep.mubr.msk.bf16.mxu1 %vm743_vm7, %v575_v43 }
  0xd8   : > { %v1199_v47 = vsel %vm554_vm6, %v1183_v21, %v2178_v59  ;;  %v1200_v1 = vsel %vm554_vm6, %v1184_v20, %v2179_v52  ;;  %v3206_v20 = vld [vmem:[#allocation4_spill] sm:$0xff] }
  0xd9   : > { %v1211_v54 = vpack.c.bf16 %v1200_v1, %v1199_v47  ;;  %v2187_v25 = vpop.permute.xlu1 %2186  ;;  %v1186_v16 = vsel %vm537_vm5, %v2722_v30, %v2174_v42  ;;  %v1185_v12 = vsel %vm537_vm5, %v2718_v48, %v2173_v39 }
  0xda   : > { %v2189_v44 = vunpack.i.h.bf16 %v2187_v25  ;;  %v2188_v28 = vunpack.i.l.bf16 %v2187_v25  ;;  %v2182_v63 = vpop.permute.xlu0 %2181 }
  0xdb   : > { %v2184_v62 = vunpack.i.h.bf16 %v2182_v63  ;;  %v2183_v27 = vunpack.i.l.bf16 %v2182_v63  ;;  %1902 = vmatprep.mubr.msk.bf16.mxu0 %vm743_vm7, %v1211_v54 }
  0xdc   : > { %v1201_v56 = vsel %vm554_vm6, %v1185_v12, %v2188_v28  ;;  %v1202_v24 = vsel %vm554_vm6, %v1186_v16, %v2189_v44 }
  0xdd   : > { %v1212_v23 = vpack.c.bf16 %v1202_v24, %v1201_v56  ;;  %v565_v30 = vsel %vm554_vm6, %v548_v4, %v2183_v27  ;;  %v566_v45 = vsel %vm554_vm6, %v549_v17, %v2184_v62  ;;  %v2197_v48 = vpop.permute.xlu1 %2196  ;;  %v2995_v17 = vld [vmem:[%s3190_s3] ss:$0 sm:$0xff] }
  0xde   : > { %v576_v35 = vpack.c.bf16 %v566_v45, %v565_v30  ;;  %v2192_v33 = vpop.permute.xlu0 %2191  ;;  %v2199_v10 = vunpack.i.h.bf16 %v2197_v48  ;;  %v2198_v41 = vunpack.i.l.bf16 %v2197_v48 }
  0xdf   : > { %v2194_v36 = vunpack.i.h.bf16 %v2192_v33  ;;  %v2193_v46 = vunpack.i.l.bf16 %v2192_v33  ;;  %1903 = vmatmul.mubr.msk.bf16.gmra.mrb[8].mxu0 %vm743_vm7, %v1212_v23 }
  0xe0   : > { %1885 = vmatmul.mubr.msk.bf16.vlgmr.msra.gmra.mrb[8].mxu1 %vm743_vm7, %v576_v35  ;;  %v1188_v6 = vsel %vm537_vm5, %v2761_v22, %v2199_v10  ;;  %v1187_v31 = vsel %vm537_vm5, %v2757_v19, %v2198_v41 }
  0xe1   : > { %v2207_v49 = vpop.permute.xlu1 %2206  ;;  %v551_v34 = vsel %vm537_vm5, %v2740_v11, %v2194_v36  ;;  %v550_v29 = vsel %vm537_vm5, %v3205_v9, %v2193_v46 }
  0xe2   : > { %v2209_v18 = vunpack.i.h.bf16 %v2207_v49  ;;  %v2208_v0 = vunpack.i.l.bf16 %v2207_v49  ;;  %v2202_v2 = vpop.permute.xlu0 %2201 }
  0xe3   : > { %v2204_v58 = vunpack.i.h.bf16 %v2202_v2  ;;  %v2203_v38 = vunpack.i.l.bf16 %v2202_v2 }
  0xe4   : > { %v567_v8 = vsel %vm554_vm6, %v550_v29, %v2208_v0  ;;  %v568_v53 = vsel %vm554_vm6, %v551_v34, %v2209_v18 }
  0xe5   : > { %v577_v61 = vpack.c.bf16 %v568_v53, %v567_v8  ;;  %v2217_v7 = vpop.permute.xlu1 %2216  ;;  %v553_v39 = vsel %vm537_vm5, %v2783_v26, %v2204_v58  ;;  %v552_v40 = vsel %vm537_vm5, %v2582_v15, %v2203_v38 }
  0xe6   : > { %v2219_v51 = vunpack.i.h.bf16 %v2217_v7  ;;  %v2218_v50 = vunpack.i.l.bf16 %v2217_v7  ;;  %v2212_v60 = vpop.permute.xlu0 %2211 }
  0xe7   : > { %v2214_v32 = vunpack.i.h.bf16 %v2212_v60  ;;  %v2213_v11 = vunpack.i.l.bf16 %v2212_v60  ;;  %1888 = vmatprep.mubr.msk.bf16.mxu1 %vm743_vm7, %v577_v61 }
  0xe8   : > { %v1203_v37 = vsel %vm554_vm6, %v1187_v31, %v2218_v50  ;;  %v1204_v3 = vsel %vm554_vm6, %v1188_v6, %v2219_v51 }
  0xe9   : > { %v1213_v43 = vpack.c.bf16 %v1204_v3, %v1203_v37  ;;  %v2227_v14 = vpop.permute.xlu1 %2226  ;;  %v1190_v22 = vsel %vm537_vm5, %v2775_v57, %v2214_v32  ;;  %v1189_v19 = vsel %vm537_vm5, %v3206_v20, %v2213_v11 }
  0xea   : > { %v2229_v52 = vunpack.i.h.bf16 %v2227_v14  ;;  %v2228_v59 = vunpack.i.l.bf16 %v2227_v14  ;;  %v2222_v55 = vpop.permute.xlu0 %2221 }
  0xeb   : > { %v2224_v21 = vunpack.i.h.bf16 %v2222_v55  ;;  %v2223_v42 = vunpack.i.l.bf16 %v2222_v55  ;;  %1906 = vmatprep.mubr.msk.bf16.mxu0 %vm743_vm7, %v1213_v43 }
  0xec   : > { %v1205_v13 = vsel %vm554_vm6, %v1189_v19, %v2228_v59  ;;  %v1206_v47 = vsel %vm554_vm6, %v1190_v22, %v2229_v52 }
  0xed   : > { %v1214_v1 = vpack.c.bf16 %v1206_v47, %v1205_v13  ;;  %v569_v57 = vsel %vm554_vm6, %v552_v40, %v2223_v42  ;;  %v570_v54 = vsel %vm554_vm6, %v553_v39, %v2224_v21 }
  0xee   : > { %v578_v25 = vpack.c.bf16 %v570_v54, %v569_v57 }
  0xef   : > { %1907 = vmatmul.mubr.msk.bf16.gmra.mrb[12].mxu0 %vm743_vm7, %v1214_v1 }
  0xf0   : > { %1889 = vmatmul.mubr.msk.bf16.gmra.mrb[12].mxu1 %vm743_vm7, %v578_v25 }
 0x16c   : > { %v1860_v44 = vpop.f32.mrb[0].mxu1 }
 0x16d   : > { %v806_v26 = vpop.f32.mrb[1].mxu1 }
 0x16e   : > { %v1861_v28 = vpop.f32.mrb[2].mxu1 }
 0x16f   : > { %v809_v63 = vpop.f32.mrb[3].mxu1 }
 0x182   : > { %v1864_v15 = vpop.f32.mrb[4].mxu1 }
 0x183   : > { %v822_v16 = vpop.f32.mrb[5].mxu1 }
 0x184   : > { %v1865_v12 = vpop.f32.mrb[6].mxu1 }
 0x185   : > { %v825_v62 = vpop.f32.mrb[7].mxu1 }
 0x192   : > { %v1896_v27 = vpop.f32.mrb[0].mxu0 }
 0x193   : > { %v1912_v5 = vadd.f32 %v1896_v27, %v1860_v44  ;;  %v1284_v4 = vpop.f32.mrb[1].mxu0 }
 0x194   : > { %v1913_v56 = vadd.f32 %v1284_v4, %v806_v26  ;;  %v1897_v24 = vpop.f32.mrb[2].mxu0 }
 0x195   : > { %v2999_v23 = vadd.f32 %v1912_v5, %v2995_v17  ;;  %v1914_v30 = vadd.f32 %v1897_v24, %v1861_v28  ;;  %v1287_v45 = vpop.f32.mrb[3].mxu0 }
 0x196   : > { %v3007_v48 = vadd.f32 %v1913_v56, %v2995_v17  ;;  %v1915_v35 = vadd.f32 %v1287_v45, %v809_v63 }
 0x197   : > { %v1815_v33 = vpack.c.bf16 %v2999_v23, %v2999_v23  ;;  %v3012_v36 = vadd.f32 %v1914_v30, %v2995_v17  ;;  %v1389_v34 = vsel %vm537_vm5, %v2999_v23, 0.0 }
 0x198   : > { %v1813_v46 = vpack.c.bf16 %v3007_v48, %v3007_v48  ;;  %v3017_v49 = vadd.f32 %v1915_v35, %v2995_v17  ;;  %v1386_v10 = vsel %vm537_vm5, %v3007_v48, 0.0 }
 0x199   : > { %1564 = vst.msk [vmem:[%s3004_s15 + $0x8] sm:$0xf] %vm1561_vm8, %v1815_v33  ;;  %v1816_v18 = vpack.c.bf16 %v3012_v36, %v3012_v36  ;;  %v1391_v6 = vsel %vm537_vm5, %v3012_v36, 0.0 }
 0x19a   : > { %1562 = vst.msk [vmem:[%s3004_s15] sm:$0xf] %vm1561_vm8, %v1813_v46  ;;  %v1814_v0 = vpack.c.bf16 %v3017_v49, %v3017_v49  ;;  %v1387_v2 = vsel %vm537_vm5, %v3017_v49, 0.0 }
 0x19b   : > { %1565 = vst.msk [vmem:[%s3004_s15 + $0xc] sm:$0xf] %vm1561_vm8, %v1816_v18  ;;  %v1388_v41 = vadd.f32 %v1387_v2, %v1386_v10 }
 0x19c   : > { %1563 = vst.msk [vmem:[%s3004_s15 + $0x4] sm:$0xf] %vm1561_vm8, %v1814_v0 }
 0x19d   : > { %v1390_v29 = vadd.f32 %v1389_v34, %v1388_v41 }
 0x19f   : > { %v1392_v58 = vadd.f32 %v1391_v6, %v1390_v29 }
 0x1a2   : > { %v1900_v9 = vpop.f32.mrb[4].mxu0 }
 0x1a3   : > { %v1916_v8 = vadd.f32 %v1900_v9, %v1864_v15  ;;  %v1300_v53 = vpop.f32.mrb[5].mxu0 }
 0x1a4   : > { %v1917_v61 = vadd.f32 %v1300_v53, %v822_v16  ;;  %v1901_v7 = vpop.f32.mrb[6].mxu0 }
 0x1a5   : > { %v3038_v51 = vadd.f32 %v1916_v8, %v2995_v17  ;;  %v1918_v50 = vadd.f32 %v1901_v7, %v1865_v12  ;;  %v1303_v60 = vpop.f32.mrb[7].mxu0 }
 0x1a6   : > { %v3043_v31 = vadd.f32 %v1917_v61, %v2995_v17  ;;  %v1919_v32 = vadd.f32 %v1303_v60, %v825_v62 }
 0x1a7   : > { %v1819_v11 = vpack.c.bf16 %v3038_v51, %v3038_v51  ;;  %v3048_v38 = vadd.f32 %v1918_v50, %v2995_v17  ;;  %v1397_v20 = vsel %vm537_vm5, %v3038_v51, 0.0 }
 0x1a8   : > { %v1393_v37 = vsel %vm537_vm5, %v3043_v31, 0.0  ;;  %v1817_v3 = vpack.c.bf16 %v3043_v31, %v3043_v31  ;;  %v3055_v43 = vadd.f32 %v1919_v32, %v2995_v17 }
 0x1a9   : > { %1568 = vst.msk [vmem:[%s3004_s15 + $0x18] sm:$0xf] %vm1561_vm8, %v1819_v11  ;;  %v1394_v14 = vadd.f32 %v1393_v37, %v1392_v58  ;;  %v1820_v52 = vpack.c.bf16 %v3048_v38, %v3048_v38  ;;  %v1399_v21 = vsel %vm537_vm5, %v3048_v38, 0.0 }
 0x1aa   : > { %1566 = vst.msk [vmem:[%s3004_s15 + $0x10] sm:$0xf] %vm1561_vm8, %v1817_v3  ;;  %v1395_v59 = vsel %vm537_vm5, %v3055_v43, 0.0  ;;  %v1818_v55 = vpack.c.bf16 %v3055_v43, %v3055_v43 }
 0x1ab   : > { %1569 = vst.msk [vmem:[%s3004_s15 + $0x1c] sm:$0xf] %vm1561_vm8, %v1820_v52  ;;  %v1396_v22 = vadd.f32 %v1395_v59, %v1394_v14 }
 0x1ac   : > { %1567 = vst.msk [vmem:[%s3004_s15 + $0x14] sm:$0xf] %vm1561_vm8, %v1818_v55 }
 0x1ad   : > { %v1398_v19 = vadd.f32 %v1397_v20, %v1396_v22 }
 0x1af   : > { %v1400_v42 = vadd.f32 %v1399_v21, %v1398_v19 }
 0x1b2   : > { %v1904_v39 = vpop.f32.mrb[8].mxu0 }
 0x1b3   : > { %v1886_v40 = vpop.f32.mrb[8].mxu1  ;;  %v1316_v13 = vpop.f32.mrb[9].mxu0 }
 0x1b4   : > { %v1920_v47 = vadd.f32 %v1904_v39, %v1886_v40  ;;  %v967_v1 = vpop.f32.mrb[9].mxu1  ;;  %v1905_v57 = vpop.f32.mrb[10].mxu0 }
 0x1b5   : > { %v1921_v54 = vadd.f32 %v1316_v13, %v967_v1  ;;  %v1887_v25 = vpop.f32.mrb[10].mxu1  ;;  %v1319_v44 = vpop.f32.mrb[11].mxu0 }
 0x1b6   : > { %v3076_v26 = vadd.f32 %v1920_v47, %v2995_v17  ;;  %v1922_v28 = vadd.f32 %v1905_v57, %v1887_v25  ;;  %v970_v63 = vpop.f32.mrb[11].mxu1 }
 0x1b7   : > { %v3079_v15 = vadd.f32 %v1921_v54, %v2995_v17  ;;  %v1923_v16 = vadd.f32 %v1319_v44, %v970_v63 }
 0x1b8   : > { %v1823_v12 = vpack.c.bf16 %v3076_v26, %v3076_v26  ;;  %v3084_v62 = vadd.f32 %v1922_v28, %v2995_v17  ;;  %v1405_v33 = vsel %vm537_vm5, %v3076_v26, 0.0 }
 0x1b9   : > { %v1401_v27 = vsel %vm537_vm5, %v3079_v15, 0.0  ;;  %v1821_v5 = vpack.c.bf16 %v3079_v15, %v3079_v15  ;;  %v1379_v4 = vadd.f32 %v1923_v16, %v2995_v17 }
 0x1ba   : > { %1572 = vst.msk [vmem:[%s3004_s15 + $0x28] sm:$0xf] %vm1561_vm8, %v1823_v12  ;;  %v1402_v56 = vadd.f32 %v1401_v27, %v1400_v42  ;;  %v1824_v24 = vpack.c.bf16 %v3084_v62, %v3084_v62  ;;  %v1407_v18 = vsel %vm537_vm5, %v3084_v62, 0.0 }
 0x1bb   : > { %1570 = vst.msk [vmem:[%s3004_s15 + $0x20] sm:$0xf] %vm1561_vm8, %v1821_v5  ;;  %v1403_v30 = vsel %vm537_vm5, %v1379_v4, 0.0  ;;  %v1822_v45 = vpack.c.bf16 %v1379_v4, %v1379_v4 }
 0x1bc   : > { %1573 = vst.msk [vmem:[%s3004_s15 + $0x2c] sm:$0xf] %vm1561_vm8, %v1824_v24  ;;  %v1404_v35 = vadd.f32 %v1403_v30, %v1402_v56 }
 0x1bd   : > { %1571 = vst.msk [vmem:[%s3004_s15 + $0x24] sm:$0xf] %vm1561_vm8, %v1822_v45 }
 0x1be   : > { %v1406_v46 = vadd.f32 %v1405_v33, %v1404_v35 }
 0x1c0   : > { %v1408_v0 = vadd.f32 %v1407_v18, %v1406_v46 }
 0x1c2   : > { %v1908_v2 = vpop.f32.mrb[12].mxu0 }
 0x1c3   : > { %v1890_v10 = vpop.f32.mrb[12].mxu1  ;;  %v1332_v41 = vpop.f32.mrb[13].mxu0 }
 0x1c4   : > { %v1924_v34 = vadd.f32 %v1908_v2, %v1890_v10  ;;  %v983_v9 = vpop.f32.mrb[13].mxu1  ;;  %v1909_v29 = vpop.f32.mrb[14].mxu0 }
 0x1c5   : > { %v1925_v8 = vadd.f32 %v1332_v41, %v983_v9  ;;  %v1891_v53 = vpop.f32.mrb[14].mxu1  ;;  %v1335_v61 = vpop.f32.mrb[15].mxu0 }
 0x1c6   : > { %v1384_v7 = vadd.f32 %v1924_v34, %v2995_v17  ;;  %v1926_v50 = vadd.f32 %v1909_v29, %v1891_v53  ;;  %v986_v60 = vpop.f32.mrb[15].mxu1 }
 0x1c7   : > { %v1382_v6 = vadd.f32 %v1925_v8, %v2995_v17  ;;  %v1927_v32 = vadd.f32 %v1335_v61, %v986_v60 }
 0x1c8   : > { %v1827_v11 = vpack.c.bf16 %v1384_v7, %v1384_v7  ;;  %v1385_v58 = vadd.f32 %v1926_v50, %v2995_v17  ;;  %v1413_v19 = vsel %vm537_vm5, %v1384_v7, 0.0 }
 0x1c9   : > { %v1409_v37 = vsel %vm537_vm5, %v1382_v6, 0.0  ;;  %v1825_v3 = vpack.c.bf16 %v1382_v6, %v1382_v6  ;;  %v1383_v14 = vadd.f32 %v1927_v32, %v2995_v17 }
 0x1ca   : > { %1576 = vst.msk [vmem:[%s3004_s15 + $0x38] sm:$0xf] %vm1561_vm8, %v1827_v11  ;;  %v1410_v52 = vadd.f32 %v1409_v37, %v1408_v0  ;;  %v1828_v59 = vpack.c.bf16 %v1385_v58, %v1385_v58  ;;  %v1415_v42 = vsel %vm537_vm5, %v1385_v58, 0.0 }
 0x1cb   : > { %1574 = vst.msk [vmem:[%s3004_s15 + $0x30] sm:$0xf] %vm1561_vm8, %v1825_v3  ;;  %v1411_v55 = vsel %vm537_vm5, %v1383_v14, 0.0  ;;  %v1826_v22 = vpack.c.bf16 %v1383_v14, %v1383_v14 }
 0x1cc   : > { %1577 = vst.msk [vmem:[%s3004_s15 + $0x3c] sm:$0xf] %vm1561_vm8, %v1828_v59  ;;  %v1412_v20 = vadd.f32 %v1411_v55, %v1410_v52 }
 0x1cd   : > { %1575 = vst.msk [vmem:[%s3004_s15 + $0x34] sm:$0xf] %vm1561_vm8, %v1826_v22 }
 0x1ce   : > { %v1414_v21 = vadd.f32 %v1413_v19, %v1412_v20 }
 0x1d0   : > { %v1416_v17 = vadd.f32 %v1415_v42, %v1414_v21 }
 0x1d2   : > { %v1417_v39 = vrot.slane %v1416_v17, 4 }
 0x1d4   : > { %v1418_v40 = vadd.f32 %v1417_v39, %v1416_v17 }
 0x1d6   : > { %v1419_v13 = vrot.slane %v1418_v40, 2 }
 0x1d8   : > { %v1420_v47 = vadd.f32 %v1419_v13, %v1418_v40 }
 0x1da   : > { %v1421_v1 = vrot.slane %v1420_v47, 1 }
 0x1dc   : > { %v1422_v57 = vadd.f32 %v1421_v1, %v1420_v47 }
 0x1de   : > { %v3122_v54 = vmul.f32 0.0078125, %v1422_v57 }
 0x1e0   : > { %v1424_v25 = vsub.f32 %v3007_v48, %v3122_v54  ;;  %v1425_v44 = vsub.f32 %v3017_v49, %v3122_v54  ;;  %v1426_v28 = vsub.f32 %v2999_v23, %v3122_v54  ;;  %v1428_v63 = vsub.f32 %v3043_v31, %v3122_v54 }
 0x1e1   : > { %v1429_v16 = vsub.f32 %v3055_v43, %v3122_v54  ;;  %v1430_v12 = vsub.f32 %v3038_v51, %v3122_v54  ;;  %v1431_v27 = vsub.f32 %v3048_v38, %v3122_v54  ;;  %v1432_v48 = vsub.f32 %v3079_v15, %v3122_v54 }
 0x1e2   : > { %v1433_v49 = vsub.f32 %v1379_v4, %v3122_v54  ;;  %v1434_v23 = vsub.f32 %v3076_v26, %v3122_v54  ;;  %v1435_v31 = vsub.f32 %v3084_v62, %v3122_v54  ;;  %v1436_v5 = vsub.f32 %v1382_v6, %v3122_v54 }
 0x1e3   : > { %v1437_v43 = vsub.f32 %v1383_v14, %v3122_v54  ;;  %v1438_v51 = vsub.f32 %v1384_v7, %v3122_v54  ;;  %v1439_v56 = vsub.f32 %v1385_v58, %v3122_v54  ;;  %v1427_v38 = vsub.f32 %v3012_v36, %v3122_v54 }
 0x1e4   : > { %v1440_v15 = vmul.f32 %v1424_v25, %v1424_v25  ;;  %v1441_v24 = vmul.f32 %v1425_v44, %v1425_v44  ;;  %v1442_v4 = vmul.f32 %v1426_v28, %v1426_v28  ;;  %v1444_v35 = vmul.f32 %v1428_v63, %v1428_v63 }
 0x1e5   : > { %v1443_v30 = vmul.f32 %v1427_v38, %v1427_v38  ;;  %v1445_v18 = vmul.f32 %v1429_v16, %v1429_v16  ;;  %v1446_v10 = vmul.f32 %v1430_v12, %v1430_v12  ;;  %v1447_v34 = vmul.f32 %v1431_v27, %v1431_v27 }
 0x1e6   : > { %v1456_v26 = vsel %vm537_vm5, %v1440_v15, 0.0  ;;  %v1457_v45 = vsel %vm537_vm5, %v1441_v24, 0.0  ;;  %v1459_v33 = vsel %vm537_vm5, %v1442_v4, 0.0  ;;  %v1463_v36 = vsel %vm537_vm5, %v1444_v35, 0.0 }
 0x1e7   : > { %v1458_v62 = vadd.f32 %v1457_v45, %v1456_v26  ;;  %v1461_v0 = vsel %vm537_vm5, %v1443_v30, 0.0  ;;  %v1465_v9 = vsel %vm537_vm5, %v1445_v18, 0.0  ;;  %v1448_v8 = vmul.f32 %v1432_v48, %v1432_v48 }
 0x1e8   : > { %v1467_v53 = vsel %vm537_vm5, %v1446_v10, 0.0  ;;  %v1449_v7 = vmul.f32 %v1433_v49, %v1433_v49  ;;  %v1469_v50 = vsel %vm537_vm5, %v1447_v34, 0.0  ;;  %v1450_v6 = vmul.f32 %v1434_v23, %v1434_v23 }
 0x1e9   : > { %v1460_v46 = vadd.f32 %v1459_v33, %v1458_v62  ;;  %v1471_v32 = vsel %vm537_vm5, %v1448_v8, 0.0  ;;  %v1451_v58 = vmul.f32 %v1435_v31, %v1435_v31  ;;  %v1452_v14 = vmul.f32 %v1436_v5, %v1436_v5 }
 0x1ea   : > { %v1473_v37 = vsel %vm537_vm5, %v1449_v7, 0.0  ;;  %v1475_v52 = vsel %vm537_vm5, %v1450_v6, 0.0  ;;  %v1453_v55 = vmul.f32 %v1437_v43, %v1437_v43  ;;  %v1454_v19 = vmul.f32 %v1438_v51, %v1438_v51 }
 0x1eb   : > { %v1462_v2 = vadd.f32 %v1461_v0, %v1460_v46  ;;  %v1477_v22 = vsel %vm537_vm5, %v1451_v58, 0.0  ;;  %v1479_v21 = vsel %vm537_vm5, %v1452_v14, 0.0  ;;  %v1455_v17 = vmul.f32 %v1439_v56, %v1439_v56 }
 0x1ec   : > { %v1481_v39 = vsel %vm537_vm5, %v1453_v55, 0.0  ;;  %v1483_v13 = vsel %vm537_vm5, %v1454_v19, 0.0 }
 0x1ed   : > { %v1464_v41 = vadd.f32 %v1463_v36, %v1462_v2  ;;  %v1485_v1 = vsel %vm537_vm5, %v1455_v17, 0.0 }
 0x1ef   : > { %v1466_v29 = vadd.f32 %v1465_v9, %v1464_v41 }
 0x1f1   : > { %v1468_v61 = vadd.f32 %v1467_v53, %v1466_v29 }
 0x1f3   : > { %v1470_v60 = vadd.f32 %v1469_v50, %v1468_v61 }
 0x1f5   : > { %v1472_v11 = vadd.f32 %v1471_v32, %v1470_v60 }
 0x1f7   : > { %v1474_v3 = vadd.f32 %v1473_v37, %v1472_v11 }
 0x1f9   : > { %v1476_v59 = vadd.f32 %v1475_v52, %v1474_v3 }
 0x1fb   : > { %v1478_v20 = vadd.f32 %v1477_v22, %v1476_v59 }
 0x1fd   : > { %v1480_v42 = vadd.f32 %v1479_v21, %v1478_v20 }
 0x1ff   : > { %v1482_v40 = vadd.f32 %v1481_v39, %v1480_v42 }
 0x201   : > { %v1484_v47 = vadd.f32 %v1483_v13, %v1482_v40 }
 0x203   : > { %v1486_v57 = vadd.f32 %v1485_v1, %v1484_v47 }
 0x205   : > { %v1487_v25 = vrot.slane %v1486_v57, 4 }
 0x207   : > { %v1488_v44 = vadd.f32 %v1487_v25, %v1486_v57 }
 0x209   : > { %v1489_v28 = vrot.slane %v1488_v44, 2 }
 0x20b   : > { %v1490_v63 = vadd.f32 %v1489_v28, %v1488_v44 }
 0x20d   : > { %v1491_v16 = vrot.slane %v1490_v63, 1 }
 0x20f   : > { %v1492_v12 = vadd.f32 %v1491_v16, %v1490_v63 }
 0x211   : > { %v1494_v27 = vsel %vm1493_vm9, %v3122_v54, %v1492_v12 }
 0x212   : > { %1496 = vst.msk [vmem:[%s323_s25] sm:$0x3] %vm1495_vm10, %v1494_v27 }
 0x213 PF: > { %s16_s22 = sadd.s32 1, %s2283_s22   ;;  %s3207_s18 = smov %s2275_s20 }
 0x214   : > { %p13_p10 = scmp.ge.s32.totalorder %s16_s22, 6   ;;  %s3208_s19 = smov %s2279_s21 }
 0x215   : > { %s3209_s20 = smov %s3212_s23  ;;  %s3210_s21 = smov %s3216_s24 }
 0x216   :  { %15 = sbr.rel (!%p13_p10) target bundleno = 3 (0x3), region = 83 }

// kernel: residual_block_pallas.4
= control target key start
LH: loop header
LB: loop body
LE: loop exit
PB: predicated region body
PF: predicated region fallthrough
CT: control target
= control target key end

     0   :  { %s2553_s24 = smov 0   ;;  %s2555_s25 = smov 0   ;;  %s3460_s0 = inlined_call_operand.vmem [shape: bf16[2,16,16,4], index: 0, kind: input, shape index: {}]   ;;  %s3461_s1 = inlined_call_operand.vmem [shape: bf16[2,2,2,16,4], index: 1, kind: input, shape index: {}]   ;;  %s3462_s2 = inlined_call_operand.vmem [shape: f32[1,4], index: 2, kind: input, shape index: {}]   ;;  %s3463_s3 = inlined_call_operand.vmem [shape: f32[1,4], index: 3, kind: input, shape index: {}]   ;;  %s3464_s4 = inlined_call_operand.vmem [shape: bf16[3,12,4], index: 4, kind: input, shape index: {}]   ;;  %s3465_s5 = inlined_call_operand.vmem [shape: f32[1,4], index: 5, kind: input, shape index: {}]   ;;  %s3466_s6 = inlined_call_operand.vmem [shape: bf16[2,16,16,4], index: 6, kind: output, shape index: {0}]   ;;  %s3467_s7 = inlined_call_operand.vmem [shape: f32[2,2,2,4], index: 7, kind: output, shape index: {1}]  }
   0x1   :  { %s2557_s26 = smov 0   ;;  %s2559_s27 = smov 0  }
   0x2   :  { %s2561_s28 = smov 0  }
   0x3 LB: > { %s27_s29 = sadd.s32 1, %s2501_s26  ;;  %s30_s30 = sadd.s32 1, %s2505_s27  ;;  %s2509_s28 = sphi %s2561_s28, %s18_s28   ;;  %s2505_s27 = sphi %s2559_s27, %s3485_s27   ;;  %s2501_s26 = sphi %s2557_s26, %s3484_s26   ;;  %s2497_s25 = sphi %s2555_s25, %s3483_s25   ;;  %s2493_s24 = sphi %s2553_s24, %s3482_s24  }
   0x4   : > { %p28_p0 = scmp.ge.s32.totalorder %s27_s29, 2  ;;  %p1937_p1 = scmp.ge.s32.totalorder %s2509_s28, 1 }
   0x5   : > { %p280_p2 = scmp.lt.s32.totalorder %s2509_s28, 5 }
   0x6   : > { %s3487_s29 = smov (%p28_p0, %s27_s29), 0  ;;  %s3489_s30 = smov (!%p28_p0, %s30_s30), %s2505_s27 }
   0x7   : > { %p281_p3 = pnand %p1937_p1, %p280_p2  ;;  %p32_p4 = scmp.ge.s32.totalorder %s3489_s30, 2 }
   0x9   : > { %s3491_s30 = smov (%p32_p4, %s3489_s30), 0  ;;  %284 = sbr.rel (%p281_p3) target bundleno = 540 (0x21c), region = 44 }
  0x10   : > { %s1938_s8 = sshll.u32 %s2493_s24, 3  ;;  %p340_p5 = scmp.lt.s32.totalorder %s2497_s25, 1  ;;  %v545_v0 = vlaneseq  ;;  %v2603_v1 = vld [vmem:[%s3462_s2] ss:$0 sm:$0xff] }
  0x11   : > { %p342_p6 = scmp.lt.s32.totalorder %s1938_s8, 15  ;;  %p352_p7 = scmp.lt.s32.totalorder %s2493_s24, 1  ;;  %v2618_v11 = vld [vmem:[%s3463_s3] ss:$0 sm:$0xff] }
  0x12   : > { %s3493_s25 = smov (!%p340_p5, %s2497_s25), 1  ;;  %v2605_v2 = vshrl.u32 %v545_v0, 7  ;;  %s2511_s23 = smov 8  }
  0x13   : > { %s3495_s8 = smov (!%p342_p6, %s1938_s8), 15  ;;  %s1940_s9 = sshll.u32 %s3493_s25, 5 }
  0x14   : > { %s1939_s10 = sshll.u32 %s3495_s8, 1  ;;  %s1949_s18 = sshll.u32 %s3493_s25, 1  ;;  %vm568_vm0 = vcmp.lt.s32.totalorder %v2605_v2, 1  ;;  %vm589_vm1 = vcmp.eq.s32.totalorder %v2605_v2, 0  ;;  %vm1206_vm12 = vcmp.lt.s32.totalorder %v2605_v2, 7 }
  0x15   : > { %s2590_s11 = sadd.s32 %s1940_s9, %s1939_s10  ;;  %s2512_s8 = smov 4  }
  0x16   : > { %s1941_s12 = sshll.u32 %s2590_s11, 2  ;;  %s1943_s10 = sshll.u32 %s3493_s25, 3 }
  0x17   : > { %s2598_s15 = scalar_lea.vmem %s3460_s0, %s1941_s12  ;;  %p539_p8 = scmp.eq.s32.totalorder %s2493_s24, 1 }
  0x18   : > { %v2059_v3 = vld [vmem:[%s2598_s15 + $0x8] sm:$0xff]   ;;  %v2020_v4 = vld [vmem:[%s2598_s15] sm:$0xff]   ;;  %v2060_v5 = vld [vmem:[%s2598_s15 + $0x10] sm:$0xff]   ;;  %s2612_s19 = scalar_select %p352_p7, %s2493_s24, 1 }
  0x19   : > { %v2025_v6 = vunpack.c.l.bf16 %v2059_v3  ;;  %v2026_v7 = vunpack.c.h.bf16 %v2059_v3  ;;  %v2021_v8 = vunpack.c.l.bf16 %v2020_v4  ;;  %v2022_v9 = vunpack.c.h.bf16 %v2020_v4  ;;  %v2061_v10 = vld [vmem:[%s2598_s15 + $0x18] sm:$0xff]   ;;  %v2062_v57 = vld [vmem:[%s2598_s15 + $0x20] sm:$0xff]   ;;  %p533_p9 = scmp.eq.s32.totalorder %s2493_s24, 0  ;;  %s3277_s14 = scalar_lea.vmem %s3466_s6, %s1941_s12 }
  0x1a   : > { %v2029_v12 = vunpack.c.l.bf16 %v2060_v5  ;;  %v2030_v13 = vunpack.c.h.bf16 %v2060_v5  ;;  %v2033_v14 = vunpack.c.l.bf16 %v2061_v10  ;;  %v2034_v15 = vunpack.c.h.bf16 %v2061_v10  ;;  %s2621_s22 = sadd.s32 %s1949_s18, %s2612_s19  ;;  %s1942_s9 = sshll.u32 %s2612_s19, 2 }
  0x1b   : > { %v429_v16 = vmul.f32 %v2025_v6, %v2603_v1  ;;  %v430_v17 = vmul.f32 %v2026_v7, %v2603_v1  ;;  %v427_v18 = vmul.f32 %v2021_v8, %v2603_v1  ;;  %v428_v19 = vmul.f32 %v2022_v9, %v2603_v1  ;;  %s356_s13 = sadd.s32 %s1943_s10, %s1942_s9  ;;  %s1950_s11 = sshll.u32 %s2621_s22, 1 }
  0x1c   : > { %v431_v20 = vmul.f32 %v2029_v12, %v2603_v1  ;;  %v432_v21 = vmul.f32 %v2030_v13, %v2603_v1  ;;  %v433_v22 = vmul.f32 %v2033_v14, %v2603_v1  ;;  %v434_v29 = vmul.f32 %v2034_v15, %v2603_v1  ;;  %v2063_v14 = vld [vmem:[%s2598_s15 + $0x28] sm:$0xff]   ;;  %s1944_s25 = sshll.u32 %s356_s13, 2 }
  0x1d   : > { %v451_v23 = vadd.f32 %v2618_v11, %v429_v16  ;;  %v452_v24 = vadd.f32 %v2618_v11, %v430_v17  ;;  %v449_v25 = vadd.f32 %v2618_v11, %v427_v18  ;;  %v450_v26 = vadd.f32 %v2618_v11, %v428_v19  ;;  %s2797_s17 = scalar_lea.vmem %s3461_s1, %s1944_s25 }
  0x1e   : > { %v453_v27 = vadd.f32 %v2618_v11, %v431_v20  ;;  %v454_v28 = vadd.f32 %v2618_v11, %v432_v21  ;;  %v455_v30 = vadd.f32 %v2618_v11, %v433_v22  ;;  %v456_v44 = vadd.f32 %v2618_v11, %v434_v29  ;;  %s2935_s9 = scalar_select %p533_p9, 1, 0 }
  0x1f   : > { %vm467_vm2 = vcmp.gt.f32.partialorder %v451_v23, 0.0  ;;  %vm468_vm3 = vcmp.gt.f32.partialorder %v452_v24, 0.0  ;;  %v483_v31 = vmul.f32 0.01, %v451_v23  ;;  %v484_v32 = vmul.f32 0.01, %v452_v24 }
  0x20   : > { %vm465_vm4 = vcmp.gt.f32.partialorder %v449_v25, 0.0  ;;  %vm466_vm5 = vcmp.gt.f32.partialorder %v450_v26, 0.0  ;;  %v481_v33 = vmul.f32 0.01, %v449_v25  ;;  %v482_v34 = vmul.f32 0.01, %v450_v26 }
  0x21   : > { %v2640_v35 = vsel %vm467_vm2, %v451_v23, %v483_v31  ;;  %v2642_v36 = vsel %vm468_vm3, %v452_v24, %v484_v32  ;;  %vm469_vm6 = vcmp.gt.f32.partialorder %v453_v27, 0.0  ;;  %vm470_vm7 = vcmp.gt.f32.partialorder %v454_v28, 0.0 }
  0x22   : > { %v2238_v37 = vpack.i.bf16 %v2642_v36, %v2640_v35  ;;  %v2646_v38 = vsel %vm465_vm4, %v449_v25, %v481_v33  ;;  %v2648_v39 = vsel %vm466_vm5, %v450_v26, %v482_v34  ;;  %v485_v40 = vmul.f32 0.01, %v453_v27 }
  0x23   : > { %v2228_v41 = vpack.i.bf16 %v2648_v39, %v2646_v38  ;;  %v486_v42 = vmul.f32 0.01, %v454_v28  ;;  %v549_v43 = vrot.slane %v2646_v38, 7  ;;  %v559_v46 = vrot.slane %v2648_v39, 7 }
  0x24   : > { %2239 = vrot.lane.b32.xlu1 %v2238_v37, %s2511_s23  ;;  %v2655_v45 = vsel %vm469_vm6, %v453_v27, %v485_v40  ;;  %v550_v47 = vrot.slane %v2640_v35, 7  ;;  %v560_v48 = vrot.slane %v2642_v36, 7  ;;  %vm471_vm8 = vcmp.gt.f32.partialorder %v455_v30, 0.0 }
  0x25   : > { %2229 = vrot.lane.b32.xlu0 %v2228_v41, %s2512_s8  ;;  %v2662_v49 = vsel %vm470_vm7, %v454_v28, %v486_v42  ;;  %v551_v50 = vrot.slane %v2655_v45, 7  ;;  %v2669_v52 = vsel %vm568_vm0, %v549_v43, %v559_v46  ;;  %v580_v53 = vsel %vm568_vm0, %v559_v46, %v549_v43 }
  0x26   : > { %v2243_v51 = vpack.i.bf16 %v2662_v49, %v2655_v45  ;;  %v2675_v54 = vsel %vm589_vm1, 0.0, %v580_v53  ;;  %v581_v55 = vsel %vm568_vm0, %v560_v48, %v550_v47  ;;  %v561_v56 = vrot.slane %v2662_v49, 7 }
  0x27   : > { %vm472_vm9 = vcmp.gt.f32.partialorder %v456_v44, 0.0  ;;  %v2684_v58 = vsel %vm568_vm0, %v550_v47, %v560_v48  ;;  %v487_v59 = vmul.f32 0.01, %v455_v30  ;;  %v488_v60 = vmul.f32 0.01, %v456_v44 }
  0x28   : > { %2244 = vrot.lane.b32.xlu1 %v2243_v51, %s2511_s23  ;;  %v2253_v61 = vpack.i.bf16 %v2669_v52, %v2675_v54  ;;  %v2691_v62 = vsel %vm589_vm1, 0.0, %v581_v55  ;;  %v2695_v63 = vsel %vm568_vm0, %v551_v50, %v561_v56  ;;  %v582_v0 = vsel %vm568_vm0, %v561_v56, %v551_v50 }
  0x29   : > { %2234 = vrot.lane.b32.xlu0 %v2238_v37, %s2512_s8  ;;  %v2701_v3 = vsel %vm589_vm1, 0.0, %v582_v0  ;;  %v2704_v4 = vsel %vm471_vm8, %v455_v30, %v487_v59  ;;  %v2706_v5 = vsel %vm472_vm9, %v456_v44, %v488_v60  ;;  %v2037_v6 = vunpack.c.l.bf16 %v2062_v57  ;;  %v2064_v37 = vld [vmem:[%s2598_s15 + $0x30] sm:$0xff]   ;;  %v2065_v60 = vld [vmem:[%s2598_s15 + $0x38] sm:$0xff]   ;;  %s2832_s15 = scalar_select %p539_p8, 1, 0 }
  0x2a   : > { %v552_v7 = vrot.slane %v2704_v4, 7  ;;  %v562_v8 = vrot.slane %v2706_v5, 7  ;;  %v2258_v9 = vpack.i.bf16 %v2684_v58, %v2691_v62  ;;  %v2038_v10 = vunpack.c.h.bf16 %v2062_v57 }
  0x2b   : > { %v435_v12 = vmul.f32 %v2037_v6, %v2603_v1  ;;  %v2268_v13 = vpack.i.bf16 %v2695_v63, %v2701_v3  ;;  %v2041_v20 = vunpack.c.l.bf16 %v2063_v14  ;;  %v2042_v23 = vunpack.c.h.bf16 %v2063_v14 }
  0x2c   : > { %2249 = vrot.lane.b32.xlu1 %v2243_v51, %s2512_s8  ;;  %v583_v15 = vsel %vm568_vm0, %v562_v8, %v552_v7  ;;  %v436_v16 = vmul.f32 %v2038_v10, %v2603_v1  ;;  %v2727_v21 = vsel %vm568_vm0, %v552_v7, %v562_v8  ;;  %v2737_v27 = vadd.s32 8, %v2605_v2 }
  0x2d   : > { %2254 = vrot.lane.b32.xlu0 %v2253_v61, %s2512_s8  ;;  %v457_v17 = vadd.f32 %v2618_v11, %v435_v12  ;;  %v2731_v22 = vsel %vm589_vm1, 0.0, %v583_v15  ;;  %v1187_v28 = vrot.slane %v2646_v38, 1  ;;  %v1197_v31 = vrot.slane %v2648_v39, 1 }
  0x2e   : > { %v458_v18 = vadd.f32 %v2618_v11, %v436_v16  ;;  %v2288_v29 = vpack.i.bf16 %v2727_v21, %v2731_v22  ;;  %v437_v32 = vmul.f32 %v2041_v20, %v2603_v1  ;;  %v438_v34 = vmul.f32 %v2042_v23, %v2603_v1 }
  0x2f   : > { %vm473_vm10 = vcmp.gt.f32.partialorder %v457_v17, 0.0  ;;  %v489_v19 = vmul.f32 0.01, %v457_v17  ;;  %v2293_v41 = vpack.i.bf16 %v2706_v5, %v2704_v4  ;;  %v1218_v42 = vsel %vm1206_vm12, %v1197_v31, %v1187_v28 }
  0x30   : > { %2259 = vrot.lane.b32.xlu1 %v2258_v9, %s2512_s8  ;;  %vm474_vm11 = vcmp.gt.f32.partialorder %v458_v18, 0.0  ;;  %v490_v24 = vmul.f32 0.01, %v458_v18  ;;  %vm1228_vm13 = vcmp.eq.s32.totalorder %v2737_v27, 15  ;;  %v459_v43 = vadd.f32 %v2618_v11, %v437_v32 }
  0x31   : > { %2269 = vrot.lane.b32.xlu0 %v2268_v13, %s2511_s23  ;;  %v2733_v25 = vsel %vm473_vm10, %v457_v17, %v489_v19  ;;  %v460_v44 = vadd.f32 %v2618_v11, %v438_v34  ;;  %v2045_v46 = vunpack.c.l.bf16 %v2064_v37  ;;  %v2046_v50 = vunpack.c.h.bf16 %v2064_v37  ;;  %v2066_v19 = vld [vmem:[%s2797_s17 + $0x8] sm:$0xff]  }
  0x32   : > { %v553_v26 = vrot.slane %v2733_v25, 7  ;;  %v2743_v30 = vsel %vm474_vm11, %v458_v18, %v490_v24  ;;  %v2775_v51 = vsel %vm1206_vm12, %v1187_v28, %v1197_v31  ;;  %v2779_v53 = vsel %vm1228_vm13, 0.0, %v1218_v42 }
  0x33   : > { %v563_v33 = vrot.slane %v2743_v30, 7  ;;  %v2303_v55 = vpack.i.bf16 %v2743_v30, %v2733_v25  ;;  %v491_v56 = vmul.f32 0.01, %v459_v43  ;;  %v1188_v57 = vrot.slane %v2640_v35, 1 }
  0x34   : > { %2264 = vrot.lane.b32.xlu1 %v2258_v9, %s2511_s23  ;;  %v1198_v59 = vrot.slane %v2642_v36, 1  ;;  %v492_v0 = vmul.f32 0.01, %v460_v44  ;;  %v439_v6 = vmul.f32 %v2045_v46, %v2603_v1  ;;  %v440_v7 = vmul.f32 %v2046_v50, %v2603_v1 }
  0x35   : > { %2274 = vrot.lane.b32.xlu0 %v2268_v13, %s2512_s8  ;;  %v584_v40 = vsel %vm568_vm0, %v563_v33, %v553_v26  ;;  %v2767_v47 = vsel %vm568_vm0, %v553_v26, %v563_v33  ;;  %vm475_vm14 = vcmp.gt.f32.partialorder %v459_v43, 0.0  ;;  %vm476_vm15 = vcmp.gt.f32.partialorder %v460_v44, 0.0 }
  0x36   : > { %3473 = vst [vmem:[#allocation2_spill] sm:$0xff] %v2767_v47  ;;  %v2771_v48 = vsel %vm589_vm1, 0.0, %v584_v40  ;;  %v2313_v8 = vpack.i.bf16 %v2779_v53, %v2775_v51  ;;  %v2049_v9 = vunpack.c.l.bf16 %v2065_v60  ;;  %v2050_v10 = vunpack.c.h.bf16 %v2065_v60 }
  0x37   : > { %3474 = vst [vmem:[#allocation3_spill] sm:$0xff] %v2771_v48  ;;  %v2790_v61 = vpack.i.bf16 %v2767_v47, %v2771_v48  ;;  %v1219_v12 = vsel %vm1206_vm12, %v1198_v59, %v1188_v57  ;;  %v1189_v13 = vrot.slane %v2655_v45, 1  ;;  %v1199_v14 = vrot.slane %v2662_v49, 1 }
  0x38   : > { %2289 = vrot.lane.b32.xlu1 %v2288_v29, %s2511_s23  ;;  %v2808_v15 = vsel %vm475_vm14, %v459_v43, %v491_v56  ;;  %v2810_v16 = vsel %vm476_vm15, %v460_v44, %v492_v0  ;;  %v461_v17 = vadd.f32 %v2618_v11, %v439_v6  ;;  %v462_v18 = vadd.f32 %v2618_v11, %v440_v7 }
  0x39   : > { %2279 = vrot.lane.b32.xlu0 %v2288_v29, %s2512_s8  ;;  %v2818_v20 = vsel %vm1206_vm12, %v1188_v57, %v1198_v59  ;;  %v441_v23 = vmul.f32 %v2049_v9, %v2603_v1  ;;  %v442_v24 = vmul.f32 %v2050_v10, %v2603_v1  ;;  %v2323_v26 = vpack.i.bf16 %v2810_v16, %v2808_v15 }
  0x3a   : > { %v2827_v28 = vsel %vm1228_vm13, 0.0, %v1219_v12  ;;  %v2057_v29 = vunpack.c.l.bf16 %v2066_v19  ;;  %v2058_v31 = vunpack.c.h.bf16 %v2066_v19  ;;  %v1220_v32 = vsel %vm1206_vm12, %v1199_v14, %v1189_v13 }
  0x3b   : > { %v493_v33 = vmul.f32 0.01, %v461_v17  ;;  %v494_v34 = vmul.f32 0.01, %v462_v18  ;;  %vm477_vm2 = vcmp.gt.f32.partialorder %v461_v17, 0.0  ;;  %vm478_vm3 = vcmp.gt.f32.partialorder %v462_v18, 0.0 }
  0x3c   : > { %2294 = vrot.lane.b32.xlu1 %v2293_v41, %s2511_s23  ;;  %v515_v37 = vmul.f32 %v2057_v29, %v2603_v1  ;;  %v516_v40 = vmul.f32 %v2058_v31, %v2603_v1  ;;  %v463_v42 = vadd.f32 %v2618_v11, %v441_v23  ;;  %v464_v43 = vadd.f32 %v2618_v11, %v442_v24 }
  0x3d   : > { %2284 = vrot.lane.b32.xlu0 %v2293_v41, %s2512_s8  ;;  %v2838_v41 = vsel %vm1206_vm12, %v1189_v13, %v1199_v14  ;;  %v2333_v44 = vpack.i.bf16 %v2827_v28, %v2818_v20  ;;  %v2852_v56 = vsel %vm477_vm2, %v461_v17, %v493_v33  ;;  %v2854_v57 = vsel %vm478_vm3, %v462_v18, %v494_v34 }
  0x3e   : > { %v519_v46 = vadd.f32 %v2618_v11, %v515_v37  ;;  %v520_v50 = vadd.f32 %v2618_v11, %v516_v40  ;;  %v541_v59 = vstv %s2832_s15  ;;  %v495_v6 = vmul.f32 0.01, %v463_v42 }
  0x3f   : > { %v496_v7 = vmul.f32 0.01, %v464_v43  ;;  %v1200_v9 = vrot.slane %v2706_v5, 1  ;;  %vm479_vm6 = vcmp.gt.f32.partialorder %v463_v42, 0.0  ;;  %vm480_vm7 = vcmp.gt.f32.partialorder %v464_v43, 0.0 }
  0x40   : > { %2304 = vrot.lane.b32.xlu1 %v2303_v55, %s2511_s23  ;;  %vm523_vm4 = vcmp.gt.f32.partialorder %v519_v46, 0.0  ;;  %vm524_vm5 = vcmp.gt.f32.partialorder %v520_v50, 0.0  ;;  %v527_v60 = vmul.f32 0.01, %v519_v46  ;;  %v528_v0 = vmul.f32 0.01, %v520_v50 }
  0x41   : > { %2299 = vrot.lane.b32.xlu0 %v2790_v61, %s2511_s23  ;;  %v2338_v12 = vpack.i.bf16 %v2854_v57, %v2852_v56  ;;  %vm542_vm8 = vcmp.eq.s32.totalorder %v541_v59, 1  ;;  %v3468_v17 = vrot.slane %v2852_v56, 7  ;;  %v2866_v18 = vsel %vm479_vm6, %v463_v42, %v495_v6  ;;  %v2468_v6 = vld [vmem:[%s3464_s4 + $0x8] sm:$0x3f]  }
  0x42   : > { %v531_v13 = vsel %vm523_vm4, %v519_v46, %v527_v60  ;;  %v532_v14 = vsel %vm524_vm5, %v520_v50, %v528_v0  ;;  %v2868_v19 = vsel %vm480_vm7, %v464_v43, %v496_v7  ;;  %v3469_v29 = vrot.slane %v2854_v57, 7  ;;  %v2052_v7 = vld [vmem:[%s2797_s17] sm:$0xff]   ;;  %s377_s17 = scalar_lea.vmem %s3467_s7, %s1950_s11 }
  0x43   : > { %v2873_v24 = vsel %vm542_vm8, 0.0, %v531_v13  ;;  %v556_v31 = vrot.slane %v2866_v18, 7  ;;  %v566_v34 = vrot.slane %v2868_v19, 7  ;;  %v1191_v40 = vrot.slane %v2733_v25, 1 }
  0x44   : > { %2314 = vrot.lane.b32.xlu1 %v2313_v8, %s2512_s8  ;;  %v1190_v8 = vrot.slane %v2704_v4, 1  ;;  %v557_v33 = vrot.slane %v2873_v24, 7  ;;  %v1201_v42 = vrot.slane %v2743_v30, 1  ;;  %v586_v43 = vsel %vm568_vm0, %v3469_v29, %v3468_v17 }
  0x45   : > { %2309 = vrot.lane.b32.xlu0 %v2303_v55, %s2512_s8  ;;  %v2850_v55 = vsel %vm1228_vm13, 0.0, %v1220_v32  ;;  %v2902_v46 = vsel %vm589_vm1, 0.0, %v586_v43  ;;  %v577_v50 = vsel %vm568_vm0, %v556_v31, %v566_v34  ;;  %v587_v59 = vsel %vm568_vm0, %v566_v34, %v556_v31 }
  0x46   : > { %v2343_v10 = vpack.i.bf16 %v2850_v55, %v2838_v41  ;;  %v1221_v23 = vsel %vm1206_vm12, %v1200_v9, %v1190_v8  ;;  %v2885_v37 = vsel %vm1206_vm12, %v1190_v8, %v1200_v9  ;;  %v2363_v60 = vpack.i.bf16 %v2868_v19, %v2866_v18 }
  0x47   : > { %v607_v0 = vsel %vm589_vm1, 0.0, %v587_v59  ;;  %vm956_vm9 = vcmask 1045504   ;;  %v2053_v34 = vunpack.c.l.bf16 %v2052_v7  ;;  %v554_v43 = vrot.slane %v2808_v15, 7 }
  0x48   : > { %2324 = vrot.lane.b32.xlu1 %v2323_v26, %s2511_s23  ;;  %v2918_v8 = vpack.i.bf16 %v577_v50, %v607_v0  ;;  %2182 = vmatprep.subr.msk.bf16.mxu1 %vm956_vm9, %v2468_v6  ;;  %v2054_v50 = vunpack.c.h.bf16 %v2052_v7  ;;  %v2953_v59 = vsel %vm1206_vm12, %v1191_v40, %v1201_v42  ;;  %v958_v17 = vsel %vm956_vm9, %v2468_v6, 0 }
  0x49   : > { %2319 = vrot.lane.b32.xlu0 %v2323_v26, %s2512_s8  ;;  %v2875_v26 = vsel %vm542_vm8, 0.0, %v532_v14  ;;  %v1222_v14 = vsel %vm1206_vm12, %v1201_v42, %v1191_v40  ;;  %v535_v29 = vstv %s2935_s9  ;;  %2095 = vmatpush3.bf16.msra.mxu1 %v958_v17  ;;  %vm1681_vm15 = vcmask 1040384  }
  0x4a   : > { %v567_v32 = vrot.slane %v2875_v26, 7  ;;  %v2957_v0 = vsel %vm1228_vm13, 0.0, %v1222_v14  ;;  %v2378_v7 = vpack.i.bf16 %v2875_v26, %v2873_v24  ;;  %vm536_vm11 = vcmp.eq.s32.totalorder %v535_v29, 1 }
  0x4b   : > { %v2383_v6 = vpack.i.bf16 %v2957_v0, %v2953_v59  ;;  %v1193_v29 = vrot.slane %v2852_v56, 1  ;;  %vm1683_vm2 = vcmask 25600  }
  0x4c   : > { %2334 = vrot.lane.b32.xlu1 %v2333_v44, %s2511_s23  ;;  %v2922_v9 = vsel %vm568_vm0, %v557_v33, %v567_v32 }
  0x4d   : > { %2329 = vrot.lane.b32.xlu0 %v2333_v44, %s2512_s8  ;;  %v2898_v44 = vsel %vm1228_vm13, 0.0, %v1221_v23  ;;  %v588_v23 = vsel %vm568_vm0, %v567_v32, %v557_v33  ;;  %v564_v32 = vrot.slane %v2810_v16, 7  ;;  %v514_v33 = vmul.f32 %v2054_v50, %v2603_v1 }
  0x4e   : > { %v2373_v13 = vpack.i.bf16 %v2898_v44, %v2885_v37  ;;  %v2942_v31 = vsel %vm589_vm1, 0.0, %v588_v23  ;;  %v513_v23 = vmul.f32 %v2053_v34, %v2603_v1  ;;  %v1202_v34 = vrot.slane %v2810_v16, 1 }
  0x4f   : > { %v585_v1 = vsel %vm568_vm0, %v564_v32, %v554_v43  ;;  %v518_v17 = vadd.f32 %v2618_v11, %v514_v33 }
  0x50   : > { %2344 = vrot.lane.b32.xlu1 %v2343_v10, %s2511_s23  ;;  %v517_v42 = vadd.f32 %v2618_v11, %v513_v23  ;;  %v2988_v11 = vsel %vm568_vm0, %v554_v43, %v564_v32  ;;  %v1203_v32 = vrot.slane %v2854_v57, 1 }
  0x51   : > { %2339 = vrot.lane.b32.xlu0 %v2338_v12, %s2511_s23  ;;  %vm522_vm14 = vcmp.gt.f32.partialorder %v518_v17, 0.0  ;;  %v526_v50 = vmul.f32 0.01, %v518_v17 }
  0x52   : > { %vm521_vm10 = vcmp.gt.f32.partialorder %v517_v42, 0.0  ;;  %v525_v14 = vmul.f32 0.01, %v517_v42 }
  0x54   : > { %2354 = vrot.lane.b32.xlu1 %v2343_v10, %s2512_s8  ;;  %v2469_v10 = vld [vmem:[%s3464_s4] sm:$0x3f]   ;;  %v529_v23 = vsel %vm521_vm10, %v517_v42, %v525_v14 }
  0x55   : > { %2349 = vrot.lane.b32.xlu0 %v2338_v12, %s2512_s8  ;;  %v2470_v12 = vld [vmem:[%s3464_s4 + $0x10] sm:$0x3f]   ;;  %2183 = vmatprep.subr.msk.bf16.mxu0 %vm956_vm9, %v2469_v10  ;;  %v2994_v33 = vsel %vm536_vm11, 0.0, %v529_v23 }
  0x56   : > { %v2968_v40 = vsel %vm956_vm9, %v2470_v12, 0  ;;  %2184 = vmatprep.subr.msk.bf16.mxu1 %vm956_vm9, %v2469_v10  ;;  %v548_v42 = vrot.slane %v2994_v33, 7  ;;  %v1186_v14 = vrot.slane %v2994_v33, 1 }
  0x58   : > { %2364 = vrot.lane.b32.xlu1 %v2363_v60, %s2511_s23 }
  0x59   : > { %2359 = vrot.lane.b32.xlu0 %v2363_v60, %s2512_s8  ;;  %v2965_v60 = vsel %vm956_vm9, %v2469_v10, 0  ;;  %v1192_v10 = vrot.slane %v2808_v15, 1 }
  0x5a   : > { %2113 = vmatpush3.bf16.msra.mxu0 %v2965_v60 }
  0x5b   : > { %2185 = vmatprep.subr.msk.bf16.mxu0 %vm956_vm9, %v2470_v12  ;;  %v530_v12 = vsel %vm522_vm14, %v518_v17, %v526_v50  ;;  %v1223_v43 = vsel %vm1206_vm12, %v1202_v34, %v1192_v10 }
  0x5c   : > { %2374 = vrot.lane.b32.xlu1 %v2373_v13, %s2511_s23  ;;  %v538_v48 = vsel %vm536_vm11, 0.0, %v530_v12 }
  0x5d   : > { %2369 = vrot.lane.b32.xlu0 %v2373_v13, %s2512_s8  ;;  %v2992_v13 = vsel %vm589_vm1, 0.0, %v585_v1  ;;  %v558_v47 = vrot.slane %v538_v48, 7  ;;  %v1196_v1 = vrot.slane %v538_v48, 1 }
  0x5e   : > { %3475 = vst [vmem:[#allocation4_spill] sm:$0xff] %v2992_v13  ;;  %v2403_v17 = vpack.i.bf16 %v2988_v11, %v2992_v13 }
  0x5f   : > { %v3012_v50 = vsel %vm568_vm0, %v548_v42, %v558_v47  ;;  %v579_v23 = vsel %vm568_vm0, %v558_v47, %v548_v42  ;;  %v3018_v12 = vsel %vm1206_vm12, %v1186_v14, %v1196_v1  ;;  %v1217_v13 = vsel %vm1206_vm12, %v1196_v1, %v1186_v14 }
  0x60   : > { %2384 = vrot.lane.b32.xlu1 %v2383_v6, %s2511_s23  ;;  %v3034_v47 = vsel %vm1228_vm13, 0.0, %v1217_v13  ;;  %v3044_v42 = vsel %vm1206_vm12, %v1193_v29, %v1203_v32  ;;  %v3476_v13 = vrot.slane %v2854_v57, 7 }
  0x61   : > { %2379 = vrot.lane.b32.xlu0 %v2378_v7, %s2511_s23  ;;  %v3007_v7 = vsel %vm1206_vm12, %v1192_v10, %v1202_v34  ;;  %v3030_v10 = vsel %vm589_vm1, 0.0, %v579_v23  ;;  %v1224_v34 = vsel %vm1206_vm12, %v1203_v32, %v1193_v29  ;;  %v1194_v32 = vrot.slane %v2866_v18, 1 }
  0x62   : > { %v3048_v14 = vsel %vm1228_vm13, 0.0, %v1224_v34  ;;  %v1204_v23 = vrot.slane %v2868_v19, 1  ;;  %v1205_v34 = vrot.slane %v2875_v26, 1  ;;  %vm742_vm1 = vcmask 64512  }
  0x64   : > { %2394 = vrot.lane.b32.xlu1 %v2383_v6, %s2512_s8  ;;  %v3026_v6 = vsel %vm1228_vm13, 0.0, %v1223_v43  ;;  %v3477_v43 = vrot.slane %v2852_v56, 7  ;;  %v1215_v18 = vsel %vm1206_vm12, %v1194_v32, %v1204_v23 }
  0x65   : > { %2389 = vrot.lane.b32.xlu0 %v2790_v61, %s2512_s8  ;;  %v2413_v61 = vpack.i.bf16 %v3026_v6, %v3007_v7 }
  0x66   : > { %v3056_v1 = vsel %vm568_vm0, %v3477_v43, %v3476_v13  ;;  %v1195_v13 = vrot.slane %v2873_v24, 1  ;;  %v1225_v43 = vsel %vm1206_vm12, %v1204_v23, %v1194_v32  ;;  %v3478_v32 = vpack.i.bf16 %v2922_v9, %v2942_v31 }
  0x67   : > { %v2418_v29 = vpack.i.bf16 %v3056_v1, %v2902_v46  ;;  %v1246_v19 = vsel %vm1228_vm13, 0.0, %v1225_v43  ;;  %vm725_vm0 = vcmask 31744  }
  0x68   : > { %2404 = vrot.lane.b32.xlu1 %v2403_v17, %s2511_s23  ;;  %v2453_v24 = vpack.i.bf16 %v1246_v19, %v1215_v18  ;;  %v1216_v26 = vsel %vm1206_vm12, %v1195_v13, %v1205_v34 }
  0x69   : > { %2399 = vrot.lane.b32.xlu0 %v2403_v17, %s2512_s8  ;;  %v2423_v17 = vpack.i.bf16 %v3048_v14, %v3044_v42 }
  0x6c   : > { %2414 = vrot.lane.b32.xlu1 %v2413_v61, %s2511_s23 }
  0x6d   : > { %2409 = vrot.lane.b32.xlu0 %v2413_v61, %s2512_s8  ;;  %v1226_v61 = vsel %vm1206_vm12, %v1205_v34, %v1195_v13  ;;  %vm931_vm12 = vcmask 97280  }
  0x70   : > { %2424 = vrot.lane.b32.xlu1 %v2423_v17, %s2511_s23 }
  0x71   : > { %2419 = vrot.lane.b32.xlu0 %v2418_v29, %s2511_s23 }
  0x74   : > { %2434 = vrot.lane.b32.xlu1 %v2423_v17, %s2512_s8  ;;  %v1248_v17 = vsel %vm1228_vm13, 0.0, %v1226_v61  ;;  %vm1749_vm13 = vcmask 27648  }
  0x75   : > { %2429 = vrot.lane.b32.xlu0 %v2418_v29, %s2512_s8  ;;  %v2463_v29 = vpack.i.bf16 %v1248_v17, %v1216_v26 }
  0x78   : > { %2444 = vrot.lane.b32.xlu1 %v2918_v8, %s2511_s23 }
  0x79   : > { %2439 = vrot.lane.b32.xlu0 %v2918_v8, %s2512_s8 }
  0x7c   : > { %2454 = vrot.lane.b32.xlu1 %v2453_v24, %s2511_s23 }
  0x7d   : > { %2449 = vrot.lane.b32.xlu0 %v2453_v24, %s2512_s8 }
  0x80   : > { %2464 = vrot.lane.b32.xlu1 %v2463_v29, %s2511_s23 }
  0x81   : > { %2459 = vrot.lane.b32.xlu0 %v3478_v32, %s2511_s23 }
  0x96   : > { %v2240_v23 = vpop.permute.xlu1 %2239 }
  0x97   : > { %v2242_v8 = vunpack.i.h.bf16 %v2240_v23  ;;  %v2241_v43 = vunpack.i.l.bf16 %v2240_v23  ;;  %v2230_v2 = vpop.permute.xlu0 %2229 }
  0x98   : > { %v2232_v34 = vunpack.i.h.bf16 %v2230_v2  ;;  %v2231_v27 = vunpack.i.l.bf16 %v2230_v2 }
  0x9a   : > { %v2245_v13 = vpop.permute.xlu1 %2244  ;;  %v883_v18 = vsel %vm725_vm0, %v2994_v33, %v2231_v27  ;;  %v884_v19 = vsel %vm725_vm0, %v538_v48, %v2232_v34 }
  0x9b   : > { %v2247_v61 = vunpack.i.h.bf16 %v2245_v13  ;;  %v2246_v24 = vunpack.i.l.bf16 %v2245_v13  ;;  %v2235_v26 = vpop.permute.xlu0 %2234  ;;  %v899_v9 = vsel %vm742_vm1, %v883_v18, %v2241_v43  ;;  %v900_v31 = vsel %vm742_vm1, %v884_v19, %v2242_v8 }
  0x9c   : > { %v2237_v17 = vunpack.i.h.bf16 %v2235_v26  ;;  %v2236_v29 = vunpack.i.l.bf16 %v2235_v26  ;;  %v915_v32 = vpack.c.bf16 %v900_v31, %v899_v9 }
  0x9e   : > { %v886_v23 = vsel %vm725_vm0, %v2648_v39, %v2237_v17  ;;  %v885_v2 = vsel %vm725_vm0, %v2646_v38, %v2236_v29  ;;  %2096 = vmatprep.mubr.msk.bf16.mxu1 %vm931_vm12, %v915_v32  ;;  %v2250_v48 = vpop.permute.xlu1 %2249 }
  0x9f   : > { %v2255_v33 = vpop.permute.xlu0 %2254  ;;  %v901_v34 = vsel %vm742_vm1, %v885_v2, %v2246_v24  ;;  %v902_v27 = vsel %vm742_vm1, %v886_v23, %v2247_v61 }
  0xa0   : > { %v916_v43 = vpack.c.bf16 %v902_v27, %v901_v34  ;;  %v2257_v13 = vunpack.i.h.bf16 %v2255_v33  ;;  %v2256_v18 = vunpack.i.l.bf16 %v2255_v33 }
  0xa2   : > { %2097 = vmatmul.mubr.msk.bf16.vlgmr.msra.gmra.mrb[0].mxu1 %vm931_vm12, %v916_v43  ;;  %v2260_v8 = vpop.permute.xlu1 %2259  ;;  %v726_v23 = vsel %vm725_vm0, %v3030_v10, %v2256_v18  ;;  %v727_v2 = vsel %vm725_vm0, %v3012_v50, %v2257_v13  ;;  %v2252_v10 = vunpack.i.h.bf16 %v2250_v48  ;;  %v2251_v18 = vunpack.i.l.bf16 %v2250_v48 }
  0xa3   : > { %v2262_v19 = vunpack.i.h.bf16 %v2260_v8  ;;  %v2261_v26 = vunpack.i.l.bf16 %v2260_v8  ;;  %v2270_v39 = vpop.permute.xlu0 %2269  ;;  %2149 = vmatpush3.bf16.msra.mxu1 %v2965_v60 }
  0xa4   : > { %v2272_v38 = vunpack.i.h.bf16 %v2270_v39  ;;  %v2271_v9 = vunpack.i.l.bf16 %v2270_v39 }
  0xa5   : > { %v728_v31 = vsel %vm725_vm0, %v2675_v54, %v2261_v26  ;;  %v729_v24 = vsel %vm725_vm0, %v2669_v52, %v2262_v19 }
  0xa6   : > { %v2265_v61 = vpop.permute.xlu1 %2264  ;;  %v745_v60 = vsel %vm742_vm1, %v728_v31, %v2271_v9  ;;  %v746_v33 = vsel %vm742_vm1, %v729_v24, %v2272_v38 }
  0xa7   : > { %v2267_v17 = vunpack.i.h.bf16 %v2265_v61  ;;  %v2266_v29 = vunpack.i.l.bf16 %v2265_v61  ;;  %v2275_v32 = vpop.permute.xlu0 %2274  ;;  %v760_v19 = vpack.c.bf16 %v746_v33, %v745_v60 }
  0xa8   : > { %v2277_v34 = vunpack.i.h.bf16 %v2275_v32  ;;  %v2276_v27 = vunpack.i.l.bf16 %v2275_v32 }
  0xa9   : > { %v743_v54 = vsel %vm742_vm1, %v726_v23, %v2266_v29  ;;  %v744_v52 = vsel %vm742_vm1, %v727_v2, %v2267_v17 }
  0xaa   : > { %v2290_v43 = vpop.permute.xlu1 %2289  ;;  %v759_v8 = vpack.c.bf16 %v744_v52, %v743_v54  ;;  %v731_v50 = vsel %vm725_vm0, %v2684_v58, %v2277_v34  ;;  %v730_v13 = vsel %vm725_vm0, %v2691_v62, %v2276_v27  ;;  %v888_v58 = vsel %vm725_vm0, %v2642_v36, %v2252_v10 }
  0xab   : > { %v2292_v26 = vunpack.i.h.bf16 %v2290_v43  ;;  %v2291_v39 = vunpack.i.l.bf16 %v2290_v43  ;;  %v2280_v61 = vpop.permute.xlu0 %2279  ;;  %v887_v62 = vsel %vm725_vm0, %v2640_v35, %v2251_v18 }
  0xac   : > { %2114 = vmatprep.mubr.msk.bf16.mxu0 %vm931_vm12, %v759_v8  ;;  %v2282_v2 = vunpack.i.h.bf16 %v2280_v61  ;;  %v2281_v60 = vunpack.i.l.bf16 %v2280_v61 }
  0xad   : > { %v747_v38 = vsel %vm742_vm1, %v730_v13, %v2291_v39  ;;  %v748_v9 = vsel %vm742_vm1, %v731_v50, %v2292_v26  ;;  %2115 = vmatmul.mubr.msk.bf16.vlgmr.msra.gmra.mrb[0].mxu0 %vm931_vm12, %v760_v19 }
  0xae   : > { %v761_v31 = vpack.c.bf16 %v748_v9, %v747_v38  ;;  %v2295_v24 = vpop.permute.xlu1 %2294  ;;  %2131 = vmatpush3.bf16.msra.mxu0 %v2968_v40  ;;  %v733_v26 = vsel %vm725_vm0, %v2695_v63, %v2282_v2  ;;  %v732_v39 = vsel %vm725_vm0, %v2701_v3, %v2281_v60 }
  0xaf   : > { %v2297_v17 = vunpack.i.h.bf16 %v2295_v24  ;;  %v2296_v48 = vunpack.i.l.bf16 %v2295_v24  ;;  %v2285_v29 = vpop.permute.xlu0 %2284 }
  0xb0   : > { %v2287_v32 = vunpack.i.h.bf16 %v2285_v29  ;;  %v2286_v23 = vunpack.i.l.bf16 %v2285_v29  ;;  %2118 = vmatprep.mubr.msk.bf16.mxu0 %vm931_vm12, %v761_v31 }
  0xb1   : > { %v904_v33 = vsel %vm742_vm1, %v888_v58, %v2297_v17  ;;  %v903_v34 = vsel %vm742_vm1, %v887_v62, %v2296_v48 }
  0xb2   : > { %v917_v40 = vpack.c.bf16 %v904_v33, %v903_v34  ;;  %v2305_v27 = vpop.permute.xlu1 %2304  ;;  %v890_v36 = vsel %vm725_vm0, %v2662_v49, %v2287_v32  ;;  %v889_v35 = vsel %vm725_vm0, %v2655_v45, %v2286_v23 }
  0xb3   : > { %v2307_v54 = vunpack.i.h.bf16 %v2305_v27  ;;  %v2306_v52 = vunpack.i.l.bf16 %v2305_v27  ;;  %v2300_v43 = vpop.permute.xlu0 %2299 }
  0xb4   : > { %v2302_v8 = vunpack.i.h.bf16 %v2300_v43  ;;  %v2301_v19 = vunpack.i.l.bf16 %v2300_v43  ;;  %2100 = vmatprep.mubr.msk.bf16.mxu1 %vm931_vm12, %v917_v40 }
  0xb5   : > { %v905_v61 = vsel %vm742_vm1, %v889_v35, %v2306_v52  ;;  %v906_v10 = vsel %vm742_vm1, %v890_v36, %v2307_v54 }
  0xb6   : > { %v918_v18 = vpack.c.bf16 %v906_v10, %v905_v61  ;;  %v749_v49 = vsel %vm742_vm1, %v732_v39, %v2301_v19  ;;  %v750_v50 = vsel %vm742_vm1, %v733_v26, %v2302_v8  ;;  %v2315_v45 = vpop.permute.xlu1 %2314 }
  0xb7   : > { %v762_v13 = vpack.c.bf16 %v750_v50, %v749_v49  ;;  %v2310_v38 = vpop.permute.xlu0 %2309  ;;  %v2317_v48 = vunpack.i.h.bf16 %v2315_v45  ;;  %v2316_v29 = vunpack.i.l.bf16 %v2315_v45 }
  0xb8   : > { %v2312_v9 = vunpack.i.h.bf16 %v2310_v38  ;;  %v2311_v31 = vunpack.i.l.bf16 %v2310_v38  ;;  %2101 = vmatmul.mubr.msk.bf16.gmra.mrb[4].mxu1 %vm931_vm12, %v918_v18 }
  0xb9   : > { %2119 = vmatmul.mubr.msk.bf16.gmra.mrb[4].mxu0 %vm931_vm12, %v762_v13  ;;  %v1364_v27 = vsel %vm725_vm0, %v3034_v47, %v2317_v48  ;;  %v1363_v54 = vsel %vm725_vm0, %v3018_v12, %v2316_v29 }
  0xba   : > { %v2325_v63 = vpop.permute.xlu1 %2324  ;;  %v892_v58 = vsel %vm725_vm0, %v2706_v5, %v2312_v9  ;;  %v891_v62 = vsel %vm725_vm0, %v2704_v4, %v2311_v31 }
  0xbb   : > { %v2327_v3 = vunpack.i.h.bf16 %v2325_v63  ;;  %v2326_v24 = vunpack.i.l.bf16 %v2325_v63  ;;  %v2320_v17 = vpop.permute.xlu0 %2319 }
  0xbc   : > { %v2322_v4 = vunpack.i.h.bf16 %v2320_v17  ;;  %v2321_v43 = vunpack.i.l.bf16 %v2320_v17 }
  0xbd   : > { %v907_v32 = vsel %vm742_vm1, %v891_v62, %v2326_v24  ;;  %v908_v23 = vsel %vm742_vm1, %v892_v58, %v2327_v3 }
  0xbe   : > { %v919_v2 = vpack.c.bf16 %v908_v23, %v907_v32  ;;  %v2335_v60 = vpop.permute.xlu1 %2334  ;;  %v894_v49 = vsel %vm725_vm0, %v2743_v30, %v2322_v4  ;;  %v893_v50 = vsel %vm725_vm0, %v2733_v25, %v2321_v43 }
  0xbf   : > { %v2337_v33 = vunpack.i.h.bf16 %v2335_v60  ;;  %v2336_v34 = vunpack.i.l.bf16 %v2335_v60  ;;  %v2330_v40 = vpop.permute.xlu0 %2329 }
  0xc0   : > { %v2332_v52 = vunpack.i.h.bf16 %v2330_v40  ;;  %v2331_v5 = vunpack.i.l.bf16 %v2330_v40  ;;  %2104 = vmatprep.mubr.msk.bf16.mxu1 %vm931_vm12, %v919_v2 }
  0xc1   : > { %v1379_v36 = vsel %vm742_vm1, %v1363_v54, %v2336_v34  ;;  %v1380_v35 = vsel %vm742_vm1, %v1364_v27, %v2337_v33 }
  0xc2   : > { %v1395_v8 = vpack.c.bf16 %v1380_v35, %v1379_v36  ;;  %v2345_v19 = vpop.permute.xlu1 %2344  ;;  %v1366_v47 = vsel %vm725_vm0, %v2779_v53, %v2332_v52  ;;  %v1365_v12 = vsel %vm725_vm0, %v2775_v51, %v2331_v5 }
  0xc3   : > { %v2347_v26 = vunpack.i.h.bf16 %v2345_v19  ;;  %v2346_v39 = vunpack.i.l.bf16 %v2345_v19  ;;  %v2340_v61 = vpop.permute.xlu0 %2339 }
  0xc4   : > { %v2342_v10 = vunpack.i.h.bf16 %v2340_v61  ;;  %v2341_v18 = vunpack.i.l.bf16 %v2340_v61  ;;  %2132 = vmatprep.mubr.msk.bf16.mxu0 %vm931_vm12, %v1395_v8 }
  0xc5   : > { %v1381_v45 = vsel %vm742_vm1, %v1365_v12, %v2346_v39  ;;  %v1382_v13 = vsel %vm742_vm1, %v1366_v47, %v2347_v26 }
  0xc6   : > { %v1396_v38 = vpack.c.bf16 %v1382_v13, %v1381_v45  ;;  %v909_v53 = vsel %vm742_vm1, %v893_v50, %v2341_v18  ;;  %v910_v9 = vsel %vm742_vm1, %v894_v49, %v2342_v10  ;;  %v2355_v51 = vpop.permute.xlu1 %2354 }
  0xc7   : > { %v920_v31 = vpack.c.bf16 %v910_v9, %v909_v53  ;;  %v2350_v63 = vpop.permute.xlu0 %2349  ;;  %v2357_v29 = vunpack.i.h.bf16 %v2355_v51  ;;  %v2356_v58 = vunpack.i.l.bf16 %v2355_v51 }
  0xc8   : > { %v2352_v3 = vunpack.i.h.bf16 %v2350_v63  ;;  %v2351_v24 = vunpack.i.l.bf16 %v2350_v63  ;;  %2133 = vmatmul.mubr.msk.bf16.vlgmr.msra.gmra.mrb[0].mxu0 %vm931_vm12, %v1396_v38 }
  0xc9   : > { %2105 = vmatmul.mubr.msk.bf16.gmra.mrb[8].mxu1 %vm931_vm12, %v920_v31  ;;  %v1368_v54 = vsel %vm725_vm0, %v2827_v28, %v2357_v29  ;;  %v1367_v52 = vsel %vm725_vm0, %v2818_v20, %v2356_v58 }
  0xca   : > { %v2365_v30 = vpop.permute.xlu1 %2364  ;;  %v896_v62 = vsel %vm725_vm0, %v2810_v16, %v2352_v3  ;;  %v895_v32 = vsel %vm725_vm0, %v2808_v15, %v2351_v24 }
  0xcb   : > { %v2367_v25 = vunpack.i.h.bf16 %v2365_v30  ;;  %v2366_v17 = vunpack.i.l.bf16 %v2365_v30  ;;  %v2360_v48 = vpop.permute.xlu0 %2359 }
  0xcc   : > { %v2362_v15 = vunpack.i.h.bf16 %v2360_v48  ;;  %v2361_v4 = vunpack.i.l.bf16 %v2360_v48 }
  0xcd   : > { %v911_v23 = vsel %vm742_vm1, %v895_v32, %v2366_v17  ;;  %v912_v2 = vsel %vm742_vm1, %v896_v62, %v2367_v25 }
  0xce   : > { %v921_v60 = vpack.c.bf16 %v912_v2, %v911_v23  ;;  %v2375_v33 = vpop.permute.xlu1 %2374  ;;  %v898_v12 = vsel %vm725_vm0, %v2854_v57, %v2362_v15  ;;  %v897_v10 = vsel %vm725_vm0, %v2852_v56, %v2361_v4 }
  0xcf   : > { %v2377_v34 = vunpack.i.h.bf16 %v2375_v33  ;;  %v2376_v40 = vunpack.i.l.bf16 %v2375_v33  ;;  %v2370_v27 = vpop.permute.xlu0 %2369 }
  0xd0   : > { %v2372_v5 = vunpack.i.h.bf16 %v2370_v27  ;;  %v2371_v16 = vunpack.i.l.bf16 %v2370_v27  ;;  %2108 = vmatprep.mubr.msk.bf16.mxu1 %vm931_vm12, %v921_v60 }
  0xd1   : > { %v1383_v43 = vsel %vm742_vm1, %v1367_v52, %v2376_v40  ;;  %v1384_v36 = vsel %vm742_vm1, %v1368_v54, %v2377_v34 }
  0xd2   : > { %v1397_v35 = vpack.c.bf16 %v1384_v36, %v1383_v43  ;;  %v2385_v8 = vpop.permute.xlu1 %2384  ;;  %v1370_v28 = vsel %vm725_vm0, %v2850_v55, %v2372_v5  ;;  %v1369_v20 = vsel %vm725_vm0, %v2838_v41, %v2371_v16  ;;  %v3479_v43 = vld [vmem:[#allocation2_spill] sm:$0xff] }
  0xd3   : > { %v2387_v19 = vunpack.i.h.bf16 %v2385_v8  ;;  %v2386_v26 = vunpack.i.l.bf16 %v2385_v8  ;;  %v2380_v39 = vpop.permute.xlu0 %2379 }
  0xd4   : > { %v2382_v61 = vunpack.i.h.bf16 %v2380_v39  ;;  %v2381_v47 = vunpack.i.l.bf16 %v2380_v39  ;;  %2136 = vmatprep.mubr.msk.bf16.mxu0 %vm931_vm12, %v1397_v35  ;;  %v3480_v35 = vld [vmem:[#allocation3_spill] sm:$0xff] }
  0xd5   : > { %v1385_v18 = vsel %vm742_vm1, %v1369_v20, %v2386_v26  ;;  %v1386_v49 = vsel %vm742_vm1, %v1370_v28, %v2387_v19 }
  0xd6   : > { %v1398_v50 = vpack.c.bf16 %v1386_v49, %v1385_v18  ;;  %v913_v55 = vsel %vm742_vm1, %v897_v10, %v2381_v47  ;;  %v914_v45 = vsel %vm742_vm1, %v898_v12, %v2382_v61  ;;  %v2395_v41 = vpop.permute.xlu1 %2394 }
  0xd7   : > { %v922_v13 = vpack.c.bf16 %v914_v45, %v913_v55  ;;  %v2390_v38 = vpop.permute.xlu0 %2389  ;;  %v2397_v63 = vunpack.i.h.bf16 %v2395_v41  ;;  %v2396_v3 = vunpack.i.l.bf16 %v2395_v41 }
  0xd8   : > { %v2392_v53 = vunpack.i.h.bf16 %v2390_v38  ;;  %v2391_v9 = vunpack.i.l.bf16 %v2390_v38  ;;  %2137 = vmatmul.mubr.msk.bf16.gmra.mrb[4].mxu0 %vm931_vm12, %v1398_v50 }
  0xd9   : > { %2109 = vmatmul.mubr.msk.bf16.gmra.mrb[12].mxu1 %vm931_vm12, %v922_v13  ;;  %v1372_v23 = vsel %vm725_vm0, %v2898_v44, %v2397_v63  ;;  %v1371_v2 = vsel %vm725_vm0, %v2885_v37, %v2396_v3  ;;  %v3481_v13 = vld [vmem:[#allocation4_spill] sm:$0xff] }
  0xda   : > { %v2405_v57 = vpop.permute.xlu1 %2404  ;;  %v735_v24 = vsel %vm725_vm0, %v2727_v21, %v2392_v53  ;;  %v734_v30 = vsel %vm725_vm0, %v2731_v22, %v2391_v9 }
  0xdb   : > { %v2407_v56 = vunpack.i.h.bf16 %v2405_v57  ;;  %v2406_v51 = vunpack.i.l.bf16 %v2405_v57  ;;  %v2400_v31 = vpop.permute.xlu0 %2399 }
  0xdc   : > { %v2402_v22 = vunpack.i.h.bf16 %v2400_v31  ;;  %v2401_v33 = vunpack.i.l.bf16 %v2400_v31 }
  0xdd   : > { %v751_v25 = vsel %vm742_vm1, %v734_v30, %v2406_v51  ;;  %v752_v17 = vsel %vm742_vm1, %v735_v24, %v2407_v56 }
  0xde   : > { %v763_v48 = vpack.c.bf16 %v752_v17, %v751_v25  ;;  %v2415_v29 = vpop.permute.xlu1 %2414  ;;  %v737_v36 = vsel %vm725_vm0, %v3479_v43, %v2402_v22  ;;  %v736_v8 = vsel %vm725_vm0, %v3480_v35, %v2401_v33  ;;  %v3267_v43 = vld [vmem:[%s3465_s5] ss:$0 sm:$0xff] }
  0xdf   : > { %v2417_v58 = vunpack.i.h.bf16 %v2415_v29  ;;  %v2416_v62 = vunpack.i.l.bf16 %v2415_v29  ;;  %v2410_v32 = vpop.permute.xlu0 %2409 }
  0xe0   : > { %v2412_v60 = vunpack.i.h.bf16 %v2410_v32  ;;  %v2411_v21 = vunpack.i.l.bf16 %v2410_v32  ;;  %2122 = vmatprep.mubr.msk.bf16.mxu1 %vm931_vm12, %v763_v48 }
  0xe1   : > { %v1387_v34 = vsel %vm742_vm1, %v1371_v2, %v2416_v62  ;;  %v1388_v40 = vsel %vm742_vm1, %v1372_v23, %v2417_v58 }
  0xe2   : > { %v1399_v27 = vpack.c.bf16 %v1388_v40, %v1387_v34  ;;  %v2425_v54 = vpop.permute.xlu1 %2424  ;;  %v1374_v44 = vsel %vm725_vm0, %v2957_v0, %v2412_v60  ;;  %v1373_v37 = vsel %vm725_vm0, %v2953_v59, %v2411_v21 }
  0xe3   : > { %v2427_v52 = vunpack.i.h.bf16 %v2425_v54  ;;  %v2426_v5 = vunpack.i.l.bf16 %v2425_v54  ;;  %v2420_v16 = vpop.permute.xlu0 %2419 }
  0xe4   : > { %v2422_v15 = vunpack.i.h.bf16 %v2420_v16  ;;  %v2421_v4 = vunpack.i.l.bf16 %v2420_v16  ;;  %2140 = vmatprep.mubr.msk.bf16.mxu0 %vm931_vm12, %v1399_v27 }
  0xe5   : > { %v1389_v19 = vsel %vm742_vm1, %v1373_v37, %v2426_v5  ;;  %v1390_v26 = vsel %vm742_vm1, %v1374_v44, %v2427_v52 }
  0xe6   : > { %v1400_v39 = vpack.c.bf16 %v1390_v26, %v1389_v19  ;;  %v753_v0 = vsel %vm742_vm1, %v736_v8, %v2421_v4  ;;  %v754_v28 = vsel %vm742_vm1, %v737_v36, %v2422_v15  ;;  %v2435_v59 = vpop.permute.xlu1 %2434 }
  0xe7   : > { %v764_v20 = vpack.c.bf16 %v754_v28, %v753_v0  ;;  %v2430_v61 = vpop.permute.xlu0 %2429  ;;  %v2437_v55 = vunpack.i.h.bf16 %v2435_v59  ;;  %v2436_v45 = vunpack.i.l.bf16 %v2435_v59 }
  0xe8   : > { %v2432_v47 = vunpack.i.h.bf16 %v2430_v61  ;;  %v2431_v12 = vunpack.i.l.bf16 %v2430_v61  ;;  %2141 = vmatmul.mubr.msk.bf16.gmra.mrb[8].mxu0 %vm931_vm12, %v1400_v39 }
  0xe9   : > { %2123 = vmatmul.mubr.msk.bf16.vlgmr.msra.gmra.mrb[8].mxu1 %vm931_vm12, %v764_v20  ;;  %v1376_v3 = vsel %vm725_vm0, %v3026_v6, %v2437_v55  ;;  %v1375_v24 = vsel %vm725_vm0, %v3007_v7, %v2436_v45 }
  0xea   : > { %v2445_v10 = vpop.permute.xlu1 %2444  ;;  %v739_v41 = vsel %vm725_vm0, %v2988_v11, %v2432_v47  ;;  %v738_v38 = vsel %vm725_vm0, %v3481_v13, %v2431_v12 }
  0xeb   : > { %v2447_v18 = vunpack.i.h.bf16 %v2445_v10  ;;  %v2446_v49 = vunpack.i.l.bf16 %v2445_v10  ;;  %v2440_v50 = vpop.permute.xlu0 %2439 }
  0xec   : > { %v2442_v25 = vunpack.i.h.bf16 %v2440_v50  ;;  %v2441_v17 = vunpack.i.l.bf16 %v2440_v50 }
  0xed   : > { %v755_v53 = vsel %vm742_vm1, %v738_v38, %v2446_v49  ;;  %v756_v9 = vsel %vm742_vm1, %v739_v41, %v2447_v18 }
  0xee   : > { %v765_v57 = vpack.c.bf16 %v756_v9, %v755_v53  ;;  %v2455_v56 = vpop.permute.xlu1 %2454  ;;  %v741_v22 = vsel %vm725_vm0, %v3056_v1, %v2442_v25  ;;  %v740_v33 = vsel %vm725_vm0, %v2902_v46, %v2441_v17 }
  0xef   : > { %v2457_v51 = vunpack.i.h.bf16 %v2455_v56  ;;  %v2456_v31 = vunpack.i.l.bf16 %v2455_v56  ;;  %v2450_v63 = vpop.permute.xlu0 %2449 }
  0xf0   : > { %v2452_v30 = vunpack.i.h.bf16 %v2450_v63  ;;  %v2451_v11 = vunpack.i.l.bf16 %v2450_v63  ;;  %2126 = vmatprep.mubr.msk.bf16.mxu1 %vm931_vm12, %v765_v57 }
  0xf1   : > { %v1391_v48 = vsel %vm742_vm1, %v1375_v24, %v2456_v31  ;;  %v1392_v29 = vsel %vm742_vm1, %v1376_v3, %v2457_v51 }
  0xf2   : > { %v1401_v58 = vpack.c.bf16 %v1392_v29, %v1391_v48  ;;  %v2465_v62 = vpop.permute.xlu1 %2464  ;;  %v1378_v6 = vsel %vm725_vm0, %v3048_v14, %v2452_v30  ;;  %v1377_v7 = vsel %vm725_vm0, %v3044_v42, %v2451_v11 }
  0xf3   : > { %v2467_v32 = vunpack.i.h.bf16 %v2465_v62  ;;  %v2466_v23 = vunpack.i.l.bf16 %v2465_v62  ;;  %v2460_v2 = vpop.permute.xlu0 %2459 }
  0xf4   : > { %v2462_v60 = vunpack.i.h.bf16 %v2460_v2  ;;  %v2461_v21 = vunpack.i.l.bf16 %v2460_v2  ;;  %2144 = vmatprep.mubr.msk.bf16.mxu0 %vm931_vm12, %v1401_v58 }
  0xf5   : > { %v1393_v34 = vsel %vm742_vm1, %v1377_v7, %v2466_v23  ;;  %v1394_v40 = vsel %vm742_vm1, %v1378_v6, %v2467_v32 }
  0xf6   : > { %v1402_v27 = vpack.c.bf16 %v1394_v40, %v1393_v34  ;;  %v757_v14 = vsel %vm742_vm1, %v740_v33, %v2461_v21  ;;  %v758_v54 = vsel %vm742_vm1, %v741_v22, %v2462_v60 }
  0xf7   : > { %v766_v42 = vpack.c.bf16 %v758_v54, %v757_v14 }
  0xf8   : > { %2145 = vmatmul.mubr.msk.bf16.gmra.mrb[12].mxu0 %vm931_vm12, %v1402_v27 }
  0xf9   : > { %2127 = vmatmul.mubr.msk.bf16.gmra.mrb[12].mxu1 %vm931_vm12, %v766_v42 }
 0x175   : > { %v2098_v52 = vpop.f32.mrb[0].mxu1 }
 0x176   : > { %v994_v5 = vpop.f32.mrb[1].mxu1 }
 0x177   : > { %v2099_v1 = vpop.f32.mrb[2].mxu1 }
 0x178   : > { %v997_v16 = vpop.f32.mrb[3].mxu1 }
 0x18b   : > { %v2102_v46 = vpop.f32.mrb[4].mxu1 }
 0x18c   : > { %v1010_v44 = vpop.f32.mrb[5].mxu1 }
 0x18d   : > { %v2103_v37 = vpop.f32.mrb[6].mxu1 }
 0x18e   : > { %v1013_v15 = vpop.f32.mrb[7].mxu1 }
 0x19b   : > { %v2134_v4 = vpop.f32.mrb[0].mxu0 }
 0x19c   : > { %v2150_v36 = vadd.f32 %v2134_v4, %v2098_v52  ;;  %v1472_v35 = vpop.f32.mrb[1].mxu0 }
 0x19d   : > { %v2151_v8 = vadd.f32 %v1472_v35, %v994_v5  ;;  %v2135_v19 = vpop.f32.mrb[2].mxu0 }
 0x19e   : > { %v3270_v26 = vadd.f32 %v2150_v36, %v3267_v43  ;;  %v2152_v39 = vadd.f32 %v2135_v19, %v2099_v1  ;;  %v1475_v0 = vpop.f32.mrb[3].mxu0 }
 0x19f   : > { %v3280_v28 = vadd.f32 %v2151_v8, %v3267_v43  ;;  %v2153_v59 = vadd.f32 %v1475_v0, %v997_v16 }
 0x1a0   : > { %v2005_v20 = vpack.c.bf16 %v3270_v26, %v3270_v26  ;;  %v3285_v61 = vadd.f32 %v2152_v39, %v3267_v43  ;;  %v1577_v45 = vsel %vm725_vm0, %v3270_v26, 0.0 }
 0x1a1   : > { %v2003_v47 = vpack.c.bf16 %v3280_v28, %v3280_v28  ;;  %v3290_v12 = vadd.f32 %v2153_v59, %v3267_v43  ;;  %v1574_v50 = vsel %vm725_vm0, %v3280_v28, 0.0 }
 0x1a2   : > { %1752 = vst.msk [vmem:[%s3277_s14 + $0x8] sm:$0xf] %vm1749_vm13, %v2005_v20  ;;  %v2006_v10 = vpack.c.bf16 %v3285_v61, %v3285_v61  ;;  %v1579_v63 = vsel %vm725_vm0, %v3285_v61, 0.0 }
 0x1a3   : > { %1750 = vst.msk [vmem:[%s3277_s14] sm:$0xf] %vm1749_vm13, %v2003_v47  ;;  %v2004_v18 = vpack.c.bf16 %v3290_v12, %v3290_v12  ;;  %v1575_v49 = vsel %vm725_vm0, %v3290_v12, 0.0 }
 0x1a4   : > { %1753 = vst.msk [vmem:[%s3277_s14 + $0xc] sm:$0xf] %vm1749_vm13, %v2006_v10  ;;  %v1576_v55 = vadd.f32 %v1575_v49, %v1574_v50 }
 0x1a5   : > { %1751 = vst.msk [vmem:[%s3277_s14 + $0x4] sm:$0xf] %vm1749_vm13, %v2004_v18 }
 0x1a6   : > { %v1578_v13 = vadd.f32 %v1577_v45, %v1576_v55 }
 0x1a8   : > { %v1580_v11 = vadd.f32 %v1579_v63, %v1578_v13 }
 0x1ab   : > { %v2138_v41 = vpop.f32.mrb[4].mxu0 }
 0x1ac   : > { %v2154_v38 = vadd.f32 %v2138_v41, %v2102_v46  ;;  %v1488_v53 = vpop.f32.mrb[5].mxu0 }
 0x1ad   : > { %v2155_v9 = vadd.f32 %v1488_v53, %v1010_v44  ;;  %v2139_v57 = vpop.f32.mrb[6].mxu0 }
 0x1ae   : > { %v3311_v56 = vadd.f32 %v2154_v38, %v3267_v43  ;;  %v2156_v51 = vadd.f32 %v2139_v57, %v2103_v37  ;;  %v1491_v31 = vpop.f32.mrb[7].mxu0 }
 0x1af   : > { %v3316_v3 = vadd.f32 %v2155_v9, %v3267_v43  ;;  %v2157_v24 = vadd.f32 %v1491_v31, %v1013_v15 }
 0x1b0   : > { %v2009_v30 = vpack.c.bf16 %v3311_v56, %v3311_v56  ;;  %v3321_v25 = vadd.f32 %v2156_v51, %v3267_v43  ;;  %v1585_v6 = vsel %vm725_vm0, %v3311_v56, 0.0 }
 0x1b1   : > { %v1581_v17 = vsel %vm725_vm0, %v3316_v3, 0.0  ;;  %v2007_v48 = vpack.c.bf16 %v3316_v3, %v3316_v3  ;;  %v3328_v29 = vadd.f32 %v2157_v24, %v3267_v43 }
 0x1b2   : > { %1756 = vst.msk [vmem:[%s3277_s14 + $0x18] sm:$0xf] %vm1749_vm13, %v2009_v30  ;;  %v1582_v58 = vadd.f32 %v1581_v17, %v1580_v11  ;;  %v2010_v62 = vpack.c.bf16 %v3321_v25, %v3321_v25  ;;  %v1587_v60 = vsel %vm725_vm0, %v3321_v25, 0.0 }
 0x1b3   : > { %1754 = vst.msk [vmem:[%s3277_s14 + $0x10] sm:$0xf] %vm1749_vm13, %v2007_v48  ;;  %v1583_v32 = vsel %vm725_vm0, %v3328_v29, 0.0  ;;  %v2008_v23 = vpack.c.bf16 %v3328_v29, %v3328_v29 }
 0x1b4   : > { %1757 = vst.msk [vmem:[%s3277_s14 + $0x1c] sm:$0xf] %vm1749_vm13, %v2010_v62  ;;  %v1584_v2 = vadd.f32 %v1583_v32, %v1582_v58 }
 0x1b5   : > { %1755 = vst.msk [vmem:[%s3277_s14 + $0x14] sm:$0xf] %vm1749_vm13, %v2008_v23 }
 0x1b6   : > { %v1586_v7 = vadd.f32 %v1585_v6, %v1584_v2 }
 0x1b8   : > { %v1588_v21 = vadd.f32 %v1587_v60, %v1586_v7 }
 0x1bb   : > { %v2142_v22 = vpop.f32.mrb[8].mxu0 }
 0x1bc   : > { %v2124_v33 = vpop.f32.mrb[8].mxu1  ;;  %v1504_v34 = vpop.f32.mrb[9].mxu0 }
 0x1bd   : > { %v2158_v40 = vadd.f32 %v2142_v22, %v2124_v33  ;;  %v1155_v27 = vpop.f32.mrb[9].mxu1  ;;  %v2143_v14 = vpop.f32.mrb[10].mxu0 }
 0x1be   : > { %v2159_v54 = vadd.f32 %v1504_v34, %v1155_v27  ;;  %v2125_v42 = vpop.f32.mrb[10].mxu1  ;;  %v1507_v52 = vpop.f32.mrb[11].mxu0 }
 0x1bf   : > { %v3349_v5 = vadd.f32 %v2158_v40, %v3267_v43  ;;  %v2160_v1 = vadd.f32 %v2143_v14, %v2125_v42  ;;  %v1158_v16 = vpop.f32.mrb[11].mxu1 }
 0x1c0   : > { %v3352_v46 = vadd.f32 %v2159_v54, %v3267_v43  ;;  %v2161_v44 = vadd.f32 %v1507_v52, %v1158_v16 }
 0x1c1   : > { %v2013_v37 = vpack.c.bf16 %v3349_v5, %v3349_v5  ;;  %v3357_v15 = vadd.f32 %v2160_v1, %v3267_v43  ;;  %v1593_v20 = vsel %vm725_vm0, %v3349_v5, 0.0 }
 0x1c2   : > { %v1589_v4 = vsel %vm725_vm0, %v3352_v46, 0.0  ;;  %v2011_v36 = vpack.c.bf16 %v3352_v46, %v3352_v46  ;;  %v1567_v35 = vadd.f32 %v2161_v44, %v3267_v43 }
 0x1c3   : > { %1760 = vst.msk [vmem:[%s3277_s14 + $0x28] sm:$0xf] %vm1749_vm13, %v2013_v37  ;;  %v1590_v8 = vadd.f32 %v1589_v4, %v1588_v21  ;;  %v2014_v19 = vpack.c.bf16 %v3357_v15, %v3357_v15  ;;  %v1595_v10 = vsel %vm725_vm0, %v3357_v15, 0.0 }
 0x1c4   : > { %1758 = vst.msk [vmem:[%s3277_s14 + $0x20] sm:$0xf] %vm1749_vm13, %v2011_v36  ;;  %v1591_v39 = vsel %vm725_vm0, %v1567_v35, 0.0  ;;  %v2012_v0 = vpack.c.bf16 %v1567_v35, %v1567_v35 }
 0x1c5   : > { %1761 = vst.msk [vmem:[%s3277_s14 + $0x2c] sm:$0xf] %vm1749_vm13, %v2014_v19  ;;  %v1592_v59 = vadd.f32 %v1591_v39, %v1590_v8 }
 0x1c6   : > { %1759 = vst.msk [vmem:[%s3277_s14 + $0x24] sm:$0xf] %vm1749_vm13, %v2012_v0 }
 0x1c7   : > { %v1594_v47 = vadd.f32 %v1593_v20, %v1592_v59 }
 0x1c9   : > { %v1596_v18 = vadd.f32 %v1595_v10, %v1594_v47 }
 0x1cb   : > { %v2146_v49 = vpop.f32.mrb[12].mxu0 }
 0x1cc   : > { %v2128_v50 = vpop.f32.mrb[12].mxu1  ;;  %v1520_v55 = vpop.f32.mrb[13].mxu0 }
 0x1cd   : > { %v2162_v45 = vadd.f32 %v2146_v49, %v2128_v50  ;;  %v1171_v41 = vpop.f32.mrb[13].mxu1  ;;  %v2147_v13 = vpop.f32.mrb[14].mxu0 }
 0x1ce   : > { %v2163_v38 = vadd.f32 %v1520_v55, %v1171_v41  ;;  %v2129_v53 = vpop.f32.mrb[14].mxu1  ;;  %v1523_v9 = vpop.f32.mrb[15].mxu0 }
 0x1cf   : > { %v1572_v57 = vadd.f32 %v2162_v45, %v3267_v43  ;;  %v2164_v51 = vadd.f32 %v2147_v13, %v2129_v53  ;;  %v1174_v31 = vpop.f32.mrb[15].mxu1 }
 0x1d0   : > { %v1570_v63 = vadd.f32 %v2163_v38, %v3267_v43  ;;  %v2165_v24 = vadd.f32 %v1523_v9, %v1174_v31 }
 0x1d1   : > { %v2017_v30 = vpack.c.bf16 %v1572_v57, %v1572_v57  ;;  %v1573_v11 = vadd.f32 %v2164_v51, %v3267_v43  ;;  %v1601_v7 = vsel %vm725_vm0, %v1572_v57, 0.0 }
 0x1d2   : > { %v1597_v17 = vsel %vm725_vm0, %v1570_v63, 0.0  ;;  %v2015_v48 = vpack.c.bf16 %v1570_v63, %v1570_v63  ;;  %v1571_v58 = vadd.f32 %v2165_v24, %v3267_v43 }
 0x1d3   : > { %1764 = vst.msk [vmem:[%s3277_s14 + $0x38] sm:$0xf] %vm1749_vm13, %v2017_v30  ;;  %v1598_v62 = vadd.f32 %v1597_v17, %v1596_v18  ;;  %v2018_v32 = vpack.c.bf16 %v1573_v11, %v1573_v11  ;;  %v1603_v21 = vsel %vm725_vm0, %v1573_v11, 0.0 }
 0x1d4   : > { %1762 = vst.msk [vmem:[%s3277_s14 + $0x30] sm:$0xf] %vm1749_vm13, %v2015_v48  ;;  %v1599_v23 = vsel %vm725_vm0, %v1571_v58, 0.0  ;;  %v2016_v2 = vpack.c.bf16 %v1571_v58, %v1571_v58 }
 0x1d5   : > { %1765 = vst.msk [vmem:[%s3277_s14 + $0x3c] sm:$0xf] %vm1749_vm13, %v2018_v32  ;;  %v1600_v6 = vadd.f32 %v1599_v23, %v1598_v62 }
 0x1d6   : > { %1763 = vst.msk [vmem:[%s3277_s14 + $0x34] sm:$0xf] %vm1749_vm13, %v2016_v2 }
 0x1d7   : > { %v1602_v60 = vadd.f32 %v1601_v7, %v1600_v6 }
 0x1d9   : > { %v1604_v43 = vadd.f32 %v1603_v21, %v1602_v60 }
 0x1db   : > { %v1605_v22 = vrot.slane %v1604_v43, 4 }
 0x1dd   : > { %v1606_v33 = vadd.f32 %v1605_v22, %v1604_v43 }
 0x1df   : > { %v1607_v34 = vrot.slane %v1606_v33, 2 }
 0x1e1   : > { %v1608_v40 = vadd.f32 %v1607_v34, %v1606_v33 }
 0x1e3   : > { %v1609_v27 = vrot.slane %v1608_v40, 1 }
 0x1e5   : > { %v1610_v14 = vadd.f32 %v1609_v27, %v1608_v40 }
 0x1e7   : > { %v3395_v54 = vmul.f32 0.0078125, %v1610_v14 }
 0x1e9   : > { %v1612_v42 = vsub.f32 %v3280_v28, %v3395_v54  ;;  %v1613_v52 = vsub.f32 %v3290_v12, %v3395_v54  ;;  %v1614_v1 = vsub.f32 %v3270_v26, %v3395_v54  ;;  %v1616_v16 = vsub.f32 %v3316_v3, %v3395_v54 }
 0x1ea   : > { %v1617_v44 = vsub.f32 %v3328_v29, %v3395_v54  ;;  %v1618_v37 = vsub.f32 %v3311_v56, %v3395_v54  ;;  %v1619_v4 = vsub.f32 %v3321_v25, %v3395_v54  ;;  %v1620_v28 = vsub.f32 %v3352_v46, %v3395_v54 }
 0x1eb   : > { %v1621_v12 = vsub.f32 %v1567_v35, %v3395_v54  ;;  %v1622_v26 = vsub.f32 %v3349_v5, %v3395_v54  ;;  %v1623_v3 = vsub.f32 %v3357_v15, %v3395_v54  ;;  %v1624_v36 = vsub.f32 %v1570_v63, %v3395_v54 }
 0x1ec   : > { %v1625_v29 = vsub.f32 %v1571_v58, %v3395_v54  ;;  %v1626_v56 = vsub.f32 %v1572_v57, %v3395_v54  ;;  %v1627_v8 = vsub.f32 %v1573_v11, %v3395_v54  ;;  %v1615_v25 = vsub.f32 %v3285_v61, %v3395_v54 }
 0x1ed   : > { %v1628_v46 = vmul.f32 %v1612_v42, %v1612_v42  ;;  %v1629_v19 = vmul.f32 %v1613_v52, %v1613_v52  ;;  %v1630_v35 = vmul.f32 %v1614_v1, %v1614_v1  ;;  %v1632_v59 = vmul.f32 %v1616_v16, %v1616_v16 }
 0x1ee   : > { %v1631_v39 = vmul.f32 %v1615_v25, %v1615_v25  ;;  %v1633_v10 = vmul.f32 %v1617_v44, %v1617_v44  ;;  %v1634_v50 = vmul.f32 %v1618_v37, %v1618_v37  ;;  %v1635_v45 = vmul.f32 %v1619_v4, %v1619_v4 }
 0x1ef   : > { %v1644_v5 = vsel %vm725_vm0, %v1628_v46, 0.0  ;;  %v1645_v0 = vsel %vm725_vm0, %v1629_v19, 0.0  ;;  %v1647_v20 = vsel %vm725_vm0, %v1630_v35, 0.0  ;;  %v1651_v61 = vsel %vm725_vm0, %v1632_v59, 0.0 }
 0x1f0   : > { %v1646_v15 = vadd.f32 %v1645_v0, %v1644_v5  ;;  %v1649_v18 = vsel %vm725_vm0, %v1631_v39, 0.0  ;;  %v1653_v41 = vsel %vm725_vm0, %v1633_v10, 0.0  ;;  %v1636_v38 = vmul.f32 %v1620_v28, %v1620_v28 }
 0x1f1   : > { %v1655_v53 = vsel %vm725_vm0, %v1634_v50, 0.0  ;;  %v1637_v57 = vmul.f32 %v1621_v12, %v1621_v12  ;;  %v1657_v51 = vsel %vm725_vm0, %v1635_v45, 0.0  ;;  %v1638_v63 = vmul.f32 %v1622_v26, %v1622_v26 }
 0x1f2   : > { %v1648_v47 = vadd.f32 %v1647_v20, %v1646_v15  ;;  %v1659_v24 = vsel %vm725_vm0, %v1636_v38, 0.0  ;;  %v1639_v11 = vmul.f32 %v1623_v3, %v1623_v3  ;;  %v1640_v58 = vmul.f32 %v1624_v36, %v1624_v36 }
 0x1f3   : > { %v1661_v17 = vsel %vm725_vm0, %v1637_v57, 0.0  ;;  %v1663_v62 = vsel %vm725_vm0, %v1638_v63, 0.0  ;;  %v1641_v23 = vmul.f32 %v1625_v29, %v1625_v29  ;;  %v1642_v7 = vmul.f32 %v1626_v56, %v1626_v56 }
 0x1f4   : > { %v1650_v49 = vadd.f32 %v1649_v18, %v1648_v47  ;;  %v1665_v2 = vsel %vm725_vm0, %v1639_v11, 0.0  ;;  %v1667_v60 = vsel %vm725_vm0, %v1640_v58, 0.0  ;;  %v1643_v43 = vmul.f32 %v1627_v8, %v1627_v8 }
 0x1f5   : > { %v1669_v22 = vsel %vm725_vm0, %v1641_v23, 0.0  ;;  %v1671_v34 = vsel %vm725_vm0, %v1642_v7, 0.0 }
 0x1f6   : > { %v1652_v55 = vadd.f32 %v1651_v61, %v1650_v49  ;;  %v1673_v27 = vsel %vm725_vm0, %v1643_v43, 0.0 }
 0x1f8   : > { %v1654_v13 = vadd.f32 %v1653_v41, %v1652_v55 }
 0x1fa   : > { %v1656_v9 = vadd.f32 %v1655_v53, %v1654_v13 }
 0x1fc   : > { %v1658_v31 = vadd.f32 %v1657_v51, %v1656_v9 }
 0x1fe   : > { %v1660_v30 = vadd.f32 %v1659_v24, %v1658_v31 }
 0x200   : > { %v1662_v48 = vadd.f32 %v1661_v17, %v1660_v30 }
 0x202   : > { %v1664_v32 = vadd.f32 %v1663_v62, %v1662_v48 }
 0x204   : > { %v1666_v6 = vadd.f32 %v1665_v2, %v1664_v32 }
 0x206   : > { %v1668_v21 = vadd.f32 %v1667_v60, %v1666_v6 }
 0x208   : > { %v1670_v33 = vadd.f32 %v1669_v22, %v1668_v21 }
 0x20a   : > { %v1672_v40 = vadd.f32 %v1671_v34, %v1670_v33 }
 0x20c   : > { %v1674_v14 = vadd.f32 %v1673_v27, %v1672_v40 }
 0x20e   : > { %v1675_v42 = vrot.slane %v1674_v14, 4 }
 0x210   : > { %v1676_v52 = vadd.f32 %v1675_v42, %v1674_v14 }
 0x212   : > { %v1677_v1 = vrot.slane %v1676_v52, 2 }
 0x214   : > { %v1678_v16 = vadd.f32 %v1677_v1, %v1676_v52 }
 0x216   : > { %v1679_v44 = vrot.slane %v1678_v16, 1 }
 0x218   : > { %v1680_v37 = vadd.f32 %v1679_v44, %v1678_v16 }
 0x21a   : > { %v1682_v4 = vsel %vm1681_vm15, %v3395_v54, %v1680_v37 }
 0x21b   : > { %1684 = vst.msk [vmem:[%s377_s17] sm:$0x3] %vm1683_vm2, %v1682_v4 }
 0x21c PF: > { %s18_s28 = sadd.s32 1, %s2509_s28   ;;  %s3482_s24 = smov %s2501_s26 }
 0x21d   : > { %p15_p10 = scmp.ge.s32.totalorder %s18_s28, 6   ;;  %s3483_s25 = smov %s2505_s27 }
 0x21e   : > { %s3484_s26 = smov %s3487_s29  ;;  %s3485_s27 = smov %s3491_s30 }
 0x21f   :  { %17 = sbr.rel (!%p15_p10) target bundleno = 3 (0x3), region = 91 }

</bundles_post_ra>
